<compile_context>
chip_gen: v5e
topology: v5e:2x2
jax: 0.10.0
libtpu: 0.0.40
codegen_flags: <defaults>
</compile_context>

<pallas_src>
import functools

import jax
import jax.numpy as jnp
from jax.experimental import pallas as pl
from jax.experimental.pallas import tpu as pltpu


# --------------------------------------------------------------------------
# In-kernel helpers (traced inside the Pallas kernel bodies)
# --------------------------------------------------------------------------

def _layernorm(x, gamma, beta):
    xf = x.astype(jnp.float32)
    mu = jnp.mean(xf, axis=-1, keepdims=True)
    var = jnp.mean(jnp.square(xf - mu), axis=-1, keepdims=True)
    return (xf - mu) * jax.lax.rsqrt(var + 1e-5) * gamma + beta


def _mha(xn, cn, wq_ref, bq_ref, wk_ref, bk_ref, wv_ref, bv_ref,
         wo_ref, bo_ref, num_heads, cdt):
    """Multi-head attention on VMEM-resident, already-normalised inputs."""
    q = jnp.dot(xn, wq_ref[...], preferred_element_type=jnp.float32) + bq_ref[...]
    k = jnp.dot(cn, wk_ref[...], preferred_element_type=jnp.float32) + bk_ref[...]
    v = jnp.dot(cn, wv_ref[...], preferred_element_type=jnp.float32) + bv_ref[...]
    e = q.shape[-1]
    dh = e // num_heads
    scale = dh ** -0.5
    heads = []
    for h in range(num_heads):                      # static loop, static slices
        sl = slice(h * dh, (h + 1) * dh)
        qh = q[:, sl].astype(cdt)
        kh = k[:, sl].astype(cdt)
        vh = v[:, sl].astype(cdt)
        # q @ k^T without materialising a transpose
        s = jax.lax.dot_general(qh, kh, (((1,), (1,)), ((), ())),
                                preferred_element_type=jnp.float32) * scale
        s = s - jnp.max(s, axis=-1, keepdims=True)
        p = jnp.exp(s)
        p = p * pl.reciprocal(jnp.sum(p, axis=-1, keepdims=True), approx=True)
        heads.append(jnp.dot(p.astype(cdt), vh,
                             preferred_element_type=jnp.float32))
    attn = heads[0] if num_heads == 1 else jnp.concatenate(heads, axis=-1)
    return (jnp.dot(attn.astype(cdt), wo_ref[...],
                    preferred_element_type=jnp.float32) + bo_ref[...])


# --------------------------------------------------------------------------
# Fused block kernels
# --------------------------------------------------------------------------

def _cross_attn_block_kernel(x_ref, ctx_ref, lnq_g, lnq_b, lnk_g, lnk_b,
                             wq, bq, wk, bk, wv, bv, wo, bo, o_ref,
                             *, num_heads, add_residual):
    cdt = x_ref.dtype
    x = x_ref[0]                                     # (Lq, Dq)
    xn = _layernorm(x, lnq_g[...], lnq_b[...]).astype(cdt)
    cn = _layernorm(ctx_ref[0], lnk_g[...], lnk_b[...]).astype(cdt)
    out = _mha(xn, cn, wq, bq, wk, bk, wv, bv, wo, bo, num_heads, cdt)
    if add_residual:                                 # residual folded in-kernel
        out = out + x.astype(jnp.float32)
    o_ref[0] = out.astype(o_ref.dtype)


def _self_attn_block_kernel(x_ref, ln_g, ln_b,
                            wq, bq, wk, bk, wv, bv, wo, bo, o_ref,
                            *, num_heads):
    cdt = x_ref.dtype
    x = x_ref[0]                                     # (L, D)
    xn = _layernorm(x, ln_g[...], ln_b[...]).astype(cdt)
    out = _mha(xn, xn, wq, bq, wk, bk, wv, bv, wo, bo, num_heads, cdt)
    o_ref[0] = (out + x.astype(jnp.float32)).astype(o_ref.dtype)


def _ff_block_kernel(x_ref, ln_g, ln_b, w1, b1, w2, b2, o_ref):
    cdt = x_ref.dtype
    x = x_ref[0]                                     # (L, D)
    xn = _layernorm(x, ln_g[...], ln_b[...]).astype(cdt)
    h = jnp.dot(xn, w1[...], preferred_element_type=jnp.float32) + b1[...]
    # TODO(synk): torch.nn.GELU defaults to exact erf GELU; tanh approximation
    # used here for robust EUP lowering (differs at ~1e-3 level).
    h = jax.nn.gelu(h, approximate=True).astype(cdt)
    out = jnp.dot(h, w2[...], preferred_element_type=jnp.float32) + b2[...]
    o_ref[0] = (out + x.astype(jnp.float32)).astype(o_ref.dtype)


# --------------------------------------------------------------------------
# pallas_call wrappers (grid over batch, parallel)
# --------------------------------------------------------------------------

_PARALLEL = pltpu.CompilerParams(dimension_semantics=("parallel",))


def _rep_spec(shape):
    """Spec for an array shared (resident) across all grid steps."""
    zeros = (0,) * len(shape)
    return pl.BlockSpec(shape, lambda i: zeros)


def _batched_spec(shape):
    """Spec for a (B, L, D) array tiled along the batch axis."""
    return pl.BlockSpec(shape, lambda i: (i, 0, 0))


def cross_attention_block(x, ctx, p, num_heads, *, add_residual):
    b, lq, dq = x.shape
    _, lk, dk = ctx.shape
    e = p["wq"].shape[1]
    kernel = functools.partial(_cross_attn_block_kernel,
                               num_heads=num_heads, add_residual=add_residual)
    return pl.pallas_call(
        kernel,
        out_shape=jax.ShapeDtypeStruct((b, lq, dq), x.dtype),
        grid=(b,),
        in_specs=[
            _batched_spec((1, lq, dq)),
            _batched_spec((1, lk, dk)),
            _rep_spec((1, dq)), _rep_spec((1, dq)),
            _rep_spec((1, dk)), _rep_spec((1, dk)),
            _rep_spec((dq, e)), _rep_spec((1, e)),
            _rep_spec((dk, e)), _rep_spec((1, e)),
            _rep_spec((dk, e)), _rep_spec((1, e)),
            _rep_spec((e, dq)), _rep_spec((1, dq)),
        ],
        out_specs=_batched_spec((1, lq, dq)),
        compiler_params=_PARALLEL,
    )(x, ctx,
      p["ln_q_g"].reshape(1, dq), p["ln_q_b"].reshape(1, dq),
      p["ln_k_g"].reshape(1, dk), p["ln_k_b"].reshape(1, dk),
      p["wq"], p["bq"].reshape(1, e),
      p["wk"], p["bk"].reshape(1, e),
      p["wv"], p["bv"].reshape(1, e),
      p["wo"], p["bo"].reshape(1, dq))


def self_attention_block(x, p, num_heads):
    b, lq, dq = x.shape
    e = p["wq"].shape[1]
    kernel = functools.partial(_self_attn_block_kernel, num_heads=num_heads)
    return pl.pallas_call(
        kernel,
        out_shape=jax.ShapeDtypeStruct((b, lq, dq), x.dtype),
        grid=(b,),
        in_specs=[
            _batched_spec((1, lq, dq)),
            _rep_spec((1, dq)), _rep_spec((1, dq)),
            _rep_spec((dq, e)), _rep_spec((1, e)),
            _rep_spec((dq, e)), _rep_spec((1, e)),
            _rep_spec((dq, e)), _rep_spec((1, e)),
            _rep_spec((e, dq)), _rep_spec((1, dq)),
        ],
        out_specs=_batched_spec((1, lq, dq)),
        compiler_params=_PARALLEL,
    )(x,
      p["ln_q_g"].reshape(1, dq), p["ln_q_b"].reshape(1, dq),
      p["wq"], p["bq"].reshape(1, e),
      p["wk"], p["bk"].reshape(1, e),
      p["wv"], p["bv"].reshape(1, e),
      p["wo"], p["bo"].reshape(1, dq))


def feedforward_block(x, p):
    b, lq, d = x.shape
    f = p["w1"].shape[1]
    return pl.pallas_call(
        _ff_block_kernel,
        out_shape=jax.ShapeDtypeStruct((b, lq, d), x.dtype),
        grid=(b,),
        in_specs=[
            _batched_spec((1, lq, d)),
            _rep_spec((1, d)), _rep_spec((1, d)),
            _rep_spec((d, f)), _rep_spec((1, f)),
            _rep_spec((f, d)), _rep_spec((1, d)),
        ],
        out_specs=_batched_spec((1, lq, d)),
        compiler_params=_PARALLEL,
    )(x,
      p["ln_g"].reshape(1, d), p["ln_b"].reshape(1, d),
      p["w1"], p["b1"].reshape(1, f),
      p["w2"], p["b2"].reshape(1, d))


# --------------------------------------------------------------------------
# PerceiverIO forward (composition only; each block is one fused kernel)
# --------------------------------------------------------------------------

def perceiver_io_forward(params, net, cfg):
    b = net.shape[0]
    lat = jnp.broadcast_to(params["in_latent"][None],
                           (b,) + params["in_latent"].shape)
    for layer in params["layers"]:
        lat = cross_attention_block(lat, net, layer["cross_attn"],
                                    cfg["num_cross_heads"], add_residual=True)
        lat = feedforward_block(lat, layer["cross_ff"])
        for blk in layer["self_blocks"]:
            lat = self_attention_block(lat, blk["attn"],
                                       cfg["num_latent_heads"])
            lat = feedforward_block(lat, blk["ff"])
    out_q = jnp.broadcast_to(params["out_latent"][None],
                             (b,) + params["out_latent"].shape)
    # decoder cross-attention has no residual (matches the PyTorch forward)
    return cross_attention_block(out_q, lat, params["decoder"],
                                 cfg["num_cross_heads"], add_residual=False)


# --------------------------------------------------------------------------
# Deterministic parameter construction
# --------------------------------------------------------------------------

def _dense(key, din, dout, scale=0.02):
    return scale * jax.random.normal(key, (din, dout), jnp.float32)


def make_attn_params(key, q_dim, k_dim, embed_dim):
    ks = jax.random.split(key, 4)
    return dict(
        ln_q_g=jnp.ones((q_dim,), jnp.float32),
        ln_q_b=jnp.zeros((q_dim,), jnp.float32),
        ln_k_g=jnp.ones((k_dim,), jnp.float32),
        ln_k_b=jnp.zeros((k_dim,), jnp.float32),
        wq=_dense(ks[0], q_dim, embed_dim), bq=jnp.zeros((embed_dim,), jnp.float32),
        wk=_dense(ks[1], k_dim, embed_dim), bk=jnp.zeros((embed_dim,), jnp.float32),
        wv=_dense(ks[2], k_dim, embed_dim), bv=jnp.zeros((embed_dim,), jnp.float32),
        wo=_dense(ks[3], embed_dim, q_dim), bo=jnp.zeros((q_dim,), jnp.float32),
    )


def make_ff_params(key, dim, ff_dim):
    k1, k2 = jax.random.split(key)
    return dict(
        ln_g=jnp.ones((dim,), jnp.float32),
        ln_b=jnp.zeros((dim,), jnp.float32),
        w1=_dense(k1, dim, ff_dim), b1=jnp.zeros((ff_dim,), jnp.float32),
        w2=_dense(k2, ff_dim, dim), b2=jnp.zeros((dim,), jnp.float32),
    )


def make_perceiver_params(key, cfg):
    latent_dim = cfg["latent_dim"]
    input_dim = cfg["input_dim"]
    output_dim = cfg["output_dim"]
    ff_dim = int(round(latent_dim * cfg["feedforward_dim_ratio"]))
    keys = jax.random.split(key, 4 + cfg["num_layers"])
    layers = []
    for i in range(cfg["num_layers"]):
        lk = jax.random.split(keys[4 + i], 2 + 2 * cfg["num_self_attn_repeat"])
        self_blocks = []
        for r in range(cfg["num_self_attn_repeat"]):
            self_blocks.append(dict(
                attn=make_attn_params(lk[2 + 2 * r], latent_dim, latent_dim,
                                      latent_dim),
                ff=make_ff_params(lk[3 + 2 * r], latent_dim, ff_dim),
            ))
        layers.append(dict(
            cross_attn=make_attn_params(lk[0], latent_dim, input_dim, latent_dim),
            cross_ff=make_ff_params(lk[1], latent_dim, ff_dim),
            self_blocks=self_blocks,
        ))
    return dict(
        in_latent=jax.random.normal(keys[0],
                                    (cfg["num_latents"], latent_dim), jnp.float32),
        out_latent=jax.random.normal(keys[1],
                                     (cfg["num_output"], output_dim), jnp.float32),
        decoder=make_attn_params(keys[2], output_dim, latent_dim, latent_dim),
        layers=layers,
    )


# --------------------------------------------------------------------------
# Main
# --------------------------------------------------------------------------

if __name__ == "__main__":
    cfg = dict(
        input_dim=16,
        num_layers=2,
        num_latents=16,
        latent_dim=32,
        output_dim=32,
        num_output=8,
        num_cross_heads=1,
        num_latent_heads=4,
        feedforward_dim_ratio=2.0,
        num_self_attn_repeat=1,
    )

    key = jax.random.PRNGKey(0)
    k_param, k_net = jax.random.split(key)
    params = make_perceiver_params(k_param, cfg)

    # net: (B, S, input_dim)
    net = jax.random.normal(k_net, (2, 8, cfg["input_dim"]), jnp.float32)

    fwd = jax.jit(functools.partial(perceiver_io_forward, cfg=cfg))
    out = jax.block_until_ready(fwd(params, net))

    assert out.shape == (2, cfg["num_output"], cfg["output_dim"])
    assert bool(jnp.all(jnp.isfinite(out)))
    print("KERNEL_OK")
</pallas_src>

<mosaic_0001>
module attributes {stable_mosaic.version = 11 : i64} {
  func.func @_ff_block_kernel(%arg0: i32, %arg1: memref<1x16x32xf32, #tpu.memory_space<vmem>>, %arg2: memref<1x32xf32, #tpu.memory_space<vmem>>, %arg3: memref<1x32xf32, #tpu.memory_space<vmem>>, %arg4: memref<32x64xf32, #tpu.memory_space<vmem>>, %arg5: memref<1x64xf32, #tpu.memory_space<vmem>>, %arg6: memref<64x32xf32, #tpu.memory_space<vmem>>, %arg7: memref<1x32xf32, #tpu.memory_space<vmem>>, %arg8: memref<1x16x32xf32, #tpu.memory_space<vmem>>) attributes {dimension_semantics = [#tpu.dimension_semantics<parallel>], iteration_bounds = array<i64: 2>, scalar_prefetch = 0 : i64, scratch_operands = 0 : i64, tpu.core_type = #tpu.core_type<tc>, window_params = [{transform_indices = @transform_0, window_bounds = array<i64: 1, 16, 32>}, {pipeline_mode = #tpu.pipeline_mode<synchronous>, transform_indices = @transform_1, window_bounds = array<i64: 1, 32>}, {pipeline_mode = #tpu.pipeline_mode<synchronous>, transform_indices = @transform_2, window_bounds = array<i64: 1, 32>}, {pipeline_mode = #tpu.pipeline_mode<synchronous>, transform_indices = @transform_3, window_bounds = array<i64: 32, 64>}, {pipeline_mode = #tpu.pipeline_mode<synchronous>, transform_indices = @transform_4, window_bounds = array<i64: 1, 64>}, {pipeline_mode = #tpu.pipeline_mode<synchronous>, transform_indices = @transform_5, window_bounds = array<i64: 64, 32>}, {pipeline_mode = #tpu.pipeline_mode<synchronous>, transform_indices = @transform_6, window_bounds = array<i64: 1, 32>}, {transform_indices = @transform_7, window_bounds = array<i64: 1, 16, 32>}]} {
    %c0 = arith.constant 0 : index
    %c0_0 = arith.constant 0 : index
    %c0_1 = arith.constant 0 : index
    %0 = vector.load %arg1[%c0, %c0_0, %c0_1] : memref<1x16x32xf32, #tpu.memory_space<vmem>>, vector<1x16x32xf32>
    %1 = vector.shape_cast %0 : vector<1x16x32xf32> to vector<16x32xf32>
    %c0_2 = arith.constant 0 : index
    %c0_3 = arith.constant 0 : index
    %2 = vector.load %arg2[%c0_2, %c0_3] : memref<1x32xf32, #tpu.memory_space<vmem>>, vector<1x32xf32>
    %c0_4 = arith.constant 0 : index
    %c0_5 = arith.constant 0 : index
    %3 = vector.load %arg3[%c0_4, %c0_5] : memref<1x32xf32, #tpu.memory_space<vmem>>, vector<1x32xf32>
    %cst = arith.constant dense<0.000000e+00> : vector<16xf32>
    %4 = vector.multi_reduction <add>, %1, %cst [1] : vector<16x32xf32> to vector<16xf32>
    %5 = vector.shape_cast %4 : vector<16xf32> to vector<16x1xf32>
    %cst_6 = arith.constant 3.200000e+01 : f32
    %6 = vector.broadcast %cst_6 : f32 to vector<16x1xf32>
    %7 = arith.divf %5, %6 : vector<16x1xf32>
    %8 = vector.broadcast %7 : vector<16x1xf32> to vector<16x32xf32>
    %9 = arith.subf %1, %8 : vector<16x32xf32>
    %10 = arith.mulf %9, %9 : vector<16x32xf32>
    %cst_7 = arith.constant dense<0.000000e+00> : vector<16xf32>
    %11 = vector.multi_reduction <add>, %10, %cst_7 [1] : vector<16x32xf32> to vector<16xf32>
    %12 = vector.shape_cast %11 : vector<16xf32> to vector<16x1xf32>
    %cst_8 = arith.constant 3.200000e+01 : f32
    %13 = vector.broadcast %cst_8 : f32 to vector<16x1xf32>
    %14 = arith.divf %12, %13 : vector<16x1xf32>
    %15 = vector.broadcast %7 : vector<16x1xf32> to vector<16x32xf32>
    %16 = arith.subf %1, %15 : vector<16x32xf32>
    %cst_9 = arith.constant 9.99999974E-6 : f32
    %17 = vector.broadcast %cst_9 : f32 to vector<16x1xf32>
    %18 = arith.addf %14, %17 : vector<16x1xf32>
    %19 = math.rsqrt %18 : vector<16x1xf32>
    %20 = vector.broadcast %19 : vector<16x1xf32> to vector<16x32xf32>
    %21 = arith.mulf %16, %20 : vector<16x32xf32>
    %22 = vector.broadcast %2 : vector<1x32xf32> to vector<16x32xf32>
    %23 = arith.mulf %21, %22 : vector<16x32xf32>
    %24 = vector.broadcast %3 : vector<1x32xf32> to vector<16x32xf32>
    %25 = arith.addf %23, %24 : vector<16x32xf32>
    %c0_10 = arith.constant 0 : index
    %c0_11 = arith.constant 0 : index
    %26 = vector.load %arg4[%c0_10, %c0_11] : memref<32x64xf32, #tpu.memory_space<vmem>>, vector<32x64xf32>
    %cst_12 = arith.constant dense<0.000000e+00> : vector<16x64xf32>
    %27 = tpu.matmul %25, %26, %cst_12 {dimension_numbers = #tpu.dot_dimension_numbers<[1], [0], [0], [1], [0, 0, 1, 1], [], []>} : vector<16x32xf32>, vector<32x64xf32>, vector<16x64xf32> -> vector<16x64xf32>
    %c0_13 = arith.constant 0 : index
    %c0_14 = arith.constant 0 : index
    %28 = vector.load %arg5[%c0_13, %c0_14] : memref<1x64xf32, #tpu.memory_space<vmem>>, vector<1x64xf32>
    %29 = vector.broadcast %28 : vector<1x64xf32> to vector<16x64xf32>
    %30 = arith.addf %27, %29 : vector<16x64xf32>
    %31 = arith.mulf %30, %30 : vector<16x64xf32>
    %32 = arith.mulf %30, %31 : vector<16x64xf32>
    %cst_15 = arith.constant 4.471500e-02 : f32
    %33 = vector.broadcast %cst_15 : f32 to vector<16x64xf32>
    %34 = arith.mulf %33, %32 : vector<16x64xf32>
    %35 = arith.addf %30, %34 : vector<16x64xf32>
    %cst_16 = arith.constant 0.797884583 : f32
    %36 = vector.broadcast %cst_16 : f32 to vector<16x64xf32>
    %37 = arith.mulf %36, %35 : vector<16x64xf32>
    %38 = math.tanh %37 : vector<16x64xf32>
    %cst_17 = arith.constant 1.000000e+00 : f32
    %39 = vector.broadcast %cst_17 : f32 to vector<16x64xf32>
    %40 = arith.addf %39, %38 : vector<16x64xf32>
    %cst_18 = arith.constant 5.000000e-01 : f32
    %41 = vector.broadcast %cst_18 : f32 to vector<16x64xf32>
    %42 = arith.mulf %41, %40 : vector<16x64xf32>
    %43 = arith.mulf %30, %42 : vector<16x64xf32>
    %c0_19 = arith.constant 0 : index
    %c0_20 = arith.constant 0 : index
    %44 = vector.load %arg6[%c0_19, %c0_20] : memref<64x32xf32, #tpu.memory_space<vmem>>, vector<64x32xf32>
    %cst_21 = arith.constant dense<0.000000e+00> : vector<16x32xf32>
    %45 = tpu.matmul %43, %44, %cst_21 {dimension_numbers = #tpu.dot_dimension_numbers<[1], [0], [0], [1], [0, 0, 1, 1], [], []>} : vector<16x64xf32>, vector<64x32xf32>, vector<16x32xf32> -> vector<16x32xf32>
    %c0_22 = arith.constant 0 : index
    %c0_23 = arith.constant 0 : index
    %46 = vector.load %arg7[%c0_22, %c0_23] : memref<1x32xf32, #tpu.memory_space<vmem>>, vector<1x32xf32>
    %47 = vector.broadcast %46 : vector<1x32xf32> to vector<16x32xf32>
    %48 = arith.addf %45, %47 : vector<16x32xf32>
    %49 = arith.addf %48, %1 : vector<16x32xf32>
    %c0_24 = arith.constant 0 : index
    %c0_25 = arith.constant 0 : index
    %c0_26 = arith.constant 0 : index
    %50 = vector.load %arg8[%c0_24, %c0_25, %c0_26] : memref<1x16x32xf32, #tpu.memory_space<vmem>>, vector<1x16x32xf32>
    %51 = vector.shape_cast %50 : vector<1x16x32xf32> to vector<16x32xf32>
    %52 = vector.shape_cast %49 : vector<16x32xf32> to vector<1x16x32xf32>
    tpu.vector_store %arg8[%c0_24, %c0_25, %c0_26], %52 {strides = array<i32>} : memref<1x16x32xf32, #tpu.memory_space<vmem>>, vector<1x16x32xf32>,
    return
  }
  func.func @transform_0(%arg0: i32) -> (i32, i32, i32) {
    %c0_i32 = arith.constant 0 : i32
    %c0_i32_0 = arith.constant 0 : i32
    %c0_i32_1 = arith.constant 0 : i32
    return %arg0, %c0_i32, %c0_i32_0 : i32, i32, i32
  }
  func.func @transform_1(%arg0: i32) -> (i32, i32) {
    %c0_i32 = arith.constant 0 : i32
    %c0_i32_0 = arith.constant 0 : i32
    %c0_i32_1 = arith.constant 0 : i32
    return %c0_i32, %c0_i32_0 : i32, i32
  }
  func.func @transform_2(%arg0: i32) -> (i32, i32) {
    %c0_i32 = arith.constant 0 : i32
    %c0_i32_0 = arith.constant 0 : i32
    %c0_i32_1 = arith.constant 0 : i32
    return %c0_i32, %c0_i32_0 : i32, i32
  }
  func.func @transform_3(%arg0: i32) -> (i32, i32) {
    %c0_i32 = arith.constant 0 : i32
    %c0_i32_0 = arith.constant 0 : i32
    %c0_i32_1 = arith.constant 0 : i32
    return %c0_i32, %c0_i32_0 : i32, i32
  }
  func.func @transform_4(%arg0: i32) -> (i32, i32) {
    %c0_i32 = arith.constant 0 : i32
    %c0_i32_0 = arith.constant 0 : i32
    %c0_i32_1 = arith.constant 0 : i32
    return %c0_i32, %c0_i32_0 : i32, i32
  }
  func.func @transform_5(%arg0: i32) -> (i32, i32) {
    %c0_i32 = arith.constant 0 : i32
    %c0_i32_0 = arith.constant 0 : i32
    %c0_i32_1 = arith.constant 0 : i32
    return %c0_i32, %c0_i32_0 : i32, i32
  }
  func.func @transform_6(%arg0: i32) -> (i32, i32) {
    %c0_i32 = arith.constant 0 : i32
    %c0_i32_0 = arith.constant 0 : i32
    %c0_i32_1 = arith.constant 0 : i32
    return %c0_i32, %c0_i32_0 : i32, i32
  }
  func.func @transform_7(%arg0: i32) -> (i32, i32, i32) {
    %c0_i32 = arith.constant 0 : i32
    %c0_i32_0 = arith.constant 0 : i32
    %c0_i32_1 = arith.constant 0 : i32
    return %arg0, %c0_i32, %c0_i32_0 : i32, i32, i32
  }
}

module attributes {stable_mosaic.version = 11 : i64} {
  func.func @_cross_attn_block_kernel(%arg0: i32, %arg1: memref<1x16x32xf32, #tpu.memory_space<vmem>>, %arg2: memref<1x8x16xf32, #tpu.memory_space<vmem>>, %arg3: memref<1x32xf32, #tpu.memory_space<vmem>>, %arg4: memref<1x32xf32, #tpu.memory_space<vmem>>, %arg5: memref<1x16xf32, #tpu.memory_space<vmem>>, %arg6: memref<1x16xf32, #tpu.memory_space<vmem>>, %arg7: memref<32x32xf32, #tpu.memory_space<vmem>>, %arg8: memref<1x32xf32, #tpu.memory_space<vmem>>, %arg9: memref<16x32xf32, #tpu.memory_space<vmem>>, %arg10: memref<1x32xf32, #tpu.memory_space<vmem>>, %arg11: memref<16x32xf32, #tpu.memory_space<vmem>>, %arg12: memref<1x32xf32, #tpu.memory_space<vmem>>, %arg13: memref<32x32xf32, #tpu.memory_space<vmem>>, %arg14: memref<1x32xf32, #tpu.memory_space<vmem>>, %arg15: memref<1x16x32xf32, #tpu.memory_space<vmem>>) attributes {dimension_semantics = [#tpu.dimension_semantics<parallel>], iteration_bounds = array<i64: 2>, scalar_prefetch = 0 : i64, scratch_operands = 0 : i64, tpu.core_type = #tpu.core_type<tc>, window_params = [{transform_indices = @transform_0, window_bounds = array<i64: 1, 16, 32>}, {transform_indices = @transform_1, window_bounds = array<i64: 1, 8, 16>}, {pipeline_mode = #tpu.pipeline_mode<synchronous>, transform_indices = @transform_2, window_bounds = array<i64: 1, 32>}, {pipeline_mode = #tpu.pipeline_mode<synchronous>, transform_indices = @transform_3, window_bounds = array<i64: 1, 32>}, {pipeline_mode = #tpu.pipeline_mode<synchronous>, transform_indices = @transform_4, window_bounds = array<i64: 1, 16>}, {pipeline_mode = #tpu.pipeline_mode<synchronous>, transform_indices = @transform_5, window_bounds = array<i64: 1, 16>}, {pipeline_mode = #tpu.pipeline_mode<synchronous>, transform_indices = @transform_6, window_bounds = array<i64: 32, 32>}, {pipeline_mode = #tpu.pipeline_mode<synchronous>, transform_indices = @transform_7, window_bounds = array<i64: 1, 32>}, {pipeline_mode = #tpu.pipeline_mode<synchronous>, transform_indices = @transform_8, window_bounds = array<i64: 16, 32>}, {pipeline_mode = #tpu.pipeline_mode<synchronous>, transform_indices = @transform_9, window_bounds = array<i64: 1, 32>}, {pipeline_mode = #tpu.pipeline_mode<synchronous>, transform_indices = @transform_10, window_bounds = array<i64: 16, 32>}, {pipeline_mode = #tpu.pipeline_mode<synchronous>, transform_indices = @transform_11, window_bounds = array<i64: 1, 32>}, {pipeline_mode = #tpu.pipeline_mode<synchronous>, transform_indices = @transform_12, window_bounds = array<i64: 32, 32>}, {pipeline_mode = #tpu.pipeline_mode<synchronous>, transform_indices = @transform_13, window_bounds = array<i64: 1, 32>}, {transform_indices = @transform_14, window_bounds = array<i64: 1, 16, 32>}]} {
    %c0 = arith.constant 0 : index
    %c0_0 = arith.constant 0 : index
    %c0_1 = arith.constant 0 : index
    %0 = vector.load %arg1[%c0, %c0_0, %c0_1] : memref<1x16x32xf32, #tpu.memory_space<vmem>>, vector<1x16x32xf32>
    %1 = vector.shape_cast %0 : vector<1x16x32xf32> to vector<16x32xf32>
    %c0_2 = arith.constant 0 : index
    %c0_3 = arith.constant 0 : index
    %2 = vector.load %arg3[%c0_2, %c0_3] : memref<1x32xf32, #tpu.memory_space<vmem>>, vector<1x32xf32>
    %c0_4 = arith.constant 0 : index
    %c0_5 = arith.constant 0 : index
    %3 = vector.load %arg4[%c0_4, %c0_5] : memref<1x32xf32, #tpu.memory_space<vmem>>, vector<1x32xf32>
    %cst = arith.constant dense<0.000000e+00> : vector<16xf32>
    %4 = vector.multi_reduction <add>, %1, %cst [1] : vector<16x32xf32> to vector<16xf32>
    %5 = vector.shape_cast %4 : vector<16xf32> to vector<16x1xf32>
    %cst_6 = arith.constant 3.200000e+01 : f32
    %6 = vector.broadcast %cst_6 : f32 to vector<16x1xf32>
    %7 = arith.divf %5, %6 : vector<16x1xf32>
    %8 = vector.broadcast %7 : vector<16x1xf32> to vector<16x32xf32>
    %9 = arith.subf %1, %8 : vector<16x32xf32>
    %10 = arith.mulf %9, %9 : vector<16x32xf32>
    %cst_7 = arith.constant dense<0.000000e+00> : vector<16xf32>
    %11 = vector.multi_reduction <add>, %10, %cst_7 [1] : vector<16x32xf32> to vector<16xf32>
    %12 = vector.shape_cast %11 : vector<16xf32> to vector<16x1xf32>
    %cst_8 = arith.constant 3.200000e+01 : f32
    %13 = vector.broadcast %cst_8 : f32 to vector<16x1xf32>
    %14 = arith.divf %12, %13 : vector<16x1xf32>
    %15 = vector.broadcast %7 : vector<16x1xf32> to vector<16x32xf32>
    %16 = arith.subf %1, %15 : vector<16x32xf32>
    %cst_9 = arith.constant 9.99999974E-6 : f32
    %17 = vector.broadcast %cst_9 : f32 to vector<16x1xf32>
    %18 = arith.addf %14, %17 : vector<16x1xf32>
    %19 = math.rsqrt %18 : vector<16x1xf32>
    %20 = vector.broadcast %19 : vector<16x1xf32> to vector<16x32xf32>
    %21 = arith.mulf %16, %20 : vector<16x32xf32>
    %22 = vector.broadcast %2 : vector<1x32xf32> to vector<16x32xf32>
    %23 = arith.mulf %21, %22 : vector<16x32xf32>
    %24 = vector.broadcast %3 : vector<1x32xf32> to vector<16x32xf32>
    %25 = arith.addf %23, %24 : vector<16x32xf32>
    %c0_10 = arith.constant 0 : index
    %c0_11 = arith.constant 0 : index
    %c0_12 = arith.constant 0 : index
    %26 = vector.load %arg2[%c0_10, %c0_11, %c0_12] : memref<1x8x16xf32, #tpu.memory_space<vmem>>, vector<1x8x16xf32>
    %27 = vector.shape_cast %26 : vector<1x8x16xf32> to vector<8x16xf32>
    %c0_13 = arith.constant 0 : index
    %c0_14 = arith.constant 0 : index
    %28 = vector.load %arg5[%c0_13, %c0_14] : memref<1x16xf32, #tpu.memory_space<vmem>>, vector<1x16xf32>
    %c0_15 = arith.constant 0 : index
    %c0_16 = arith.constant 0 : index
    %29 = vector.load %arg6[%c0_15, %c0_16] : memref<1x16xf32, #tpu.memory_space<vmem>>, vector<1x16xf32>
    %cst_17 = arith.constant dense<0.000000e+00> : vector<8xf32>
    %30 = vector.multi_reduction <add>, %27, %cst_17 [1] : vector<8x16xf32> to vector<8xf32>
    %31 = vector.shape_cast %30 : vector<8xf32> to vector<8x1xf32>
    %cst_18 = arith.constant 1.600000e+01 : f32
    %32 = vector.broadcast %cst_18 : f32 to vector<8x1xf32>
    %33 = arith.divf %31, %32 : vector<8x1xf32>
    %34 = vector.broadcast %33 : vector<8x1xf32> to vector<8x16xf32>
    %35 = arith.subf %27, %34 : vector<8x16xf32>
    %36 = arith.mulf %35, %35 : vector<8x16xf32>
    %cst_19 = arith.constant dense<0.000000e+00> : vector<8xf32>
    %37 = vector.multi_reduction <add>, %36, %cst_19 [1] : vector<8x16xf32> to vector<8xf32>
    %38 = vector.shape_cast %37 : vector<8xf32> to vector<8x1xf32>
    %cst_20 = arith.constant 1.600000e+01 : f32
    %39 = vector.broadcast %cst_20 : f32 to vector<8x1xf32>
    %40 = arith.divf %38, %39 : vector<8x1xf32>
    %41 = vector.broadcast %33 : vector<8x1xf32> to vector<8x16xf32>
    %42 = arith.subf %27, %41 : vector<8x16xf32>
    %cst_21 = arith.constant 9.99999974E-6 : f32
    %43 = vector.broadcast %cst_21 : f32 to vector<8x1xf32>
    %44 = arith.addf %40, %43 : vector<8x1xf32>
    %45 = math.rsqrt %44 : vector<8x1xf32>
    %46 = vector.broadcast %45 : vector<8x1xf32> to vector<8x16xf32>
    %47 = arith.mulf %42, %46 : vector<8x16xf32>
    %48 = vector.broadcast %28 : vector<1x16xf32> to vector<8x16xf32>
    %49 = arith.mulf %47, %48 : vector<8x16xf32>
    %50 = vector.broadcast %29 : vector<1x16xf32> to vector<8x16xf32>
    %51 = arith.addf %49, %50 : vector<8x16xf32>
    %c0_22 = arith.constant 0 : index
    %c0_23 = arith.constant 0 : index
    %52 = vector.load %arg7[%c0_22, %c0_23] : memref<32x32xf32, #tpu.memory_space<vmem>>, vector<32x32xf32>
    %cst_24 = arith.constant dense<0.000000e+00> : vector<16x32xf32>
    %53 = tpu.matmul %25, %52, %cst_24 {dimension_numbers = #tpu.dot_dimension_numbers<[1], [0], [0], [1], [0, 0, 1, 1], [], []>} : vector<16x32xf32>, vector<32x32xf32>, vector<16x32xf32> -> vector<16x32xf32>
    %c0_25 = arith.constant 0 : index
    %c0_26 = arith.constant 0 : index
    %54 = vector.load %arg8[%c0_25, %c0_26] : memref<1x32xf32, #tpu.memory_space<vmem>>, vector<1x32xf32>
    %55 = vector.broadcast %54 : vector<1x32xf32> to vector<16x32xf32>
    %56 = arith.addf %53, %55 : vector<16x32xf32>
    %c0_27 = arith.constant 0 : index
    %c0_28 = arith.constant 0 : index
    %57 = vector.load %arg9[%c0_27, %c0_28] : memref<16x32xf32, #tpu.memory_space<vmem>>, vector<16x32xf32>
    %cst_29 = arith.constant dense<0.000000e+00> : vector<8x32xf32>
    %58 = tpu.matmul %51, %57, %cst_29 {dimension_numbers = #tpu.dot_dimension_numbers<[1], [0], [0], [1], [0, 0, 1, 1], [], []>} : vector<8x16xf32>, vector<16x32xf32>, vector<8x32xf32> -> vector<8x32xf32>
    %c0_30 = arith.constant 0 : index
    %c0_31 = arith.constant 0 : index
    %59 = vector.load %arg10[%c0_30, %c0_31] : memref<1x32xf32, #tpu.memory_space<vmem>>, vector<1x32xf32>
    %60 = vector.broadcast %59 : vector<1x32xf32> to vector<8x32xf32>
    %61 = arith.addf %58, %60 : vector<8x32xf32>
    %c0_32 = arith.constant 0 : index
    %c0_33 = arith.constant 0 : index
    %62 = vector.load %arg11[%c0_32, %c0_33] : memref<16x32xf32, #tpu.memory_space<vmem>>, vector<16x32xf32>
    %cst_34 = arith.constant dense<0.000000e+00> : vector<8x32xf32>
    %63 = tpu.matmul %51, %62, %cst_34 {dimension_numbers = #tpu.dot_dimension_numbers<[1], [0], [0], [1], [0, 0, 1, 1], [], []>} : vector<8x16xf32>, vector<16x32xf32>, vector<8x32xf32> -> vector<8x32xf32>
    %c0_35 = arith.constant 0 : index
    %c0_36 = arith.constant 0 : index
    %64 = vector.load %arg12[%c0_35, %c0_36] : memref<1x32xf32, #tpu.memory_space<vmem>>, vector<1x32xf32>
    %65 = vector.broadcast %64 : vector<1x32xf32> to vector<8x32xf32>
    %66 = arith.addf %63, %65 : vector<8x32xf32>
    %cst_37 = arith.constant dense<0.000000e+00> : vector<16x8xf32>
    %67 = tpu.matmul %56, %61, %cst_37 {dimension_numbers = #tpu.dot_dimension_numbers<[1], [1], [0], [0], [0, 0, 1, 0], [], []>} : vector<16x32xf32>, vector<8x32xf32>, vector<16x8xf32> -> vector<16x8xf32>
    %cst_38 = arith.constant 0.176776692 : f32
    %68 = vector.broadcast %cst_38 : f32 to vector<16x8xf32>
    %69 = arith.mulf %67, %68 : vector<16x8xf32>
    %cst_39 = arith.constant dense<0xFF800000> : vector<16xf32>
    %70 = vector.multi_reduction <maximumf>, %69, %cst_39 [1] : vector<16x8xf32> to vector<16xf32>
    %71 = vector.shape_cast %70 : vector<16xf32> to vector<16x1xf32>
    %72 = vector.broadcast %71 : vector<16x1xf32> to vector<16x8xf32>
    %73 = arith.subf %69, %72 : vector<16x8xf32>
    %74 = math.exp %73 : vector<16x8xf32>
    %cst_40 = arith.constant dense<0.000000e+00> : vector<16xf32>
    %75 = vector.multi_reduction <add>, %74, %cst_40 [1] : vector<16x8xf32> to vector<16xf32>
    %76 = vector.shape_cast %75 : vector<16xf32> to vector<16x1xf32>
    %77 = tpu.reciprocal %76 {approx = true} : vector<16x1xf32> -> vector<16x1xf32>
    %78 = vector.broadcast %77 : vector<16x1xf32> to vector<16x8xf32>
    %79 = arith.mulf %74, %78 : vector<16x8xf32>
    %cst_41 = arith.constant dense<0.000000e+00> : vector<16x32xf32>
    %80 = tpu.matmul %79, %66, %cst_41 {dimension_numbers = #tpu.dot_dimension_numbers<[1], [0], [0], [1], [0, 0, 1, 1], [], []>} : vector<16x8xf32>, vector<8x32xf32>, vector<16x32xf32> -> vector<16x32xf32>
    %c0_42 = arith.constant 0 : index
    %c0_43 = arith.constant 0 : index
    %81 = vector.load %arg13[%c0_42, %c0_43] : memref<32x32xf32, #tpu.memory_space<vmem>>, vector<32x32xf32>
    %cst_44 = arith.constant dense<0.000000e+00> : vector<16x32xf32>
    %82 = tpu.matmul %80, %81, %cst_44 {dimension_numbers = #tpu.dot_dimension_numbers<[1], [0], [0], [1], [0, 0, 1, 1], [], []>} : vector<16x32xf32>, vector<32x32xf32>, vector<16x32xf32> -> vector<16x32xf32>
    %c0_45 = arith.constant 0 : index
    %c0_46 = arith.constant 0 : index
    %83 = vector.load %arg14[%c0_45, %c0_46] : memref<1x32xf32, #tpu.memory_space<vmem>>, vector<1x32xf32>
    %84 = vector.broadcast %83 : vector<1x32xf32> to vector<16x32xf32>
    %85 = arith.addf %82, %84 : vector<16x32xf32>
    %86 = arith.addf %85, %1 : vector<16x32xf32>
    %c0_47 = arith.constant 0 : index
    %c0_48 = arith.constant 0 : index
    %c0_49 = arith.constant 0 : index
    %87 = vector.load %arg15[%c0_47, %c0_48, %c0_49] : memref<1x16x32xf32, #tpu.memory_space<vmem>>, vector<1x16x32xf32>
    %88 = vector.shape_cast %87 : vector<1x16x32xf32> to vector<16x32xf32>
    %89 = vector.shape_cast %86 : vector<16x32xf32> to vector<1x16x32xf32>
    tpu.vector_store %arg15[%c0_47, %c0_48, %c0_49], %89 {strides = array<i32>} : memref<1x16x32xf32, #tpu.memory_space<vmem>>, vector<1x16x32xf32>,
    return
  }
  func.func @transform_0(%arg0: i32) -> (i32, i32, i32) {
    %c0_i32 = arith.constant 0 : i32
    %c0_i32_0 = arith.constant 0 : i32
    %c0_i32_1 = arith.constant 0 : i32
    return %arg0, %c0_i32, %c0_i32_0 : i32, i32, i32
  }
  func.func @transform_1(%arg0: i32) -> (i32, i32, i32) {
    %c0_i32 = arith.constant 0 : i32
    %c0_i32_0 = arith.constant 0 : i32
    %c0_i32_1 = arith.constant 0 : i32
    return %arg0, %c0_i32, %c0_i32_0 : i32, i32, i32
  }
  func.func @transform_2(%arg0: i32) -> (i32, i32) {
    %c0_i32 = arith.constant 0 : i32
    %c0_i32_0 = arith.constant 0 : i32
    %c0_i32_1 = arith.constant 0 : i32
    return %c0_i32, %c0_i32_0 : i32, i32
  }
  func.func @transform_3(%arg0: i32) -> (i32, i32) {
    %c0_i32 = arith.constant 0 : i32
    %c0_i32_0 = arith.constant 0 : i32
    %c0_i32_1 = arith.constant 0 : i32
    return %c0_i32, %c0_i32_0 : i32, i32
  }
  func.func @transform_4(%arg0: i32) -> (i32, i32) {
    %c0_i32 = arith.constant 0 : i32
    %c0_i32_0 = arith.constant 0 : i32
    %c0_i32_1 = arith.constant 0 : i32
    return %c0_i32, %c0_i32_0 : i32, i32
  }
  func.func @transform_5(%arg0: i32) -> (i32, i32) {
    %c0_i32 = arith.constant 0 : i32
    %c0_i32_0 = arith.constant 0 : i32
    %c0_i32_1 = arith.constant 0 : i32
    return %c0_i32, %c0_i32_0 : i32, i32
  }
  func.func @transform_6(%arg0: i32) -> (i32, i32) {
    %c0_i32 = arith.constant 0 : i32
    %c0_i32_0 = arith.constant 0 : i32
    %c0_i32_1 = arith.constant 0 : i32
    return %c0_i32, %c0_i32_0 : i32, i32
  }
  func.func @transform_7(%arg0: i32) -> (i32, i32) {
    %c0_i32 = arith.constant 0 : i32
    %c0_i32_0 = arith.constant 0 : i32
    %c0_i32_1 = arith.constant 0 : i32
    return %c0_i32, %c0_i32_0 : i32, i32
  }
  func.func @transform_8(%arg0: i32) -> (i32, i32) {
    %c0_i32 = arith.constant 0 : i32
    %c0_i32_0 = arith.constant 0 : i32
    %c0_i32_1 = arith.constant 0 : i32
    return %c0_i32, %c0_i32_0 : i32, i32
  }
  func.func @transform_9(%arg0: i32) -> (i32, i32) {
    %c0_i32 = arith.constant 0 : i32
    %c0_i32_0 = arith.constant 0 : i32
    %c0_i32_1 = arith.constant 0 : i32
    return %c0_i32, %c0_i32_0 : i32, i32
  }
  func.func @transform_10(%arg0: i32) -> (i32, i32) {
    %c0_i32 = arith.constant 0 : i32
    %c0_i32_0 = arith.constant 0 : i32
    %c0_i32_1 = arith.constant 0 : i32
    return %c0_i32, %c0_i32_0 : i32, i32
  }
  func.func @transform_11(%arg0: i32) -> (i32, i32) {
    %c0_i32 = arith.constant 0 : i32
    %c0_i32_0 = arith.constant 0 : i32
    %c0_i32_1 = arith.constant 0 : i32
    return %c0_i32, %c0_i32_0 : i32, i32
  }
  func.func @transform_12(%arg0: i32) -> (i32, i32) {
    %c0_i32 = arith.constant 0 : i32
    %c0_i32_0 = arith.constant 0 : i32
    %c0_i32_1 = arith.constant 0 : i32
    return %c0_i32, %c0_i32_0 : i32, i32
  }
  func.func @transform_13(%arg0: i32) -> (i32, i32) {
    %c0_i32 = arith.constant 0 : i32
    %c0_i32_0 = arith.constant 0 : i32
    %c0_i32_1 = arith.constant 0 : i32
    return %c0_i32, %c0_i32_0 : i32, i32
  }
  func.func @transform_14(%arg0: i32) -> (i32, i32, i32) {
    %c0_i32 = arith.constant 0 : i32
    %c0_i32_0 = arith.constant 0 : i32
    %c0_i32_1 = arith.constant 0 : i32
    return %arg0, %c0_i32, %c0_i32_0 : i32, i32, i32
  }
}

module attributes {stable_mosaic.version = 11 : i64} {
  func.func @_self_attn_block_kernel(%arg0: i32, %arg1: memref<1x16x32xf32, #tpu.memory_space<vmem>>, %arg2: memref<1x32xf32, #tpu.memory_space<vmem>>, %arg3: memref<1x32xf32, #tpu.memory_space<vmem>>, %arg4: memref<32x32xf32, #tpu.memory_space<vmem>>, %arg5: memref<1x32xf32, #tpu.memory_space<vmem>>, %arg6: memref<32x32xf32, #tpu.memory_space<vmem>>, %arg7: memref<1x32xf32, #tpu.memory_space<vmem>>, %arg8: memref<32x32xf32, #tpu.memory_space<vmem>>, %arg9: memref<1x32xf32, #tpu.memory_space<vmem>>, %arg10: memref<32x32xf32, #tpu.memory_space<vmem>>, %arg11: memref<1x32xf32, #tpu.memory_space<vmem>>, %arg12: memref<1x16x32xf32, #tpu.memory_space<vmem>>) attributes {dimension_semantics = [#tpu.dimension_semantics<parallel>], iteration_bounds = array<i64: 2>, scalar_prefetch = 0 : i64, scratch_operands = 0 : i64, tpu.core_type = #tpu.core_type<tc>, window_params = [{transform_indices = @transform_0, window_bounds = array<i64: 1, 16, 32>}, {pipeline_mode = #tpu.pipeline_mode<synchronous>, transform_indices = @transform_1, window_bounds = array<i64: 1, 32>}, {pipeline_mode = #tpu.pipeline_mode<synchronous>, transform_indices = @transform_2, window_bounds = array<i64: 1, 32>}, {pipeline_mode = #tpu.pipeline_mode<synchronous>, transform_indices = @transform_3, window_bounds = array<i64: 32, 32>}, {pipeline_mode = #tpu.pipeline_mode<synchronous>, transform_indices = @transform_4, window_bounds = array<i64: 1, 32>}, {pipeline_mode = #tpu.pipeline_mode<synchronous>, transform_indices = @transform_5, window_bounds = array<i64: 32, 32>}, {pipeline_mode = #tpu.pipeline_mode<synchronous>, transform_indices = @transform_6, window_bounds = array<i64: 1, 32>}, {pipeline_mode = #tpu.pipeline_mode<synchronous>, transform_indices = @transform_7, window_bounds = array<i64: 32, 32>}, {pipeline_mode = #tpu.pipeline_mode<synchronous>, transform_indices = @transform_8, window_bounds = array<i64: 1, 32>}, {pipeline_mode = #tpu.pipeline_mode<synchronous>, transform_indices = @transform_9, window_bounds = array<i64: 32, 32>}, {pipeline_mode = #tpu.pipeline_mode<synchronous>, transform_indices = @transform_10, window_bounds = array<i64: 1, 32>}, {transform_indices = @transform_11, window_bounds = array<i64: 1, 16, 32>}]} {
    %c0 = arith.constant 0 : index
    %c0_0 = arith.constant 0 : index
    %c0_1 = arith.constant 0 : index
    %0 = vector.load %arg1[%c0, %c0_0, %c0_1] : memref<1x16x32xf32, #tpu.memory_space<vmem>>, vector<1x16x32xf32>
    %1 = vector.shape_cast %0 : vector<1x16x32xf32> to vector<16x32xf32>
    %c0_2 = arith.constant 0 : index
    %c0_3 = arith.constant 0 : index
    %2 = vector.load %arg2[%c0_2, %c0_3] : memref<1x32xf32, #tpu.memory_space<vmem>>, vector<1x32xf32>
    %c0_4 = arith.constant 0 : index
    %c0_5 = arith.constant 0 : index
    %3 = vector.load %arg3[%c0_4, %c0_5] : memref<1x32xf32, #tpu.memory_space<vmem>>, vector<1x32xf32>
    %cst = arith.constant dense<0.000000e+00> : vector<16xf32>
    %4 = vector.multi_reduction <add>, %1, %cst [1] : vector<16x32xf32> to vector<16xf32>
    %5 = vector.shape_cast %4 : vector<16xf32> to vector<16x1xf32>
    %cst_6 = arith.constant 3.200000e+01 : f32
    %6 = vector.broadcast %cst_6 : f32 to vector<16x1xf32>
    %7 = arith.divf %5, %6 : vector<16x1xf32>
    %8 = vector.broadcast %7 : vector<16x1xf32> to vector<16x32xf32>
    %9 = arith.subf %1, %8 : vector<16x32xf32>
    %10 = arith.mulf %9, %9 : vector<16x32xf32>
    %cst_7 = arith.constant dense<0.000000e+00> : vector<16xf32>
    %11 = vector.multi_reduction <add>, %10, %cst_7 [1] : vector<16x32xf32> to vector<16xf32>
    %12 = vector.shape_cast %11 : vector<16xf32> to vector<16x1xf32>
    %cst_8 = arith.constant 3.200000e+01 : f32
    %13 = vector.broadcast %cst_8 : f32 to vector<16x1xf32>
    %14 = arith.divf %12, %13 : vector<16x1xf32>
    %15 = vector.broadcast %7 : vector<16x1xf32> to vector<16x32xf32>
    %16 = arith.subf %1, %15 : vector<16x32xf32>
    %cst_9 = arith.constant 9.99999974E-6 : f32
    %17 = vector.broadcast %cst_9 : f32 to vector<16x1xf32>
    %18 = arith.addf %14, %17 : vector<16x1xf32>
    %19 = math.rsqrt %18 : vector<16x1xf32>
    %20 = vector.broadcast %19 : vector<16x1xf32> to vector<16x32xf32>
    %21 = arith.mulf %16, %20 : vector<16x32xf32>
    %22 = vector.broadcast %2 : vector<1x32xf32> to vector<16x32xf32>
    %23 = arith.mulf %21, %22 : vector<16x32xf32>
    %24 = vector.broadcast %3 : vector<1x32xf32> to vector<16x32xf32>
    %25 = arith.addf %23, %24 : vector<16x32xf32>
    %c0_10 = arith.constant 0 : index
    %c0_11 = arith.constant 0 : index
    %26 = vector.load %arg4[%c0_10, %c0_11] : memref<32x32xf32, #tpu.memory_space<vmem>>, vector<32x32xf32>
    %cst_12 = arith.constant dense<0.000000e+00> : vector<16x32xf32>
    %27 = tpu.matmul %25, %26, %cst_12 {dimension_numbers = #tpu.dot_dimension_numbers<[1], [0], [0], [1], [0, 0, 1, 1], [], []>} : vector<16x32xf32>, vector<32x32xf32>, vector<16x32xf32> -> vector<16x32xf32>
    %c0_13 = arith.constant 0 : index
    %c0_14 = arith.constant 0 : index
    %28 = vector.load %arg5[%c0_13, %c0_14] : memref<1x32xf32, #tpu.memory_space<vmem>>, vector<1x32xf32>
    %29 = vector.broadcast %28 : vector<1x32xf32> to vector<16x32xf32>
    %30 = arith.addf %27, %29 : vector<16x32xf32>
    %c0_15 = arith.constant 0 : index
    %c0_16 = arith.constant 0 : index
    %31 = vector.load %arg6[%c0_15, %c0_16] : memref<32x32xf32, #tpu.memory_space<vmem>>, vector<32x32xf32>
    %cst_17 = arith.constant dense<0.000000e+00> : vector<16x32xf32>
    %32 = tpu.matmul %25, %31, %cst_17 {dimension_numbers = #tpu.dot_dimension_numbers<[1], [0], [0], [1], [0, 0, 1, 1], [], []>} : vector<16x32xf32>, vector<32x32xf32>, vector<16x32xf32> -> vector<16x32xf32>
    %c0_18 = arith.constant 0 : index
    %c0_19 = arith.constant 0 : index
    %33 = vector.load %arg7[%c0_18, %c0_19] : memref<1x32xf32, #tpu.memory_space<vmem>>, vector<1x32xf32>
    %34 = vector.broadcast %33 : vector<1x32xf32> to vector<16x32xf32>
    %35 = arith.addf %32, %34 : vector<16x32xf32>
    %c0_20 = arith.constant 0 : index
    %c0_21 = arith.constant 0 : index
    %36 = vector.load %arg8[%c0_20, %c0_21] : memref<32x32xf32, #tpu.memory_space<vmem>>, vector<32x32xf32>
    %cst_22 = arith.constant dense<0.000000e+00> : vector<16x32xf32>
    %37 = tpu.matmul %25, %36, %cst_22 {dimension_numbers = #tpu.dot_dimension_numbers<[1], [0], [0], [1], [0, 0, 1, 1], [], []>} : vector<16x32xf32>, vector<32x32xf32>, vector<16x32xf32> -> vector<16x32xf32>
    %c0_23 = arith.constant 0 : index
    %c0_24 = arith.constant 0 : index
    %38 = vector.load %arg9[%c0_23, %c0_24] : memref<1x32xf32, #tpu.memory_space<vmem>>, vector<1x32xf32>
    %39 = vector.broadcast %38 : vector<1x32xf32> to vector<16x32xf32>
    %40 = arith.addf %37, %39 : vector<16x32xf32>
    %41 = vector.extract_strided_slice %30 {offsets = [0, 0], sizes = [16, 8], strides = [1, 1]} : vector<16x32xf32> to vector<16x8xf32>
    %42 = vector.extract_strided_slice %35 {offsets = [0, 0], sizes = [16, 8], strides = [1, 1]} : vector<16x32xf32> to vector<16x8xf32>
    %43 = vector.extract_strided_slice %40 {offsets = [0, 0], sizes = [16, 8], strides = [1, 1]} : vector<16x32xf32> to vector<16x8xf32>
    %cst_25 = arith.constant dense<0.000000e+00> : vector<16x16xf32>
    %44 = tpu.matmul %41, %42, %cst_25 {dimension_numbers = #tpu.dot_dimension_numbers<[1], [1], [0], [0], [0, 0, 1, 0], [], []>} : vector<16x8xf32>, vector<16x8xf32>, vector<16x16xf32> -> vector<16x16xf32>
    %cst_26 = arith.constant 0.353553385 : f32
    %45 = vector.broadcast %cst_26 : f32 to vector<16x16xf32>
    %46 = arith.mulf %44, %45 : vector<16x16xf32>
    %cst_27 = arith.constant dense<0xFF800000> : vector<16xf32>
    %47 = vector.multi_reduction <maximumf>, %46, %cst_27 [1] : vector<16x16xf32> to vector<16xf32>
    %48 = vector.shape_cast %47 : vector<16xf32> to vector<16x1xf32>
    %49 = vector.broadcast %48 : vector<16x1xf32> to vector<16x16xf32>
    %50 = arith.subf %46, %49 : vector<16x16xf32>
    %51 = math.exp %50 : vector<16x16xf32>
    %cst_28 = arith.constant dense<0.000000e+00> : vector<16xf32>
    %52 = vector.multi_reduction <add>, %51, %cst_28 [1] : vector<16x16xf32> to vector<16xf32>
    %53 = vector.shape_cast %52 : vector<16xf32> to vector<16x1xf32>
    %54 = tpu.reciprocal %53 {approx = true} : vector<16x1xf32> -> vector<16x1xf32>
    %55 = vector.broadcast %54 : vector<16x1xf32> to vector<16x16xf32>
    %56 = arith.mulf %51, %55 : vector<16x16xf32>
    %cst_29 = arith.constant dense<0.000000e+00> : vector<16x8xf32>
    %57 = tpu.matmul %56, %43, %cst_29 {dimension_numbers = #tpu.dot_dimension_numbers<[1], [0], [0], [1], [0, 0, 1, 1], [], []>} : vector<16x16xf32>, vector<16x8xf32>, vector<16x8xf32> -> vector<16x8xf32>
    %58 = vector.extract_strided_slice %30 {offsets = [0, 8], sizes = [16, 8], strides = [1, 1]} : vector<16x32xf32> to vector<16x8xf32>
    %59 = vector.extract_strided_slice %35 {offsets = [0, 8], sizes = [16, 8], strides = [1, 1]} : vector<16x32xf32> to vector<16x8xf32>
    %60 = vector.extract_strided_slice %40 {offsets = [0, 8], sizes = [16, 8], strides = [1, 1]} : vector<16x32xf32> to vector<16x8xf32>
    %cst_30 = arith.constant dense<0.000000e+00> : vector<16x16xf32>
    %61 = tpu.matmul %58, %59, %cst_30 {dimension_numbers = #tpu.dot_dimension_numbers<[1], [1], [0], [0], [0, 0, 1, 0], [], []>} : vector<16x8xf32>, vector<16x8xf32>, vector<16x16xf32> -> vector<16x16xf32>
    %cst_31 = arith.constant 0.353553385 : f32
    %62 = vector.broadcast %cst_31 : f32 to vector<16x16xf32>
    %63 = arith.mulf %61, %62 : vector<16x16xf32>
    %cst_32 = arith.constant dense<0xFF800000> : vector<16xf32>
    %64 = vector.multi_reduction <maximumf>, %63, %cst_32 [1] : vector<16x16xf32> to vector<16xf32>
    %65 = vector.shape_cast %64 : vector<16xf32> to vector<16x1xf32>
    %66 = vector.broadcast %65 : vector<16x1xf32> to vector<16x16xf32>
    %67 = arith.subf %63, %66 : vector<16x16xf32>
    %68 = math.exp %67 : vector<16x16xf32>
    %cst_33 = arith.constant dense<0.000000e+00> : vector<16xf32>
    %69 = vector.multi_reduction <add>, %68, %cst_33 [1] : vector<16x16xf32> to vector<16xf32>
    %70 = vector.shape_cast %69 : vector<16xf32> to vector<16x1xf32>
    %71 = tpu.reciprocal %70 {approx = true} : vector<16x1xf32> -> vector<16x1xf32>
    %72 = vector.broadcast %71 : vector<16x1xf32> to vector<16x16xf32>
    %73 = arith.mulf %68, %72 : vector<16x16xf32>
    %cst_34 = arith.constant dense<0.000000e+00> : vector<16x8xf32>
    %74 = tpu.matmul %73, %60, %cst_34 {dimension_numbers = #tpu.dot_dimension_numbers<[1], [0], [0], [1], [0, 0, 1, 1], [], []>} : vector<16x16xf32>, vector<16x8xf32>, vector<16x8xf32> -> vector<16x8xf32>
    %75 = vector.extract_strided_slice %30 {offsets = [0, 16], sizes = [16, 8], strides = [1, 1]} : vector<16x32xf32> to vector<16x8xf32>
    %76 = vector.extract_strided_slice %35 {offsets = [0, 16], sizes = [16, 8], strides = [1, 1]} : vector<16x32xf32> to vector<16x8xf32>
    %77 = vector.extract_strided_slice %40 {offsets = [0, 16], sizes = [16, 8], strides = [1, 1]} : vector<16x32xf32> to vector<16x8xf32>
    %cst_35 = arith.constant dense<0.000000e+00> : vector<16x16xf32>
    %78 = tpu.matmul %75, %76, %cst_35 {dimension_numbers = #tpu.dot_dimension_numbers<[1], [1], [0], [0], [0, 0, 1, 0], [], []>} : vector<16x8xf32>, vector<16x8xf32>, vector<16x16xf32> -> vector<16x16xf32>
    %cst_36 = arith.constant 0.353553385 : f32
    %79 = vector.broadcast %cst_36 : f32 to vector<16x16xf32>
    %80 = arith.mulf %78, %79 : vector<16x16xf32>
    %cst_37 = arith.constant dense<0xFF800000> : vector<16xf32>
    %81 = vector.multi_reduction <maximumf>, %80, %cst_37 [1] : vector<16x16xf32> to vector<16xf32>
    %82 = vector.shape_cast %81 : vector<16xf32> to vector<16x1xf32>
    %83 = vector.broadcast %82 : vector<16x1xf32> to vector<16x16xf32>
    %84 = arith.subf %80, %83 : vector<16x16xf32>
    %85 = math.exp %84 : vector<16x16xf32>
    %cst_38 = arith.constant dense<0.000000e+00> : vector<16xf32>
    %86 = vector.multi_reduction <add>, %85, %cst_38 [1] : vector<16x16xf32> to vector<16xf32>
    %87 = vector.shape_cast %86 : vector<16xf32> to vector<16x1xf32>
    %88 = tpu.reciprocal %87 {approx = true} : vector<16x1xf32> -> vector<16x1xf32>
    %89 = vector.broadcast %88 : vector<16x1xf32> to vector<16x16xf32>
    %90 = arith.mulf %85, %89 : vector<16x16xf32>
    %cst_39 = arith.constant dense<0.000000e+00> : vector<16x8xf32>
    %91 = tpu.matmul %90, %77, %cst_39 {dimension_numbers = #tpu.dot_dimension_numbers<[1], [0], [0], [1], [0, 0, 1, 1], [], []>} : vector<16x16xf32>, vector<16x8xf32>, vector<16x8xf32> -> vector<16x8xf32>
    %92 = vector.extract_strided_slice %30 {offsets = [0, 24], sizes = [16, 8], strides = [1, 1]} : vector<16x32xf32> to vector<16x8xf32>
    %93 = vector.extract_strided_slice %35 {offsets = [0, 24], sizes = [16, 8], strides = [1, 1]} : vector<16x32xf32> to vector<16x8xf32>
    %94 = vector.extract_strided_slice %40 {offsets = [0, 24], sizes = [16, 8], strides = [1, 1]} : vector<16x32xf32> to vector<16x8xf32>
    %cst_40 = arith.constant dense<0.000000e+00> : vector<16x16xf32>
    %95 = tpu.matmul %92, %93, %cst_40 {dimension_numbers = #tpu.dot_dimension_numbers<[1], [1], [0], [0], [0, 0, 1, 0], [], []>} : vector<16x8xf32>, vector<16x8xf32>, vector<16x16xf32> -> vector<16x16xf32>
    %cst_41 = arith.constant 0.353553385 : f32
    %96 = vector.broadcast %cst_41 : f32 to vector<16x16xf32>
    %97 = arith.mulf %95, %96 : vector<16x16xf32>
    %cst_42 = arith.constant dense<0xFF800000> : vector<16xf32>
    %98 = vector.multi_reduction <maximumf>, %97, %cst_42 [1] : vector<16x16xf32> to vector<16xf32>
    %99 = vector.shape_cast %98 : vector<16xf32> to vector<16x1xf32>
    %100 = vector.broadcast %99 : vector<16x1xf32> to vector<16x16xf32>
    %101 = arith.subf %97, %100 : vector<16x16xf32>
    %102 = math.exp %101 : vector<16x16xf32>
    %cst_43 = arith.constant dense<0.000000e+00> : vector<16xf32>
    %103 = vector.multi_reduction <add>, %102, %cst_43 [1] : vector<16x16xf32> to vector<16xf32>
    %104 = vector.shape_cast %103 : vector<16xf32> to vector<16x1xf32>
    %105 = tpu.reciprocal %104 {approx = true} : vector<16x1xf32> -> vector<16x1xf32>
    %106 = vector.broadcast %105 : vector<16x1xf32> to vector<16x16xf32>
    %107 = arith.mulf %102, %106 : vector<16x16xf32>
    %cst_44 = arith.constant dense<0.000000e+00> : vector<16x8xf32>
    %108 = tpu.matmul %107, %94, %cst_44 {dimension_numbers = #tpu.dot_dimension_numbers<[1], [0], [0], [1], [0, 0, 1, 1], [], []>} : vector<16x16xf32>, vector<16x8xf32>, vector<16x8xf32> -> vector<16x8xf32>
    %109 = tpu.concatenate %57, %74, %91, %108 in 1 : vector<16x8xf32>, vector<16x8xf32>, vector<16x8xf32>, vector<16x8xf32> -> vector<16x32xf32>
    %c0_45 = arith.constant 0 : index
    %c0_46 = arith.constant 0 : index
    %110 = vector.load %arg10[%c0_45, %c0_46] : memref<32x32xf32, #tpu.memory_space<vmem>>, vector<32x32xf32>
    %cst_47 = arith.constant dense<0.000000e+00> : vector<16x32xf32>
    %111 = tpu.matmul %109, %110, %cst_47 {dimension_numbers = #tpu.dot_dimension_numbers<[1], [0], [0], [1], [0, 0, 1, 1], [], []>} : vector<16x32xf32>, vector<32x32xf32>, vector<16x32xf32> -> vector<16x32xf32>
    %c0_48 = arith.constant 0 : index
    %c0_49 = arith.constant 0 : index
    %112 = vector.load %arg11[%c0_48, %c0_49] : memref<1x32xf32, #tpu.memory_space<vmem>>, vector<1x32xf32>
    %113 = vector.broadcast %112 : vector<1x32xf32> to vector<16x32xf32>
    %114 = arith.addf %111, %113 : vector<16x32xf32>
    %115 = arith.addf %114, %1 : vector<16x32xf32>
    %c0_50 = arith.constant 0 : index
    %c0_51 = arith.constant 0 : index
    %c0_52 = arith.constant 0 : index
    %116 = vector.load %arg12[%c0_50, %c0_51, %c0_52] : memref<1x16x32xf32, #tpu.memory_space<vmem>>, vector<1x16x32xf32>
    %117 = vector.shape_cast %116 : vector<1x16x32xf32> to vector<16x32xf32>
    %118 = vector.shape_cast %115 : vector<16x32xf32> to vector<1x16x32xf32>
    tpu.vector_store %arg12[%c0_50, %c0_51, %c0_52], %118 {strides = array<i32>} : memref<1x16x32xf32, #tpu.memory_space<vmem>>, vector<1x16x32xf32>,
    return
  }
  func.func @transform_0(%arg0: i32) -> (i32, i32, i32) {
    %c0_i32 = arith.constant 0 : i32
    %c0_i32_0 = arith.constant 0 : i32
    %c0_i32_1 = arith.constant 0 : i32
    return %arg0, %c0_i32, %c0_i32_0 : i32, i32, i32
  }
  func.func @transform_1(%arg0: i32) -> (i32, i32) {
    %c0_i32 = arith.constant 0 : i32
    %c0_i32_0 = arith.constant 0 : i32
    %c0_i32_1 = arith.constant 0 : i32
    return %c0_i32, %c0_i32_0 : i32, i32
  }
  func.func @transform_2(%arg0: i32) -> (i32, i32) {
    %c0_i32 = arith.constant 0 : i32
    %c0_i32_0 = arith.constant 0 : i32
    %c0_i32_1 = arith.constant 0 : i32
    return %c0_i32, %c0_i32_0 : i32, i32
  }
  func.func @transform_3(%arg0: i32) -> (i32, i32) {
    %c0_i32 = arith.constant 0 : i32
    %c0_i32_0 = arith.constant 0 : i32
    %c0_i32_1 = arith.constant 0 : i32
    return %c0_i32, %c0_i32_0 : i32, i32
  }
  func.func @transform_4(%arg0: i32) -> (i32, i32) {
    %c0_i32 = arith.constant 0 : i32
    %c0_i32_0 = arith.constant 0 : i32
    %c0_i32_1 = arith.constant 0 : i32
    return %c0_i32, %c0_i32_0 : i32, i32
  }
  func.func @transform_5(%arg0: i32) -> (i32, i32) {
    %c0_i32 = arith.constant 0 : i32
    %c0_i32_0 = arith.constant 0 : i32
    %c0_i32_1 = arith.constant 0 : i32
    return %c0_i32, %c0_i32_0 : i32, i32
  }
  func.func @transform_6(%arg0: i32) -> (i32, i32) {
    %c0_i32 = arith.constant 0 : i32
    %c0_i32_0 = arith.constant 0 : i32
    %c0_i32_1 = arith.constant 0 : i32
    return %c0_i32, %c0_i32_0 : i32, i32
  }
  func.func @transform_7(%arg0: i32) -> (i32, i32) {
    %c0_i32 = arith.constant 0 : i32
    %c0_i32_0 = arith.constant 0 : i32
    %c0_i32_1 = arith.constant 0 : i32
    return %c0_i32, %c0_i32_0 : i32, i32
  }
  func.func @transform_8(%arg0: i32) -> (i32, i32) {
    %c0_i32 = arith.constant 0 : i32
    %c0_i32_0 = arith.constant 0 : i32
    %c0_i32_1 = arith.constant 0 : i32
    return %c0_i32, %c0_i32_0 : i32, i32
  }
  func.func @transform_9(%arg0: i32) -> (i32, i32) {
    %c0_i32 = arith.constant 0 : i32
    %c0_i32_0 = arith.constant 0 : i32
    %c0_i32_1 = arith.constant 0 : i32
    return %c0_i32, %c0_i32_0 : i32, i32
  }
  func.func @transform_10(%arg0: i32) -> (i32, i32) {
    %c0_i32 = arith.constant 0 : i32
    %c0_i32_0 = arith.constant 0 : i32
    %c0_i32_1 = arith.constant 0 : i32
    return %c0_i32, %c0_i32_0 : i32, i32
  }
  func.func @transform_11(%arg0: i32) -> (i32, i32, i32) {
    %c0_i32 = arith.constant 0 : i32
    %c0_i32_0 = arith.constant 0 : i32
    %c0_i32_1 = arith.constant 0 : i32
    return %arg0, %c0_i32, %c0_i32_0 : i32, i32, i32
  }
}

module attributes {stable_mosaic.version = 11 : i64} {
  func.func @_ff_block_kernel(%arg0: i32, %arg1: memref<1x16x32xf32, #tpu.memory_space<vmem>>, %arg2: memref<1x32xf32, #tpu.memory_space<vmem>>, %arg3: memref<1x32xf32, #tpu.memory_space<vmem>>, %arg4: memref<32x64xf32, #tpu.memory_space<vmem>>, %arg5: memref<1x64xf32, #tpu.memory_space<vmem>>, %arg6: memref<64x32xf32, #tpu.memory_space<vmem>>, %arg7: memref<1x32xf32, #tpu.memory_space<vmem>>, %arg8: memref<1x16x32xf32, #tpu.memory_space<vmem>>) attributes {dimension_semantics = [#tpu.dimension_semantics<parallel>], iteration_bounds = array<i64: 2>, scalar_prefetch = 0 : i64, scratch_operands = 0 : i64, tpu.core_type = #tpu.core_type<tc>, window_params = [{transform_indices = @transform_0, window_bounds = array<i64: 1, 16, 32>}, {pipeline_mode = #tpu.pipeline_mode<synchronous>, transform_indices = @transform_1, window_bounds = array<i64: 1, 32>}, {pipeline_mode = #tpu.pipeline_mode<synchronous>, transform_indices = @transform_2, window_bounds = array<i64: 1, 32>}, {pipeline_mode = #tpu.pipeline_mode<synchronous>, transform_indices = @transform_3, window_bounds = array<i64: 32, 64>}, {pipeline_mode = #tpu.pipeline_mode<synchronous>, transform_indices = @transform_4, window_bounds = array<i64: 1, 64>}, {pipeline_mode = #tpu.pipeline_mode<synchronous>, transform_indices = @transform_5, window_bounds = array<i64: 64, 32>}, {pipeline_mode = #tpu.pipeline_mode<synchronous>, transform_indices = @transform_6, window_bounds = array<i64: 1, 32>}, {transform_indices = @transform_7, window_bounds = array<i64: 1, 16, 32>}]} {
    %c0 = arith.constant 0 : index
    %c0_0 = arith.constant 0 : index
    %c0_1 = arith.constant 0 : index
    %0 = vector.load %arg1[%c0, %c0_0, %c0_1] : memref<1x16x32xf32, #tpu.memory_space<vmem>>, vector<1x16x32xf32>
    %1 = vector.shape_cast %0 : vector<1x16x32xf32> to vector<16x32xf32>
    %c0_2 = arith.constant 0 : index
    %c0_3 = arith.constant 0 : index
    %2 = vector.load %arg2[%c0_2, %c0_3] : memref<1x32xf32, #tpu.memory_space<vmem>>, vector<1x32xf32>
    %c0_4 = arith.constant 0 : index
    %c0_5 = arith.constant 0 : index
    %3 = vector.load %arg3[%c0_4, %c0_5] : memref<1x32xf32, #tpu.memory_space<vmem>>, vector<1x32xf32>
    %cst = arith.constant dense<0.000000e+00> : vector<16xf32>
    %4 = vector.multi_reduction <add>, %1, %cst [1] : vector<16x32xf32> to vector<16xf32>
    %5 = vector.shape_cast %4 : vector<16xf32> to vector<16x1xf32>
    %cst_6 = arith.constant 3.200000e+01 : f32
    %6 = vector.broadcast %cst_6 : f32 to vector<16x1xf32>
    %7 = arith.divf %5, %6 : vector<16x1xf32>
    %8 = vector.broadcast %7 : vector<16x1xf32> to vector<16x32xf32>
    %9 = arith.subf %1, %8 : vector<16x32xf32>
    %10 = arith.mulf %9, %9 : vector<16x32xf32>
    %cst_7 = arith.constant dense<0.000000e+00> : vector<16xf32>
    %11 = vector.multi_reduction <add>, %10, %cst_7 [1] : vector<16x32xf32> to vector<16xf32>
    %12 = vector.shape_cast %11 : vector<16xf32> to vector<16x1xf32>
    %cst_8 = arith.constant 3.200000e+01 : f32
    %13 = vector.broadcast %cst_8 : f32 to vector<16x1xf32>
    %14 = arith.divf %12, %13 : vector<16x1xf32>
    %15 = vector.broadcast %7 : vector<16x1xf32> to vector<16x32xf32>
    %16 = arith.subf %1, %15 : vector<16x32xf32>
    %cst_9 = arith.constant 9.99999974E-6 : f32
    %17 = vector.broadcast %cst_9 : f32 to vector<16x1xf32>
    %18 = arith.addf %14, %17 : vector<16x1xf32>
    %19 = math.rsqrt %18 : vector<16x1xf32>
    %20 = vector.broadcast %19 : vector<16x1xf32> to vector<16x32xf32>
    %21 = arith.mulf %16, %20 : vector<16x32xf32>
    %22 = vector.broadcast %2 : vector<1x32xf32> to vector<16x32xf32>
    %23 = arith.mulf %21, %22 : vector<16x32xf32>
    %24 = vector.broadcast %3 : vector<1x32xf32> to vector<16x32xf32>
    %25 = arith.addf %23, %24 : vector<16x32xf32>
    %c0_10 = arith.constant 0 : index
    %c0_11 = arith.constant 0 : index
    %26 = vector.load %arg4[%c0_10, %c0_11] : memref<32x64xf32, #tpu.memory_space<vmem>>, vector<32x64xf32>
    %cst_12 = arith.constant dense<0.000000e+00> : vector<16x64xf32>
    %27 = tpu.matmul %25, %26, %cst_12 {dimension_numbers = #tpu.dot_dimension_numbers<[1], [0], [0], [1], [0, 0, 1, 1], [], []>} : vector<16x32xf32>, vector<32x64xf32>, vector<16x64xf32> -> vector<16x64xf32>
    %c0_13 = arith.constant 0 : index
    %c0_14 = arith.constant 0 : index
    %28 = vector.load %arg5[%c0_13, %c0_14] : memref<1x64xf32, #tpu.memory_space<vmem>>, vector<1x64xf32>
    %29 = vector.broadcast %28 : vector<1x64xf32> to vector<16x64xf32>
    %30 = arith.addf %27, %29 : vector<16x64xf32>
    %31 = arith.mulf %30, %30 : vector<16x64xf32>
    %32 = arith.mulf %30, %31 : vector<16x64xf32>
    %cst_15 = arith.constant 4.471500e-02 : f32
    %33 = vector.broadcast %cst_15 : f32 to vector<16x64xf32>
    %34 = arith.mulf %33, %32 : vector<16x64xf32>
    %35 = arith.addf %30, %34 : vector<16x64xf32>
    %cst_16 = arith.constant 0.797884583 : f32
    %36 = vector.broadcast %cst_16 : f32 to vector<16x64xf32>
    %37 = arith.mulf %36, %35 : vector<16x64xf32>
    %38 = math.tanh %37 : vector<16x64xf32>
    %cst_17 = arith.constant 1.000000e+00 : f32
    %39 = vector.broadcast %cst_17 : f32 to vector<16x64xf32>
    %40 = arith.addf %39, %38 : vector<16x64xf32>
    %cst_18 = arith.constant 5.000000e-01 : f32
    %41 = vector.broadcast %cst_18 : f32 to vector<16x64xf32>
    %42 = arith.mulf %41, %40 : vector<16x64xf32>
    %43 = arith.mulf %30, %42 : vector<16x64xf32>
    %c0_19 = arith.constant 0 : index
    %c0_20 = arith.constant 0 : index
    %44 = vector.load %arg6[%c0_19, %c0_20] : memref<64x32xf32, #tpu.memory_space<vmem>>, vector<64x32xf32>
    %cst_21 = arith.constant dense<0.000000e+00> : vector<16x32xf32>
    %45 = tpu.matmul %43, %44, %cst_21 {dimension_numbers = #tpu.dot_dimension_numbers<[1], [0], [0], [1], [0, 0, 1, 1], [], []>} : vector<16x64xf32>, vector<64x32xf32>, vector<16x32xf32> -> vector<16x32xf32>
    %c0_22 = arith.constant 0 : index
    %c0_23 = arith.constant 0 : index
    %46 = vector.load %arg7[%c0_22, %c0_23] : memref<1x32xf32, #tpu.memory_space<vmem>>, vector<1x32xf32>
    %47 = vector.broadcast %46 : vector<1x32xf32> to vector<16x32xf32>
    %48 = arith.addf %45, %47 : vector<16x32xf32>
    %49 = arith.addf %48, %1 : vector<16x32xf32>
    %c0_24 = arith.constant 0 : index
    %c0_25 = arith.constant 0 : index
    %c0_26 = arith.constant 0 : index
    %50 = vector.load %arg8[%c0_24, %c0_25, %c0_26] : memref<1x16x32xf32, #tpu.memory_space<vmem>>, vector<1x16x32xf32>
    %51 = vector.shape_cast %50 : vector<1x16x32xf32> to vector<16x32xf32>
    %52 = vector.shape_cast %49 : vector<16x32xf32> to vector<1x16x32xf32>
    tpu.vector_store %arg8[%c0_24, %c0_25, %c0_26], %52 {strides = array<i32>} : memref<1x16x32xf32, #tpu.memory_space<vmem>>, vector<1x16x32xf32>,
    return
  }
  func.func @transform_0(%arg0: i32) -> (i32, i32, i32) {
    %c0_i32 = arith.constant 0 : i32
    %c0_i32_0 = arith.constant 0 : i32
    %c0_i32_1 = arith.constant 0 : i32
    return %arg0, %c0_i32, %c0_i32_0 : i32, i32, i32
  }
  func.func @transform_1(%arg0: i32) -> (i32, i32) {
    %c0_i32 = arith.constant 0 : i32
    %c0_i32_0 = arith.constant 0 : i32
    %c0_i32_1 = arith.constant 0 : i32
    return %c0_i32, %c0_i32_0 : i32, i32
  }
  func.func @transform_2(%arg0: i32) -> (i32, i32) {
    %c0_i32 = arith.constant 0 : i32
    %c0_i32_0 = arith.constant 0 : i32
    %c0_i32_1 = arith.constant 0 : i32
    return %c0_i32, %c0_i32_0 : i32, i32
  }
  func.func @transform_3(%arg0: i32) -> (i32, i32) {
    %c0_i32 = arith.constant 0 : i32
    %c0_i32_0 = arith.constant 0 : i32
    %c0_i32_1 = arith.constant 0 : i32
    return %c0_i32, %c0_i32_0 : i32, i32
  }
  func.func @transform_4(%arg0: i32) -> (i32, i32) {
    %c0_i32 = arith.constant 0 : i32
    %c0_i32_0 = arith.constant 0 : i32
    %c0_i32_1 = arith.constant 0 : i32
    return %c0_i32, %c0_i32_0 : i32, i32
  }
  func.func @transform_5(%arg0: i32) -> (i32, i32) {
    %c0_i32 = arith.constant 0 : i32
    %c0_i32_0 = arith.constant 0 : i32
    %c0_i32_1 = arith.constant 0 : i32
    return %c0_i32, %c0_i32_0 : i32, i32
  }
  func.func @transform_6(%arg0: i32) -> (i32, i32) {
    %c0_i32 = arith.constant 0 : i32
    %c0_i32_0 = arith.constant 0 : i32
    %c0_i32_1 = arith.constant 0 : i32
    return %c0_i32, %c0_i32_0 : i32, i32
  }
  func.func @transform_7(%arg0: i32) -> (i32, i32, i32) {
    %c0_i32 = arith.constant 0 : i32
    %c0_i32_0 = arith.constant 0 : i32
    %c0_i32_1 = arith.constant 0 : i32
    return %arg0, %c0_i32, %c0_i32_0 : i32, i32, i32
  }
}

module attributes {stable_mosaic.version = 11 : i64} {
  func.func @_ff_block_kernel(%arg0: i32, %arg1: memref<1x16x32xf32, #tpu.memory_space<vmem>>, %arg2: memref<1x32xf32, #tpu.memory_space<vmem>>, %arg3: memref<1x32xf32, #tpu.memory_space<vmem>>, %arg4: memref<32x64xf32, #tpu.memory_space<vmem>>, %arg5: memref<1x64xf32, #tpu.memory_space<vmem>>, %arg6: memref<64x32xf32, #tpu.memory_space<vmem>>, %arg7: memref<1x32xf32, #tpu.memory_space<vmem>>, %arg8: memref<1x16x32xf32, #tpu.memory_space<vmem>>) attributes {dimension_semantics = [#tpu.dimension_semantics<parallel>], iteration_bounds = array<i64: 2>, scalar_prefetch = 0 : i64, scratch_operands = 0 : i64, tpu.core_type = #tpu.core_type<tc>, window_params = [{transform_indices = @transform_0, window_bounds = array<i64: 1, 16, 32>}, {pipeline_mode = #tpu.pipeline_mode<synchronous>, transform_indices = @transform_1, window_bounds = array<i64: 1, 32>}, {pipeline_mode = #tpu.pipeline_mode<synchronous>, transform_indices = @transform_2, window_bounds = array<i64: 1, 32>}, {pipeline_mode = #tpu.pipeline_mode<synchronous>, transform_indices = @transform_3, window_bounds = array<i64: 32, 64>}, {pipeline_mode = #tpu.pipeline_mode<synchronous>, transform_indices = @transform_4, window_bounds = array<i64: 1, 64>}, {pipeline_mode = #tpu.pipeline_mode<synchronous>, transform_indices = @transform_5, window_bounds = array<i64: 64, 32>}, {pipeline_mode = #tpu.pipeline_mode<synchronous>, transform_indices = @transform_6, window_bounds = array<i64: 1, 32>}, {transform_indices = @transform_7, window_bounds = array<i64: 1, 16, 32>}]} {
    %c0 = arith.constant 0 : index
    %c0_0 = arith.constant 0 : index
    %c0_1 = arith.constant 0 : index
    %0 = vector.load %arg1[%c0, %c0_0, %c0_1] : memref<1x16x32xf32, #tpu.memory_space<vmem>>, vector<1x16x32xf32>
    %1 = vector.shape_cast %0 : vector<1x16x32xf32> to vector<16x32xf32>
    %c0_2 = arith.constant 0 : index
    %c0_3 = arith.constant 0 : index
    %2 = vector.load %arg2[%c0_2, %c0_3] : memref<1x32xf32, #tpu.memory_space<vmem>>, vector<1x32xf32>
    %c0_4 = arith.constant 0 : index
    %c0_5 = arith.constant 0 : index
    %3 = vector.load %arg3[%c0_4, %c0_5] : memref<1x32xf32, #tpu.memory_space<vmem>>, vector<1x32xf32>
    %cst = arith.constant dense<0.000000e+00> : vector<16xf32>
    %4 = vector.multi_reduction <add>, %1, %cst [1] : vector<16x32xf32> to vector<16xf32>
    %5 = vector.shape_cast %4 : vector<16xf32> to vector<16x1xf32>
    %cst_6 = arith.constant 3.200000e+01 : f32
    %6 = vector.broadcast %cst_6 : f32 to vector<16x1xf32>
    %7 = arith.divf %5, %6 : vector<16x1xf32>
    %8 = vector.broadcast %7 : vector<16x1xf32> to vector<16x32xf32>
    %9 = arith.subf %1, %8 : vector<16x32xf32>
    %10 = arith.mulf %9, %9 : vector<16x32xf32>
    %cst_7 = arith.constant dense<0.000000e+00> : vector<16xf32>
    %11 = vector.multi_reduction <add>, %10, %cst_7 [1] : vector<16x32xf32> to vector<16xf32>
    %12 = vector.shape_cast %11 : vector<16xf32> to vector<16x1xf32>
    %cst_8 = arith.constant 3.200000e+01 : f32
    %13 = vector.broadcast %cst_8 : f32 to vector<16x1xf32>
    %14 = arith.divf %12, %13 : vector<16x1xf32>
    %15 = vector.broadcast %7 : vector<16x1xf32> to vector<16x32xf32>
    %16 = arith.subf %1, %15 : vector<16x32xf32>
    %cst_9 = arith.constant 9.99999974E-6 : f32
    %17 = vector.broadcast %cst_9 : f32 to vector<16x1xf32>
    %18 = arith.addf %14, %17 : vector<16x1xf32>
    %19 = math.rsqrt %18 : vector<16x1xf32>
    %20 = vector.broadcast %19 : vector<16x1xf32> to vector<16x32xf32>
    %21 = arith.mulf %16, %20 : vector<16x32xf32>
    %22 = vector.broadcast %2 : vector<1x32xf32> to vector<16x32xf32>
    %23 = arith.mulf %21, %22 : vector<16x32xf32>
    %24 = vector.broadcast %3 : vector<1x32xf32> to vector<16x32xf32>
    %25 = arith.addf %23, %24 : vector<16x32xf32>
    %c0_10 = arith.constant 0 : index
    %c0_11 = arith.constant 0 : index
    %26 = vector.load %arg4[%c0_10, %c0_11] : memref<32x64xf32, #tpu.memory_space<vmem>>, vector<32x64xf32>
    %cst_12 = arith.constant dense<0.000000e+00> : vector<16x64xf32>
    %27 = tpu.matmul %25, %26, %cst_12 {dimension_numbers = #tpu.dot_dimension_numbers<[1], [0], [0], [1], [0, 0, 1, 1], [], []>} : vector<16x32xf32>, vector<32x64xf32>, vector<16x64xf32> -> vector<16x64xf32>
    %c0_13 = arith.constant 0 : index
    %c0_14 = arith.constant 0 : index
    %28 = vector.load %arg5[%c0_13, %c0_14] : memref<1x64xf32, #tpu.memory_space<vmem>>, vector<1x64xf32>
    %29 = vector.broadcast %28 : vector<1x64xf32> to vector<16x64xf32>
    %30 = arith.addf %27, %29 : vector<16x64xf32>
    %31 = arith.mulf %30, %30 : vector<16x64xf32>
    %32 = arith.mulf %30, %31 : vector<16x64xf32>
    %cst_15 = arith.constant 4.471500e-02 : f32
    %33 = vector.broadcast %cst_15 : f32 to vector<16x64xf32>
    %34 = arith.mulf %33, %32 : vector<16x64xf32>
    %35 = arith.addf %30, %34 : vector<16x64xf32>
    %cst_16 = arith.constant 0.797884583 : f32
    %36 = vector.broadcast %cst_16 : f32 to vector<16x64xf32>
    %37 = arith.mulf %36, %35 : vector<16x64xf32>
    %38 = math.tanh %37 : vector<16x64xf32>
    %cst_17 = arith.constant 1.000000e+00 : f32
    %39 = vector.broadcast %cst_17 : f32 to vector<16x64xf32>
    %40 = arith.addf %39, %38 : vector<16x64xf32>
    %cst_18 = arith.constant 5.000000e-01 : f32
    %41 = vector.broadcast %cst_18 : f32 to vector<16x64xf32>
    %42 = arith.mulf %41, %40 : vector<16x64xf32>
    %43 = arith.mulf %30, %42 : vector<16x64xf32>
    %c0_19 = arith.constant 0 : index
    %c0_20 = arith.constant 0 : index
    %44 = vector.load %arg6[%c0_19, %c0_20] : memref<64x32xf32, #tpu.memory_space<vmem>>, vector<64x32xf32>
    %cst_21 = arith.constant dense<0.000000e+00> : vector<16x32xf32>
    %45 = tpu.matmul %43, %44, %cst_21 {dimension_numbers = #tpu.dot_dimension_numbers<[1], [0], [0], [1], [0, 0, 1, 1], [], []>} : vector<16x64xf32>, vector<64x32xf32>, vector<16x32xf32> -> vector<16x32xf32>
    %c0_22 = arith.constant 0 : index
    %c0_23 = arith.constant 0 : index
    %46 = vector.load %arg7[%c0_22, %c0_23] : memref<1x32xf32, #tpu.memory_space<vmem>>, vector<1x32xf32>
    %47 = vector.broadcast %46 : vector<1x32xf32> to vector<16x32xf32>
    %48 = arith.addf %45, %47 : vector<16x32xf32>
    %49 = arith.addf %48, %1 : vector<16x32xf32>
    %c0_24 = arith.constant 0 : index
    %c0_25 = arith.constant 0 : index
    %c0_26 = arith.constant 0 : index
    %50 = vector.load %arg8[%c0_24, %c0_25, %c0_26] : memref<1x16x32xf32, #tpu.memory_space<vmem>>, vector<1x16x32xf32>
    %51 = vector.shape_cast %50 : vector<1x16x32xf32> to vector<16x32xf32>
    %52 = vector.shape_cast %49 : vector<16x32xf32> to vector<1x16x32xf32>
    tpu.vector_store %arg8[%c0_24, %c0_25, %c0_26], %52 {strides = array<i32>} : memref<1x16x32xf32, #tpu.memory_space<vmem>>, vector<1x16x32xf32>,
    return
  }
  func.func @transform_0(%arg0: i32) -> (i32, i32, i32) {
    %c0_i32 = arith.constant 0 : i32
    %c0_i32_0 = arith.constant 0 : i32
    %c0_i32_1 = arith.constant 0 : i32
    return %arg0, %c0_i32, %c0_i32_0 : i32, i32, i32
  }
  func.func @transform_1(%arg0: i32) -> (i32, i32) {
    %c0_i32 = arith.constant 0 : i32
    %c0_i32_0 = arith.constant 0 : i32
    %c0_i32_1 = arith.constant 0 : i32
    return %c0_i32, %c0_i32_0 : i32, i32
  }
  func.func @transform_2(%arg0: i32) -> (i32, i32) {
    %c0_i32 = arith.constant 0 : i32
    %c0_i32_0 = arith.constant 0 : i32
    %c0_i32_1 = arith.constant 0 : i32
    return %c0_i32, %c0_i32_0 : i32, i32
  }
  func.func @transform_3(%arg0: i32) -> (i32, i32) {
    %c0_i32 = arith.constant 0 : i32
    %c0_i32_0 = arith.constant 0 : i32
    %c0_i32_1 = arith.constant 0 : i32
    return %c0_i32, %c0_i32_0 : i32, i32
  }
  func.func @transform_4(%arg0: i32) -> (i32, i32) {
    %c0_i32 = arith.constant 0 : i32
    %c0_i32_0 = arith.constant 0 : i32
    %c0_i32_1 = arith.constant 0 : i32
    return %c0_i32, %c0_i32_0 : i32, i32
  }
  func.func @transform_5(%arg0: i32) -> (i32, i32) {
    %c0_i32 = arith.constant 0 : i32
    %c0_i32_0 = arith.constant 0 : i32
    %c0_i32_1 = arith.constant 0 : i32
    return %c0_i32, %c0_i32_0 : i32, i32
  }
  func.func @transform_6(%arg0: i32) -> (i32, i32) {
    %c0_i32 = arith.constant 0 : i32
    %c0_i32_0 = arith.constant 0 : i32
    %c0_i32_1 = arith.constant 0 : i32
    return %c0_i32, %c0_i32_0 : i32, i32
  }
  func.func @transform_7(%arg0: i32) -> (i32, i32, i32) {
    %c0_i32 = arith.constant 0 : i32
    %c0_i32_0 = arith.constant 0 : i32
    %c0_i32_1 = arith.constant 0 : i32
    return %arg0, %c0_i32, %c0_i32_0 : i32, i32, i32
  }
}

module attributes {stable_mosaic.version = 11 : i64} {
  func.func @_cross_attn_block_kernel(%arg0: i32, %arg1: memref<1x16x32xf32, #tpu.memory_space<vmem>>, %arg2: memref<1x8x16xf32, #tpu.memory_space<vmem>>, %arg3: memref<1x32xf32, #tpu.memory_space<vmem>>, %arg4: memref<1x32xf32, #tpu.memory_space<vmem>>, %arg5: memref<1x16xf32, #tpu.memory_space<vmem>>, %arg6: memref<1x16xf32, #tpu.memory_space<vmem>>, %arg7: memref<32x32xf32, #tpu.memory_space<vmem>>, %arg8: memref<1x32xf32, #tpu.memory_space<vmem>>, %arg9: memref<16x32xf32, #tpu.memory_space<vmem>>, %arg10: memref<1x32xf32, #tpu.memory_space<vmem>>, %arg11: memref<16x32xf32, #tpu.memory_space<vmem>>, %arg12: memref<1x32xf32, #tpu.memory_space<vmem>>, %arg13: memref<32x32xf32, #tpu.memory_space<vmem>>, %arg14: memref<1x32xf32, #tpu.memory_space<vmem>>, %arg15: memref<1x16x32xf32, #tpu.memory_space<vmem>>) attributes {dimension_semantics = [#tpu.dimension_semantics<parallel>], iteration_bounds = array<i64: 2>, scalar_prefetch = 0 : i64, scratch_operands = 0 : i64, tpu.core_type = #tpu.core_type<tc>, window_params = [{transform_indices = @transform_0, window_bounds = array<i64: 1, 16, 32>}, {transform_indices = @transform_1, window_bounds = array<i64: 1, 8, 16>}, {pipeline_mode = #tpu.pipeline_mode<synchronous>, transform_indices = @transform_2, window_bounds = array<i64: 1, 32>}, {pipeline_mode = #tpu.pipeline_mode<synchronous>, transform_indices = @transform_3, window_bounds = array<i64: 1, 32>}, {pipeline_mode = #tpu.pipeline_mode<synchronous>, transform_indices = @transform_4, window_bounds = array<i64: 1, 16>}, {pipeline_mode = #tpu.pipeline_mode<synchronous>, transform_indices = @transform_5, window_bounds = array<i64: 1, 16>}, {pipeline_mode = #tpu.pipeline_mode<synchronous>, transform_indices = @transform_6, window_bounds = array<i64: 32, 32>}, {pipeline_mode = #tpu.pipeline_mode<synchronous>, transform_indices = @transform_7, window_bounds = array<i64: 1, 32>}, {pipeline_mode = #tpu.pipeline_mode<synchronous>, transform_indices = @transform_8, window_bounds = array<i64: 16, 32>}, {pipeline_mode = #tpu.pipeline_mode<synchronous>, transform_indices = @transform_9, window_bounds = array<i64: 1, 32>}, {pipeline_mode = #tpu.pipeline_mode<synchronous>, transform_indices = @transform_10, window_bounds = array<i64: 16, 32>}, {pipeline_mode = #tpu.pipeline_mode<synchronous>, transform_indices = @transform_11, window_bounds = array<i64: 1, 32>}, {pipeline_mode = #tpu.pipeline_mode<synchronous>, transform_indices = @transform_12, window_bounds = array<i64: 32, 32>}, {pipeline_mode = #tpu.pipeline_mode<synchronous>, transform_indices = @transform_13, window_bounds = array<i64: 1, 32>}, {transform_indices = @transform_14, window_bounds = array<i64: 1, 16, 32>}]} {
    %c0 = arith.constant 0 : index
    %c0_0 = arith.constant 0 : index
    %c0_1 = arith.constant 0 : index
    %0 = vector.load %arg1[%c0, %c0_0, %c0_1] : memref<1x16x32xf32, #tpu.memory_space<vmem>>, vector<1x16x32xf32>
    %1 = vector.shape_cast %0 : vector<1x16x32xf32> to vector<16x32xf32>
    %c0_2 = arith.constant 0 : index
    %c0_3 = arith.constant 0 : index
    %2 = vector.load %arg3[%c0_2, %c0_3] : memref<1x32xf32, #tpu.memory_space<vmem>>, vector<1x32xf32>
    %c0_4 = arith.constant 0 : index
    %c0_5 = arith.constant 0 : index
    %3 = vector.load %arg4[%c0_4, %c0_5] : memref<1x32xf32, #tpu.memory_space<vmem>>, vector<1x32xf32>
    %cst = arith.constant dense<0.000000e+00> : vector<16xf32>
    %4 = vector.multi_reduction <add>, %1, %cst [1] : vector<16x32xf32> to vector<16xf32>
    %5 = vector.shape_cast %4 : vector<16xf32> to vector<16x1xf32>
    %cst_6 = arith.constant 3.200000e+01 : f32
    %6 = vector.broadcast %cst_6 : f32 to vector<16x1xf32>
    %7 = arith.divf %5, %6 : vector<16x1xf32>
    %8 = vector.broadcast %7 : vector<16x1xf32> to vector<16x32xf32>
    %9 = arith.subf %1, %8 : vector<16x32xf32>
    %10 = arith.mulf %9, %9 : vector<16x32xf32>
    %cst_7 = arith.constant dense<0.000000e+00> : vector<16xf32>
    %11 = vector.multi_reduction <add>, %10, %cst_7 [1] : vector<16x32xf32> to vector<16xf32>
    %12 = vector.shape_cast %11 : vector<16xf32> to vector<16x1xf32>
    %cst_8 = arith.constant 3.200000e+01 : f32
    %13 = vector.broadcast %cst_8 : f32 to vector<16x1xf32>
    %14 = arith.divf %12, %13 : vector<16x1xf32>
    %15 = vector.broadcast %7 : vector<16x1xf32> to vector<16x32xf32>
    %16 = arith.subf %1, %15 : vector<16x32xf32>
    %cst_9 = arith.constant 9.99999974E-6 : f32
    %17 = vector.broadcast %cst_9 : f32 to vector<16x1xf32>
    %18 = arith.addf %14, %17 : vector<16x1xf32>
    %19 = math.rsqrt %18 : vector<16x1xf32>
    %20 = vector.broadcast %19 : vector<16x1xf32> to vector<16x32xf32>
    %21 = arith.mulf %16, %20 : vector<16x32xf32>
    %22 = vector.broadcast %2 : vector<1x32xf32> to vector<16x32xf32>
    %23 = arith.mulf %21, %22 : vector<16x32xf32>
    %24 = vector.broadcast %3 : vector<1x32xf32> to vector<16x32xf32>
    %25 = arith.addf %23, %24 : vector<16x32xf32>
    %c0_10 = arith.constant 0 : index
    %c0_11 = arith.constant 0 : index
    %c0_12 = arith.constant 0 : index
    %26 = vector.load %arg2[%c0_10, %c0_11, %c0_12] : memref<1x8x16xf32, #tpu.memory_space<vmem>>, vector<1x8x16xf32>
    %27 = vector.shape_cast %26 : vector<1x8x16xf32> to vector<8x16xf32>
    %c0_13 = arith.constant 0 : index
    %c0_14 = arith.constant 0 : index
    %28 = vector.load %arg5[%c0_13, %c0_14] : memref<1x16xf32, #tpu.memory_space<vmem>>, vector<1x16xf32>
    %c0_15 = arith.constant 0 : index
    %c0_16 = arith.constant 0 : index
    %29 = vector.load %arg6[%c0_15, %c0_16] : memref<1x16xf32, #tpu.memory_space<vmem>>, vector<1x16xf32>
    %cst_17 = arith.constant dense<0.000000e+00> : vector<8xf32>
    %30 = vector.multi_reduction <add>, %27, %cst_17 [1] : vector<8x16xf32> to vector<8xf32>
    %31 = vector.shape_cast %30 : vector<8xf32> to vector<8x1xf32>
    %cst_18 = arith.constant 1.600000e+01 : f32
    %32 = vector.broadcast %cst_18 : f32 to vector<8x1xf32>
    %33 = arith.divf %31, %32 : vector<8x1xf32>
    %34 = vector.broadcast %33 : vector<8x1xf32> to vector<8x16xf32>
    %35 = arith.subf %27, %34 : vector<8x16xf32>
    %36 = arith.mulf %35, %35 : vector<8x16xf32>
    %cst_19 = arith.constant dense<0.000000e+00> : vector<8xf32>
    %37 = vector.multi_reduction <add>, %36, %cst_19 [1] : vector<8x16xf32> to vector<8xf32>
    %38 = vector.shape_cast %37 : vector<8xf32> to vector<8x1xf32>
    %cst_20 = arith.constant 1.600000e+01 : f32
    %39 = vector.broadcast %cst_20 : f32 to vector<8x1xf32>
    %40 = arith.divf %38, %39 : vector<8x1xf32>
    %41 = vector.broadcast %33 : vector<8x1xf32> to vector<8x16xf32>
    %42 = arith.subf %27, %41 : vector<8x16xf32>
    %cst_21 = arith.constant 9.99999974E-6 : f32
    %43 = vector.broadcast %cst_21 : f32 to vector<8x1xf32>
    %44 = arith.addf %40, %43 : vector<8x1xf32>
    %45 = math.rsqrt %44 : vector<8x1xf32>
    %46 = vector.broadcast %45 : vector<8x1xf32> to vector<8x16xf32>
    %47 = arith.mulf %42, %46 : vector<8x16xf32>
    %48 = vector.broadcast %28 : vector<1x16xf32> to vector<8x16xf32>
    %49 = arith.mulf %47, %48 : vector<8x16xf32>
    %50 = vector.broadcast %29 : vector<1x16xf32> to vector<8x16xf32>
    %51 = arith.addf %49, %50 : vector<8x16xf32>
    %c0_22 = arith.constant 0 : index
    %c0_23 = arith.constant 0 : index
    %52 = vector.load %arg7[%c0_22, %c0_23] : memref<32x32xf32, #tpu.memory_space<vmem>>, vector<32x32xf32>
    %cst_24 = arith.constant dense<0.000000e+00> : vector<16x32xf32>
    %53 = tpu.matmul %25, %52, %cst_24 {dimension_numbers = #tpu.dot_dimension_numbers<[1], [0], [0], [1], [0, 0, 1, 1], [], []>} : vector<16x32xf32>, vector<32x32xf32>, vector<16x32xf32> -> vector<16x32xf32>
    %c0_25 = arith.constant 0 : index
    %c0_26 = arith.constant 0 : index
    %54 = vector.load %arg8[%c0_25, %c0_26] : memref<1x32xf32, #tpu.memory_space<vmem>>, vector<1x32xf32>
    %55 = vector.broadcast %54 : vector<1x32xf32> to vector<16x32xf32>
    %56 = arith.addf %53, %55 : vector<16x32xf32>
    %c0_27 = arith.constant 0 : index
    %c0_28 = arith.constant 0 : index
    %57 = vector.load %arg9[%c0_27, %c0_28] : memref<16x32xf32, #tpu.memory_space<vmem>>, vector<16x32xf32>
    %cst_29 = arith.constant dense<0.000000e+00> : vector<8x32xf32>
    %58 = tpu.matmul %51, %57, %cst_29 {dimension_numbers = #tpu.dot_dimension_numbers<[1], [0], [0], [1], [0, 0, 1, 1], [], []>} : vector<8x16xf32>, vector<16x32xf32>, vector<8x32xf32> -> vector<8x32xf32>
    %c0_30 = arith.constant 0 : index
    %c0_31 = arith.constant 0 : index
    %59 = vector.load %arg10[%c0_30, %c0_31] : memref<1x32xf32, #tpu.memory_space<vmem>>, vector<1x32xf32>
    %60 = vector.broadcast %59 : vector<1x32xf32> to vector<8x32xf32>
    %61 = arith.addf %58, %60 : vector<8x32xf32>
    %c0_32 = arith.constant 0 : index
    %c0_33 = arith.constant 0 : index
    %62 = vector.load %arg11[%c0_32, %c0_33] : memref<16x32xf32, #tpu.memory_space<vmem>>, vector<16x32xf32>
    %cst_34 = arith.constant dense<0.000000e+00> : vector<8x32xf32>
    %63 = tpu.matmul %51, %62, %cst_34 {dimension_numbers = #tpu.dot_dimension_numbers<[1], [0], [0], [1], [0, 0, 1, 1], [], []>} : vector<8x16xf32>, vector<16x32xf32>, vector<8x32xf32> -> vector<8x32xf32>
    %c0_35 = arith.constant 0 : index
    %c0_36 = arith.constant 0 : index
    %64 = vector.load %arg12[%c0_35, %c0_36] : memref<1x32xf32, #tpu.memory_space<vmem>>, vector<1x32xf32>
    %65 = vector.broadcast %64 : vector<1x32xf32> to vector<8x32xf32>
    %66 = arith.addf %63, %65 : vector<8x32xf32>
    %cst_37 = arith.constant dense<0.000000e+00> : vector<16x8xf32>
    %67 = tpu.matmul %56, %61, %cst_37 {dimension_numbers = #tpu.dot_dimension_numbers<[1], [1], [0], [0], [0, 0, 1, 0], [], []>} : vector<16x32xf32>, vector<8x32xf32>, vector<16x8xf32> -> vector<16x8xf32>
    %cst_38 = arith.constant 0.176776692 : f32
    %68 = vector.broadcast %cst_38 : f32 to vector<16x8xf32>
    %69 = arith.mulf %67, %68 : vector<16x8xf32>
    %cst_39 = arith.constant dense<0xFF800000> : vector<16xf32>
    %70 = vector.multi_reduction <maximumf>, %69, %cst_39 [1] : vector<16x8xf32> to vector<16xf32>
    %71 = vector.shape_cast %70 : vector<16xf32> to vector<16x1xf32>
    %72 = vector.broadcast %71 : vector<16x1xf32> to vector<16x8xf32>
    %73 = arith.subf %69, %72 : vector<16x8xf32>
    %74 = math.exp %73 : vector<16x8xf32>
    %cst_40 = arith.constant dense<0.000000e+00> : vector<16xf32>
    %75 = vector.multi_reduction <add>, %74, %cst_40 [1] : vector<16x8xf32> to vector<16xf32>
    %76 = vector.shape_cast %75 : vector<16xf32> to vector<16x1xf32>
    %77 = tpu.reciprocal %76 {approx = true} : vector<16x1xf32> -> vector<16x1xf32>
    %78 = vector.broadcast %77 : vector<16x1xf32> to vector<16x8xf32>
    %79 = arith.mulf %74, %78 : vector<16x8xf32>
    %cst_41 = arith.constant dense<0.000000e+00> : vector<16x32xf32>
    %80 = tpu.matmul %79, %66, %cst_41 {dimension_numbers = #tpu.dot_dimension_numbers<[1], [0], [0], [1], [0, 0, 1, 1], [], []>} : vector<16x8xf32>, vector<8x32xf32>, vector<16x32xf32> -> vector<16x32xf32>
    %c0_42 = arith.constant 0 : index
    %c0_43 = arith.constant 0 : index
    %81 = vector.load %arg13[%c0_42, %c0_43] : memref<32x32xf32, #tpu.memory_space<vmem>>, vector<32x32xf32>
    %cst_44 = arith.constant dense<0.000000e+00> : vector<16x32xf32>
    %82 = tpu.matmul %80, %81, %cst_44 {dimension_numbers = #tpu.dot_dimension_numbers<[1], [0], [0], [1], [0, 0, 1, 1], [], []>} : vector<16x32xf32>, vector<32x32xf32>, vector<16x32xf32> -> vector<16x32xf32>
    %c0_45 = arith.constant 0 : index
    %c0_46 = arith.constant 0 : index
    %83 = vector.load %arg14[%c0_45, %c0_46] : memref<1x32xf32, #tpu.memory_space<vmem>>, vector<1x32xf32>
    %84 = vector.broadcast %83 : vector<1x32xf32> to vector<16x32xf32>
    %85 = arith.addf %82, %84 : vector<16x32xf32>
    %86 = arith.addf %85, %1 : vector<16x32xf32>
    %c0_47 = arith.constant 0 : index
    %c0_48 = arith.constant 0 : index
    %c0_49 = arith.constant 0 : index
    %87 = vector.load %arg15[%c0_47, %c0_48, %c0_49] : memref<1x16x32xf32, #tpu.memory_space<vmem>>, vector<1x16x32xf32>
    %88 = vector.shape_cast %87 : vector<1x16x32xf32> to vector<16x32xf32>
    %89 = vector.shape_cast %86 : vector<16x32xf32> to vector<1x16x32xf32>
    tpu.vector_store %arg15[%c0_47, %c0_48, %c0_49], %89 {strides = array<i32>} : memref<1x16x32xf32, #tpu.memory_space<vmem>>, vector<1x16x32xf32>,
    return
  }
  func.func @transform_0(%arg0: i32) -> (i32, i32, i32) {
    %c0_i32 = arith.constant 0 : i32
    %c0_i32_0 = arith.constant 0 : i32
    %c0_i32_1 = arith.constant 0 : i32
    return %arg0, %c0_i32, %c0_i32_0 : i32, i32, i32
  }
  func.func @transform_1(%arg0: i32) -> (i32, i32, i32) {
    %c0_i32 = arith.constant 0 : i32
    %c0_i32_0 = arith.constant 0 : i32
    %c0_i32_1 = arith.constant 0 : i32
    return %arg0, %c0_i32, %c0_i32_0 : i32, i32, i32
  }
  func.func @transform_2(%arg0: i32) -> (i32, i32) {
    %c0_i32 = arith.constant 0 : i32
    %c0_i32_0 = arith.constant 0 : i32
    %c0_i32_1 = arith.constant 0 : i32
    return %c0_i32, %c0_i32_0 : i32, i32
  }
  func.func @transform_3(%arg0: i32) -> (i32, i32) {
    %c0_i32 = arith.constant 0 : i32
    %c0_i32_0 = arith.constant 0 : i32
    %c0_i32_1 = arith.constant 0 : i32
    return %c0_i32, %c0_i32_0 : i32, i32
  }
  func.func @transform_4(%arg0: i32) -> (i32, i32) {
    %c0_i32 = arith.constant 0 : i32
    %c0_i32_0 = arith.constant 0 : i32
    %c0_i32_1 = arith.constant 0 : i32
    return %c0_i32, %c0_i32_0 : i32, i32
  }
  func.func @transform_5(%arg0: i32) -> (i32, i32) {
    %c0_i32 = arith.constant 0 : i32
    %c0_i32_0 = arith.constant 0 : i32
    %c0_i32_1 = arith.constant 0 : i32
    return %c0_i32, %c0_i32_0 : i32, i32
  }
  func.func @transform_6(%arg0: i32) -> (i32, i32) {
    %c0_i32 = arith.constant 0 : i32
    %c0_i32_0 = arith.constant 0 : i32
    %c0_i32_1 = arith.constant 0 : i32
    return %c0_i32, %c0_i32_0 : i32, i32
  }
  func.func @transform_7(%arg0: i32) -> (i32, i32) {
    %c0_i32 = arith.constant 0 : i32
    %c0_i32_0 = arith.constant 0 : i32
    %c0_i32_1 = arith.constant 0 : i32
    return %c0_i32, %c0_i32_0 : i32, i32
  }
  func.func @transform_8(%arg0: i32) -> (i32, i32) {
    %c0_i32 = arith.constant 0 : i32
    %c0_i32_0 = arith.constant 0 : i32
    %c0_i32_1 = arith.constant 0 : i32
    return %c0_i32, %c0_i32_0 : i32, i32
  }
  func.func @transform_9(%arg0: i32) -> (i32, i32) {
    %c0_i32 = arith.constant 0 : i32
    %c0_i32_0 = arith.constant 0 : i32
    %c0_i32_1 = arith.constant 0 : i32
    return %c0_i32, %c0_i32_0 : i32, i32
  }
  func.func @transform_10(%arg0: i32) -> (i32, i32) {
    %c0_i32 = arith.constant 0 : i32
    %c0_i32_0 = arith.constant 0 : i32
    %c0_i32_1 = arith.constant 0 : i32
    return %c0_i32, %c0_i32_0 : i32, i32
  }
  func.func @transform_11(%arg0: i32) -> (i32, i32) {
    %c0_i32 = arith.constant 0 : i32
    %c0_i32_0 = arith.constant 0 : i32
    %c0_i32_1 = arith.constant 0 : i32
    return %c0_i32, %c0_i32_0 : i32, i32
  }
  func.func @transform_12(%arg0: i32) -> (i32, i32) {
    %c0_i32 = arith.constant 0 : i32
    %c0_i32_0 = arith.constant 0 : i32
    %c0_i32_1 = arith.constant 0 : i32
    return %c0_i32, %c0_i32_0 : i32, i32
  }
  func.func @transform_13(%arg0: i32) -> (i32, i32) {
    %c0_i32 = arith.constant 0 : i32
    %c0_i32_0 = arith.constant 0 : i32
    %c0_i32_1 = arith.constant 0 : i32
    return %c0_i32, %c0_i32_0 : i32, i32
  }
  func.func @transform_14(%arg0: i32) -> (i32, i32, i32) {
    %c0_i32 = arith.constant 0 : i32
    %c0_i32_0 = arith.constant 0 : i32
    %c0_i32_1 = arith.constant 0 : i32
    return %arg0, %c0_i32, %c0_i32_0 : i32, i32, i32
  }
}

module attributes {stable_mosaic.version = 11 : i64} {
  func.func @_cross_attn_block_kernel(%arg0: i32, %arg1: memref<1x8x32xf32, #tpu.memory_space<vmem>>, %arg2: memref<1x16x32xf32, #tpu.memory_space<vmem>>, %arg3: memref<1x32xf32, #tpu.memory_space<vmem>>, %arg4: memref<1x32xf32, #tpu.memory_space<vmem>>, %arg5: memref<1x32xf32, #tpu.memory_space<vmem>>, %arg6: memref<1x32xf32, #tpu.memory_space<vmem>>, %arg7: memref<32x32xf32, #tpu.memory_space<vmem>>, %arg8: memref<1x32xf32, #tpu.memory_space<vmem>>, %arg9: memref<32x32xf32, #tpu.memory_space<vmem>>, %arg10: memref<1x32xf32, #tpu.memory_space<vmem>>, %arg11: memref<32x32xf32, #tpu.memory_space<vmem>>, %arg12: memref<1x32xf32, #tpu.memory_space<vmem>>, %arg13: memref<32x32xf32, #tpu.memory_space<vmem>>, %arg14: memref<1x32xf32, #tpu.memory_space<vmem>>, %arg15: memref<1x8x32xf32, #tpu.memory_space<vmem>>) attributes {dimension_semantics = [#tpu.dimension_semantics<parallel>], iteration_bounds = array<i64: 2>, scalar_prefetch = 0 : i64, scratch_operands = 0 : i64, tpu.core_type = #tpu.core_type<tc>, window_params = [{transform_indices = @transform_0, window_bounds = array<i64: 1, 8, 32>}, {transform_indices = @transform_1, window_bounds = array<i64: 1, 16, 32>}, {pipeline_mode = #tpu.pipeline_mode<synchronous>, transform_indices = @transform_2, window_bounds = array<i64: 1, 32>}, {pipeline_mode = #tpu.pipeline_mode<synchronous>, transform_indices = @transform_3, window_bounds = array<i64: 1, 32>}, {pipeline_mode = #tpu.pipeline_mode<synchronous>, transform_indices = @transform_4, window_bounds = array<i64: 1, 32>}, {pipeline_mode = #tpu.pipeline_mode<synchronous>, transform_indices = @transform_5, window_bounds = array<i64: 1, 32>}, {pipeline_mode = #tpu.pipeline_mode<synchronous>, transform_indices = @transform_6, window_bounds = array<i64: 32, 32>}, {pipeline_mode = #tpu.pipeline_mode<synchronous>, transform_indices = @transform_7, window_bounds = array<i64: 1, 32>}, {pipeline_mode = #tpu.pipeline_mode<synchronous>, transform_indices = @transform_8, window_bounds = array<i64: 32, 32>}, {pipeline_mode = #tpu.pipeline_mode<synchronous>, transform_indices = @transform_9, window_bounds = array<i64: 1, 32>}, {pipeline_mode = #tpu.pipeline_mode<synchronous>, transform_indices = @transform_10, window_bounds = array<i64: 32, 32>}, {pipeline_mode = #tpu.pipeline_mode<synchronous>, transform_indices = @transform_11, window_bounds = array<i64: 1, 32>}, {pipeline_mode = #tpu.pipeline_mode<synchronous>, transform_indices = @transform_12, window_bounds = array<i64: 32, 32>}, {pipeline_mode = #tpu.pipeline_mode<synchronous>, transform_indices = @transform_13, window_bounds = array<i64: 1, 32>}, {transform_indices = @transform_14, window_bounds = array<i64: 1, 8, 32>}]} {
    %c0 = arith.constant 0 : index
    %c0_0 = arith.constant 0 : index
    %c0_1 = arith.constant 0 : index
    %0 = vector.load %arg1[%c0, %c0_0, %c0_1] : memref<1x8x32xf32, #tpu.memory_space<vmem>>, vector<1x8x32xf32>
    %1 = vector.shape_cast %0 : vector<1x8x32xf32> to vector<8x32xf32>
    %c0_2 = arith.constant 0 : index
    %c0_3 = arith.constant 0 : index
    %2 = vector.load %arg3[%c0_2, %c0_3] : memref<1x32xf32, #tpu.memory_space<vmem>>, vector<1x32xf32>
    %c0_4 = arith.constant 0 : index
    %c0_5 = arith.constant 0 : index
    %3 = vector.load %arg4[%c0_4, %c0_5] : memref<1x32xf32, #tpu.memory_space<vmem>>, vector<1x32xf32>
    %cst = arith.constant dense<0.000000e+00> : vector<8xf32>
    %4 = vector.multi_reduction <add>, %1, %cst [1] : vector<8x32xf32> to vector<8xf32>
    %5 = vector.shape_cast %4 : vector<8xf32> to vector<8x1xf32>
    %cst_6 = arith.constant 3.200000e+01 : f32
    %6 = vector.broadcast %cst_6 : f32 to vector<8x1xf32>
    %7 = arith.divf %5, %6 : vector<8x1xf32>
    %8 = vector.broadcast %7 : vector<8x1xf32> to vector<8x32xf32>
    %9 = arith.subf %1, %8 : vector<8x32xf32>
    %10 = arith.mulf %9, %9 : vector<8x32xf32>
    %cst_7 = arith.constant dense<0.000000e+00> : vector<8xf32>
    %11 = vector.multi_reduction <add>, %10, %cst_7 [1] : vector<8x32xf32> to vector<8xf32>
    %12 = vector.shape_cast %11 : vector<8xf32> to vector<8x1xf32>
    %cst_8 = arith.constant 3.200000e+01 : f32
    %13 = vector.broadcast %cst_8 : f32 to vector<8x1xf32>
    %14 = arith.divf %12, %13 : vector<8x1xf32>
    %15 = vector.broadcast %7 : vector<8x1xf32> to vector<8x32xf32>
    %16 = arith.subf %1, %15 : vector<8x32xf32>
    %cst_9 = arith.constant 9.99999974E-6 : f32
    %17 = vector.broadcast %cst_9 : f32 to vector<8x1xf32>
    %18 = arith.addf %14, %17 : vector<8x1xf32>
    %19 = math.rsqrt %18 : vector<8x1xf32>
    %20 = vector.broadcast %19 : vector<8x1xf32> to vector<8x32xf32>
    %21 = arith.mulf %16, %20 : vector<8x32xf32>
    %22 = vector.broadcast %2 : vector<1x32xf32> to vector<8x32xf32>
    %23 = arith.mulf %21, %22 : vector<8x32xf32>
    %24 = vector.broadcast %3 : vector<1x32xf32> to vector<8x32xf32>
    %25 = arith.addf %23, %24 : vector<8x32xf32>
    %c0_10 = arith.constant 0 : index
    %c0_11 = arith.constant 0 : index
    %c0_12 = arith.constant 0 : index
    %26 = vector.load %arg2[%c0_10, %c0_11, %c0_12] : memref<1x16x32xf32, #tpu.memory_space<vmem>>, vector<1x16x32xf32>
    %27 = vector.shape_cast %26 : vector<1x16x32xf32> to vector<16x32xf32>
    %c0_13 = arith.constant 0 : index
    %c0_14 = arith.constant 0 : index
    %28 = vector.load %arg5[%c0_13, %c0_14] : memref<1x32xf32, #tpu.memory_space<vmem>>, vector<1x32xf32>
    %c0_15 = arith.constant 0 : index
    %c0_16 = arith.constant 0 : index
    %29 = vector.load %arg6[%c0_15, %c0_16] : memref<1x32xf32, #tpu.memory_space<vmem>>, vector<1x32xf32>
    %cst_17 = arith.constant dense<0.000000e+00> : vector<16xf32>
    %30 = vector.multi_reduction <add>, %27, %cst_17 [1] : vector<16x32xf32> to vector<16xf32>
    %31 = vector.shape_cast %30 : vector<16xf32> to vector<16x1xf32>
    %cst_18 = arith.constant 3.200000e+01 : f32
    %32 = vector.broadcast %cst_18 : f32 to vector<16x1xf32>
    %33 = arith.divf %31, %32 : vector<16x1xf32>
    %34 = vector.broadcast %33 : vector<16x1xf32> to vector<16x32xf32>
    %35 = arith.subf %27, %34 : vector<16x32xf32>
    %36 = arith.mulf %35, %35 : vector<16x32xf32>
    %cst_19 = arith.constant dense<0.000000e+00> : vector<16xf32>
    %37 = vector.multi_reduction <add>, %36, %cst_19 [1] : vector<16x32xf32> to vector<16xf32>
    %38 = vector.shape_cast %37 : vector<16xf32> to vector<16x1xf32>
    %cst_20 = arith.constant 3.200000e+01 : f32
    %39 = vector.broadcast %cst_20 : f32 to vector<16x1xf32>
    %40 = arith.divf %38, %39 : vector<16x1xf32>
    %41 = vector.broadcast %33 : vector<16x1xf32> to vector<16x32xf32>
    %42 = arith.subf %27, %41 : vector<16x32xf32>
    %cst_21 = arith.constant 9.99999974E-6 : f32
    %43 = vector.broadcast %cst_21 : f32 to vector<16x1xf32>
    %44 = arith.addf %40, %43 : vector<16x1xf32>
    %45 = math.rsqrt %44 : vector<16x1xf32>
    %46 = vector.broadcast %45 : vector<16x1xf32> to vector<16x32xf32>
    %47 = arith.mulf %42, %46 : vector<16x32xf32>
    %48 = vector.broadcast %28 : vector<1x32xf32> to vector<16x32xf32>
    %49 = arith.mulf %47, %48 : vector<16x32xf32>
    %50 = vector.broadcast %29 : vector<1x32xf32> to vector<16x32xf32>
    %51 = arith.addf %49, %50 : vector<16x32xf32>
    %c0_22 = arith.constant 0 : index
    %c0_23 = arith.constant 0 : index
    %52 = vector.load %arg7[%c0_22, %c0_23] : memref<32x32xf32, #tpu.memory_space<vmem>>, vector<32x32xf32>
    %cst_24 = arith.constant dense<0.000000e+00> : vector<8x32xf32>
    %53 = tpu.matmul %25, %52, %cst_24 {dimension_numbers = #tpu.dot_dimension_numbers<[1], [0], [0], [1], [0, 0, 1, 1], [], []>} : vector<8x32xf32>, vector<32x32xf32>, vector<8x32xf32> -> vector<8x32xf32>
    %c0_25 = arith.constant 0 : index
    %c0_26 = arith.constant 0 : index
    %54 = vector.load %arg8[%c0_25, %c0_26] : memref<1x32xf32, #tpu.memory_space<vmem>>, vector<1x32xf32>
    %55 = vector.broadcast %54 : vector<1x32xf32> to vector<8x32xf32>
    %56 = arith.addf %53, %55 : vector<8x32xf32>
    %c0_27 = arith.constant 0 : index
    %c0_28 = arith.constant 0 : index
    %57 = vector.load %arg9[%c0_27, %c0_28] : memref<32x32xf32, #tpu.memory_space<vmem>>, vector<32x32xf32>
    %cst_29 = arith.constant dense<0.000000e+00> : vector<16x32xf32>
    %58 = tpu.matmul %51, %57, %cst_29 {dimension_numbers = #tpu.dot_dimension_numbers<[1], [0], [0], [1], [0, 0, 1, 1], [], []>} : vector<16x32xf32>, vector<32x32xf32>, vector<16x32xf32> -> vector<16x32xf32>
    %c0_30 = arith.constant 0 : index
    %c0_31 = arith.constant 0 : index
    %59 = vector.load %arg10[%c0_30, %c0_31] : memref<1x32xf32, #tpu.memory_space<vmem>>, vector<1x32xf32>
    %60 = vector.broadcast %59 : vector<1x32xf32> to vector<16x32xf32>
    %61 = arith.addf %58, %60 : vector<16x32xf32>
    %c0_32 = arith.constant 0 : index
    %c0_33 = arith.constant 0 : index
    %62 = vector.load %arg11[%c0_32, %c0_33] : memref<32x32xf32, #tpu.memory_space<vmem>>, vector<32x32xf32>
    %cst_34 = arith.constant dense<0.000000e+00> : vector<16x32xf32>
    %63 = tpu.matmul %51, %62, %cst_34 {dimension_numbers = #tpu.dot_dimension_numbers<[1], [0], [0], [1], [0, 0, 1, 1], [], []>} : vector<16x32xf32>, vector<32x32xf32>, vector<16x32xf32> -> vector<16x32xf32>
    %c0_35 = arith.constant 0 : index
    %c0_36 = arith.constant 0 : index
    %64 = vector.load %arg12[%c0_35, %c0_36] : memref<1x32xf32, #tpu.memory_space<vmem>>, vector<1x32xf32>
    %65 = vector.broadcast %64 : vector<1x32xf32> to vector<16x32xf32>
    %66 = arith.addf %63, %65 : vector<16x32xf32>
    %cst_37 = arith.constant dense<0.000000e+00> : vector<8x16xf32>
    %67 = tpu.matmul %56, %61, %cst_37 {dimension_numbers = #tpu.dot_dimension_numbers<[1], [1], [0], [0], [0, 0, 1, 0], [], []>} : vector<8x32xf32>, vector<16x32xf32>, vector<8x16xf32> -> vector<8x16xf32>
    %cst_38 = arith.constant 0.176776692 : f32
    %68 = vector.broadcast %cst_38 : f32 to vector<8x16xf32>
    %69 = arith.mulf %67, %68 : vector<8x16xf32>
    %cst_39 = arith.constant dense<0xFF800000> : vector<8xf32>
    %70 = vector.multi_reduction <maximumf>, %69, %cst_39 [1] : vector<8x16xf32> to vector<8xf32>
    %71 = vector.shape_cast %70 : vector<8xf32> to vector<8x1xf32>
    %72 = vector.broadcast %71 : vector<8x1xf32> to vector<8x16xf32>
    %73 = arith.subf %69, %72 : vector<8x16xf32>
    %74 = math.exp %73 : vector<8x16xf32>
    %cst_40 = arith.constant dense<0.000000e+00> : vector<8xf32>
    %75 = vector.multi_reduction <add>, %74, %cst_40 [1] : vector<8x16xf32> to vector<8xf32>
    %76 = vector.shape_cast %75 : vector<8xf32> to vector<8x1xf32>
    %77 = tpu.reciprocal %76 {approx = true} : vector<8x1xf32> -> vector<8x1xf32>
    %78 = vector.broadcast %77 : vector<8x1xf32> to vector<8x16xf32>
    %79 = arith.mulf %74, %78 : vector<8x16xf32>
    %cst_41 = arith.constant dense<0.000000e+00> : vector<8x32xf32>
    %80 = tpu.matmul %79, %66, %cst_41 {dimension_numbers = #tpu.dot_dimension_numbers<[1], [0], [0], [1], [0, 0, 1, 1], [], []>} : vector<8x16xf32>, vector<16x32xf32>, vector<8x32xf32> -> vector<8x32xf32>
    %c0_42 = arith.constant 0 : index
    %c0_43 = arith.constant 0 : index
    %81 = vector.load %arg13[%c0_42, %c0_43] : memref<32x32xf32, #tpu.memory_space<vmem>>, vector<32x32xf32>
    %cst_44 = arith.constant dense<0.000000e+00> : vector<8x32xf32>
    %82 = tpu.matmul %80, %81, %cst_44 {dimension_numbers = #tpu.dot_dimension_numbers<[1], [0], [0], [1], [0, 0, 1, 1], [], []>} : vector<8x32xf32>, vector<32x32xf32>, vector<8x32xf32> -> vector<8x32xf32>
    %c0_45 = arith.constant 0 : index
    %c0_46 = arith.constant 0 : index
    %83 = vector.load %arg14[%c0_45, %c0_46] : memref<1x32xf32, #tpu.memory_space<vmem>>, vector<1x32xf32>
    %84 = vector.broadcast %83 : vector<1x32xf32> to vector<8x32xf32>
    %85 = arith.addf %82, %84 : vector<8x32xf32>
    %c0_47 = arith.constant 0 : index
    %c0_48 = arith.constant 0 : index
    %c0_49 = arith.constant 0 : index
    %86 = vector.load %arg15[%c0_47, %c0_48, %c0_49] : memref<1x8x32xf32, #tpu.memory_space<vmem>>, vector<1x8x32xf32>
    %87 = vector.shape_cast %86 : vector<1x8x32xf32> to vector<8x32xf32>
    %88 = vector.shape_cast %85 : vector<8x32xf32> to vector<1x8x32xf32>
    tpu.vector_store %arg15[%c0_47, %c0_48, %c0_49], %88 {strides = array<i32>} : memref<1x8x32xf32, #tpu.memory_space<vmem>>, vector<1x8x32xf32>,
    return
  }
  func.func @transform_0(%arg0: i32) -> (i32, i32, i32) {
    %c0_i32 = arith.constant 0 : i32
    %c0_i32_0 = arith.constant 0 : i32
    %c0_i32_1 = arith.constant 0 : i32
    return %arg0, %c0_i32, %c0_i32_0 : i32, i32, i32
  }
  func.func @transform_1(%arg0: i32) -> (i32, i32, i32) {
    %c0_i32 = arith.constant 0 : i32
    %c0_i32_0 = arith.constant 0 : i32
    %c0_i32_1 = arith.constant 0 : i32
    return %arg0, %c0_i32, %c0_i32_0 : i32, i32, i32
  }
  func.func @transform_2(%arg0: i32) -> (i32, i32) {
    %c0_i32 = arith.constant 0 : i32
    %c0_i32_0 = arith.constant 0 : i32
    %c0_i32_1 = arith.constant 0 : i32
    return %c0_i32, %c0_i32_0 : i32, i32
  }
  func.func @transform_3(%arg0: i32) -> (i32, i32) {
    %c0_i32 = arith.constant 0 : i32
    %c0_i32_0 = arith.constant 0 : i32
    %c0_i32_1 = arith.constant 0 : i32
    return %c0_i32, %c0_i32_0 : i32, i32
  }
  func.func @transform_4(%arg0: i32) -> (i32, i32) {
    %c0_i32 = arith.constant 0 : i32
    %c0_i32_0 = arith.constant 0 : i32
    %c0_i32_1 = arith.constant 0 : i32
    return %c0_i32, %c0_i32_0 : i32, i32
  }
  func.func @transform_5(%arg0: i32) -> (i32, i32) {
    %c0_i32 = arith.constant 0 : i32
    %c0_i32_0 = arith.constant 0 : i32
    %c0_i32_1 = arith.constant 0 : i32
    return %c0_i32, %c0_i32_0 : i32, i32
  }
  func.func @transform_6(%arg0: i32) -> (i32, i32) {
    %c0_i32 = arith.constant 0 : i32
    %c0_i32_0 = arith.constant 0 : i32
    %c0_i32_1 = arith.constant 0 : i32
    return %c0_i32, %c0_i32_0 : i32, i32
  }
  func.func @transform_7(%arg0: i32) -> (i32, i32) {
    %c0_i32 = arith.constant 0 : i32
    %c0_i32_0 = arith.constant 0 : i32
    %c0_i32_1 = arith.constant 0 : i32
    return %c0_i32, %c0_i32_0 : i32, i32
  }
  func.func @transform_8(%arg0: i32) -> (i32, i32) {
    %c0_i32 = arith.constant 0 : i32
    %c0_i32_0 = arith.constant 0 : i32
    %c0_i32_1 = arith.constant 0 : i32
    return %c0_i32, %c0_i32_0 : i32, i32
  }
  func.func @transform_9(%arg0: i32) -> (i32, i32) {
    %c0_i32 = arith.constant 0 : i32
    %c0_i32_0 = arith.constant 0 : i32
    %c0_i32_1 = arith.constant 0 : i32
    return %c0_i32, %c0_i32_0 : i32, i32
  }
  func.func @transform_10(%arg0: i32) -> (i32, i32) {
    %c0_i32 = arith.constant 0 : i32
    %c0_i32_0 = arith.constant 0 : i32
    %c0_i32_1 = arith.constant 0 : i32
    return %c0_i32, %c0_i32_0 : i32, i32
  }
  func.func @transform_11(%arg0: i32) -> (i32, i32) {
    %c0_i32 = arith.constant 0 : i32
    %c0_i32_0 = arith.constant 0 : i32
    %c0_i32_1 = arith.constant 0 : i32
    return %c0_i32, %c0_i32_0 : i32, i32
  }
  func.func @transform_12(%arg0: i32) -> (i32, i32) {
    %c0_i32 = arith.constant 0 : i32
    %c0_i32_0 = arith.constant 0 : i32
    %c0_i32_1 = arith.constant 0 : i32
    return %c0_i32, %c0_i32_0 : i32, i32
  }
  func.func @transform_13(%arg0: i32) -> (i32, i32) {
    %c0_i32 = arith.constant 0 : i32
    %c0_i32_0 = arith.constant 0 : i32
    %c0_i32_1 = arith.constant 0 : i32
    return %c0_i32, %c0_i32_0 : i32, i32
  }
  func.func @transform_14(%arg0: i32) -> (i32, i32, i32) {
    %c0_i32 = arith.constant 0 : i32
    %c0_i32_0 = arith.constant 0 : i32
    %c0_i32_1 = arith.constant 0 : i32
    return %arg0, %c0_i32, %c0_i32_0 : i32, i32, i32
  }
}

</mosaic_0001>

<bundles_post_ra>
// kernel: perceiver_io_forward.10
= control target key start
LH: loop header
LB: loop body
LE: loop exit
PB: predicated region body
PF: predicated region fallthrough
CT: control target
= control target key end

     0   :  { %12 = vsyncpa [#allocation3], 0  ;;  %s1016_s0 = inlined_call_operand.vmem [shape: f32[2,16,32], index: 0, kind: input, shape index: {}]   ;;  %s1017_s1 = inlined_call_operand.hbm [shape: f32[1,32], index: 1, kind: input, shape index: {}]   ;;  %s1018_s2 = inlined_call_operand.hbm [shape: f32[1,32], index: 2, kind: input, shape index: {}]   ;;  %s1019_s3 = inlined_call_operand.vmem [shape: f32[32,64], index: 3, kind: input, shape index: {}]   ;;  %s1020_s4 = inlined_call_operand.hbm [shape: f32[1,64], index: 4, kind: input, shape index: {}]   ;;  %s1021_s5 = inlined_call_operand.vmem [shape: f32[64,32], index: 5, kind: input, shape index: {}]   ;;  %s1022_s6 = inlined_call_operand.hbm [shape: f32[1,32], index: 6, kind: input, shape index: {}]   ;;  %s1023_s7 = inlined_call_operand.vmem [shape: f32[2,16,32], index: 7, kind: output, shape index: {}]  }
   0x1   :  { %13 = vsyncpa [#allocation5], 0 }
   0x2   :  { %14 = vsyncpa [#allocation8], 0  ;;  %s887_s24 = smov 0  }
   0x3 LB: > { %s227_s27 = sshll.u32 %s1018_s2, 4  ;;  %s896_s28 = sadd.s32 4294967295, %s840_s24   ;;  %s840_s24 = sphi %s887_s24, %s20_s24   ;;  %s228_s27 = int_to_ptr.hbm [resolvable:$true] %s227_s27 }
   0x4   : > { %p603_p0 = scmp.ge.s32.totalorder %s840_s24, 1  ;;  %p203_p1 = scmp.lt.s32.totalorder %s840_s24, 3 }
   0x5   : > { %p667_p2 = scmp.eq.s32.totalorder %s896_s28, 0  ;;  %s842_s30 = smov [#allocation4]  }
   0x6   : > { %p901_p3 = pnand %p603_p0, %p203_p1  ;;  %s229_s8 = sshll.u32 %s842_s30, 4  ;;  %s230_s8 = int_to_ptr.vmem [resolvable:$true] %s229_s8 }
   0x7   : > { %s215_s11 = sshll.u32 %s1017_s1, 4  ;;  %s242_s14 = sshll.u32 %s1020_s4, 4  ;;  %s216_s11 = int_to_ptr.hbm [resolvable:$true] %s215_s11  ;;  %s243_s14 = int_to_ptr.hbm [resolvable:$true] %s242_s14 }
   0x8   : > { %p654_p4 = pneg %p901_p3  ;;  %s843_s16 = smov [#allocation2]  }
   0x9   : > { %s217_s17 = sshll.u32 %s843_s16, 4  ;;  %s844_s18 = smov [#allocation6]   ;;  %s218_s17 = int_to_ptr.vmem [resolvable:$true] %s217_s17 }
   0xa   : > { %p915_p5 = pnand %p667_p2, %p654_p4  ;;  %s244_s19 = sshll.u32 %s844_s18, 4  ;;  %s245_s19 = int_to_ptr.vmem [resolvable:$true] %s244_s19 }
   0xb   : > { %s257_s22 = sshll.u32 %s1022_s6, 4  ;;  %s845_s23 = smov [#allocation7]   ;;  %s258_s22 = int_to_ptr.hbm [resolvable:$true] %s257_s22 }
   0xc   : > { %660 = dma.hbm_to_vmem [thread:$0]  (!%p915_p5), %s228_s27, 16, %s230_s8, [#allocation5]  }
   0xd   : > { %657 = dma.hbm_to_vmem [thread:$0]  (!%p915_p5), %s216_s11, 16, %s218_s17, [#allocation3]  }
   0xe   : > { %663 = dma.hbm_to_vmem [thread:$0]  (!%p915_p5), %s243_s14, 16, %s245_s19, [#allocation5]  }
   0xf   : > { %s259_s25 = sshll.u32 %s845_s23, 4  ;;  %280 = sbr.rel (%p901_p3) target bundleno = 593 (0x251), region = 48  ;;  %s260_s25 = int_to_ptr.vmem [resolvable:$true] %s259_s25 }
  0x10   : > { %666 = dma.hbm_to_vmem [thread:$0]  (!%p915_p5), %s258_s22, 16, %s260_s25, [#allocation8]  }
  0x14   : > { %827 = dma.done.wait (%p667_p2), [#allocation3], 16  }
  0x15   : > { %829 = vsyncadd (%p667_p2), [#allocation3], 4294967280 }
  0x16   : > { %831 = dma.done.wait (%p667_p2), [#allocation5], 32  }
  0x17   : > { %833 = vsyncadd (%p667_p2), [#allocation5], 4294967264 }
  0x18   : > { %835 = dma.done.wait (%p667_p2), [#allocation8], 16  }
  0x19   : > { %837 = vsyncadd (%p667_p2), [#allocation8], 4294967280  ;;  %p328_p6 = scmp.lt.s32.totalorder %s896_s28, 1  ;;  %vm342_vm0 = vcmask 261120   ;;  %v846_v4 = vmov 32.0   ;;  %v407_v21 = vld [vmem:[%s1019_s3 + $0x18] sm:$0xff] }
  0x1a   : > { %692 = vrcp.f32 %v846_v4  ;;  %626 = vmatpush.msra.mxu3 %v407_v21  ;;  %430 = vmatpush.msra.mxu0 %v407_v21  ;;  %v406_v22 = vld [vmem:[%s1019_s3 + $0x10] sm:$0xff]  ;;  %v405_v23 = vld [vmem:[%s1019_s3 + $0x8] sm:$0xff]  ;;  %v404_v24 = vld [vmem:[%s1019_s3] sm:$0xff]  ;;  %vm471_vm8 = vcmask 523264  }
  0x1b   : > { %s1027_s28 = smov (!%p328_p6, %s896_s28), 1  ;;  %v688_v39 = vld [vmem:[#allocation2] ss:$0 sm:$0xff]  ;;  %v689_v43 = vld [vmem:[#allocation4] ss:$0 sm:$0xff]  ;;  %v466_v53 = vld [vmem:[%s1021_s5 + $0x38] sm:$0xff] }
  0x1c   : > { %s624_s26 = sshll.u32 %s1027_s28, 4  ;;  %627 = vmatpush.msra.mxu3 %v406_v22  ;;  %431 = vmatpush.msra.mxu0 %v406_v22  ;;  %v465_v54 = vld [vmem:[%s1021_s5 + $0x30] sm:$0xff]  ;;  %v464_v55 = vld [vmem:[%s1021_s5 + $0x28] sm:$0xff]  ;;  %v463_v56 = vld [vmem:[%s1021_s5 + $0x20] sm:$0xff] }
  0x1d   : > { %s332_s30 = scalar_lea.vmem %s1016_s0, %s624_s26  ;;  %630 = vmatpush.msra.mxu2 %v466_v53  ;;  %486 = vmatpush.msra.mxu1 %v466_v53  ;;  %v462_v57 = vld [vmem:[%s1021_s5 + $0x18] sm:$0xff]  ;;  %v461_v58 = vld [vmem:[%s1021_s5 + $0x10] sm:$0xff]  ;;  %v460_v59 = vld [vmem:[%s1021_s5 + $0x8] sm:$0xff]  ;;  %s337_s14 = scalar_lea.vmem %s1023_s7, %s624_s26 }
  0x1e   : > { %v954_v0 = vld [vmem:[%s332_s30 + $0x8] sm:$0xff]  ;;  %v958_v2 = vld [vmem:[%s332_s30] sm:$0xff]  ;;  %628 = vmatpush.msra.mxu3 %v405_v23  ;;  %432 = vmatpush.msra.mxu0 %v405_v23 }
  0x1f   : > { %v346_v1 = vsel %vm342_vm0, %v954_v0, 0.0  ;;  %v343_v3 = vsel %vm342_vm0, %v958_v2, 0.0  ;;  %631 = vmatpush.msra.mxu2 %v465_v54  ;;  %487 = vmatpush.msra.mxu1 %v465_v54  ;;  %v459_v60 = vld [vmem:[%s1021_s5] sm:$0xff] }
  0x20   : > { %347 = vadd.xlane.f32.xlu0 %v346_v1  ;;  %v693_v5 = vpop.eup %692  ;;  %629 = vmatpush.msra.mxu3 %v404_v24  ;;  %v690_v61 = vld [vmem:[#allocation6] ss:$0 sm:$0xff]  ;;  %v691_v22 = vld [vmem:[#allocation7] ss:$0 sm:$0xff] }
  0x21   : > { %v350_v6 = vmul.f32 32.0, %v693_v5  ;;  %vm354_vm1 = vweird.f32 %v693_v5  ;;  %433 = vmatpush.msra.mxu0 %v404_v24  ;;  %632 = vmatpush.msra.mxu2 %v464_v55 }
  0x22   : > { %488 = vmatpush.msra.mxu1 %v464_v55 }
  0x23   : > { %v351_v7 = vsub.f32 1.0, %v350_v6  ;;  %633 = vmatpush.msra.mxu2 %v463_v56 }
  0x24   : > { %489 = vmatpush.msra.mxu1 %v463_v56 }
  0x25   : > { %v352_v8 = vmul.f32 %v693_v5, %v351_v7  ;;  %634 = vmatpush.msra.mxu2 %v462_v57 }
  0x26   : > { %490 = vmatpush.msra.mxu1 %v462_v57 }
  0x27   : > { %v353_v9 = vadd.f32 %v693_v5, %v352_v8  ;;  %635 = vmatpush.msra.mxu2 %v461_v58 }
  0x28   : > { %344 = vadd.xlane.f32.xlu0 %v343_v3  ;;  %491 = vmatpush.msra.mxu1 %v461_v58 }
  0x29   : > { %v355_v10 = vsel %vm354_vm1, %v693_v5, %v353_v9  ;;  %636 = vmatpush.msra.mxu2 %v460_v59 }
  0x2a   : > { %492 = vmatpush.msra.mxu1 %v460_v59 }
  0x2b   : > { %637 = vmatpush.msra.mxu2 %v459_v60 }
  0x2c   : > { %493 = vmatpush.msra.mxu1 %v459_v60 }
  0x93   : > { %v348_v11 = vpop.xlane.xlu0 %347 }
  0x94   : > { %v357_v12 = vmul.f32 %v355_v10, %v348_v11 }
  0x96   : > { %v359_v13 = vsub.f32 %v954_v0, %v357_v12 }
  0x98   : > { %v361_v14 = vmul.f32 %v359_v13, %v359_v13 }
  0x9a   : > { %v365_v15 = vsel %vm342_vm0, %v361_v14, 0.0 }
  0x9b   : > { %366 = vadd.xlane.f32.xlu1 %v365_v15  ;;  %v345_v16 = vpop.xlane.xlu0 %344 }
  0x9c   : > { %v356_v17 = vmul.f32 %v355_v10, %v345_v16 }
  0x9e   : > { %v358_v18 = vsub.f32 %v958_v2, %v356_v17 }
  0xa0   : > { %v360_v19 = vmul.f32 %v358_v18, %v358_v18 }
  0xa2   : > { %v362_v20 = vsel %vm342_vm0, %v360_v19, 0.0 }
  0xa3   : > { %363 = vadd.xlane.f32.xlu1 %v362_v20 }
 0x10e   : > { %v367_v25 = vpop.xlane.xlu1 %366 }
 0x10f   : > { %v369_v26 = vmul.f32 %v367_v25, %v355_v10 }
 0x111   : > { %v371_v27 = vadd.f32 1e-05, %v369_v26 }
 0x113   : > { %694 = vrsqrt.f32 %v371_v27  ;;  %vm388_vm3 = vweird.f32 %v371_v27 }
 0x116   : > { %v364_v28 = vpop.xlane.xlu1 %363 }
 0x117   : > { %v368_v29 = vmul.f32 %v364_v28, %v355_v10 }
 0x119   : > { %v695_v30 = vpop.eup %694  ;;  %v370_v31 = vadd.f32 1e-05, %v368_v29 }
 0x11a   : > { %v383_v32 = vmul.f32 %v695_v30, %v371_v27  ;;  %vm389_vm2 = vweird.f32 %v695_v30 }
 0x11b   : > { %696 = vrsqrt.f32 %v370_v31  ;;  %vm390_vm4 = vmor %vm388_vm3, %vm389_vm2  ;;  %vm378_vm6 = vweird.f32 %v370_v31 }
 0x11c   : > { %v384_v33 = vmul.f32 %v695_v30, %v383_v32 }
 0x11e   : > { %v385_v34 = vmul.f32 0.5, %v384_v33 }
 0x120   : > { %v386_v35 = vsub.f32 1.5, %v385_v34 }
 0x121   : > { %v697_v36 = vpop.eup %696 }
 0x122   : > { %v387_v37 = vmul.f32 %v695_v30, %v386_v35  ;;  %v373_v38 = vmul.f32 %v697_v36, %v370_v31  ;;  %vm379_vm5 = vweird.f32 %v697_v36 }
 0x123   : > { %vm380_vm7 = vmor %vm378_vm6, %vm379_vm5 }
 0x124   : > { %v391_v40 = vsel %vm390_vm4, %v695_v30, %v387_v37  ;;  %v374_v41 = vmul.f32 %v697_v36, %v373_v38 }
 0x125   : > { %v393_v42 = vmul.f32 %v391_v40, %v359_v13 }
 0x126   : > { %v375_v44 = vmul.f32 0.5, %v374_v41 }
 0x127   : > { %v398_v45 = vmul.f32 %v688_v39, %v393_v42 }
 0x128   : > { %v376_v46 = vsub.f32 1.5, %v375_v44 }
 0x129   : > { %v403_v47 = vadd.f32 %v689_v43, %v398_v45 }
 0x12a   : > { %v377_v48 = vmul.f32 %v697_v36, %v376_v46 }
 0x12b   : > { %619 = vmatmul.msk.f32.vlgmr.msra.gmra.mxu3 %vm342_vm0, %v403_v47 }
 0x12c   : > { %v381_v49 = vsel %vm380_vm7, %v697_v36, %v377_v48 }
 0x12d   : > { %v392_v50 = vmul.f32 %v381_v49, %v358_v18 }
 0x12f   : > { %v397_v51 = vmul.f32 %v688_v39, %v392_v50 }
 0x131   : > { %v402_v52 = vadd.f32 %v689_v43, %v397_v51 }
 0x133   : > { %618 = vmatmul.msk.f32.vlgmr.msra.gmra.mxu0 %vm342_vm0, %v402_v52 }
 0x1ae   : > { %v438_v62 = vpop.f32.mrf.mxu3 }
 0x1af   : > { %v439_v63 = vadd.f32 %v690_v61, %v438_v62 }
 0x1b0   : > { %v435_v1 = vpop.f32.mrf.mxu0 }
 0x1b1   : > { %v442_v3 = vmul.f32 %v439_v63, %v439_v63  ;;  %v436_v4 = vadd.f32 %v690_v61, %v435_v1 }
 0x1b3   : > { %v444_v5 = vmul.f32 %v442_v3, %v439_v63  ;;  %v441_v6 = vmul.f32 %v436_v4, %v436_v4 }
 0x1b5   : > { %v446_v7 = vmul.f32 0.044715, %v444_v5  ;;  %v443_v8 = vmul.f32 %v441_v6, %v436_v4 }
 0x1b7   : > { %v448_v9 = vadd.f32 %v446_v7, %v439_v63  ;;  %v445_v10 = vmul.f32 0.044715, %v443_v8 }
 0x1b9   : > { %v447_v11 = vadd.f32 %v445_v10, %v436_v4  ;;  %v450_v12 = vmul.f32 0.7978846, %v448_v9 }
 0x1bb   : > { %698 = vtanh.f32 %v450_v12  ;;  %v449_v13 = vmul.f32 0.7978846, %v447_v11 }
 0x1bd   : > { %700 = vtanh.f32 %v449_v13 }
 0x1c1   : > { %v699_v14 = vpop.eup %698 }
 0x1c2   : > { %v454_v15 = vadd.f32 1.0, %v699_v14 }
 0x1c3   : > { %v701_v16 = vpop.eup %700 }
 0x1c4   : > { %v456_v17 = vmul.f32 0.5, %v454_v15  ;;  %v453_v18 = vadd.f32 1.0, %v701_v16 }
 0x1c6   : > { %v458_v19 = vmul.f32 %v456_v17, %v439_v63  ;;  %v455_v20 = vmul.f32 0.5, %v453_v18 }
 0x1c8   : > { %621 = vmatmul.msk.f32.vlgmr.msra.gmra.mxu2 %vm471_vm8, %v458_v19  ;;  %v457_v21 = vmul.f32 %v455_v20, %v436_v4 }
 0x1ca   : > { %620 = vmatmul.msk.f32.vlgmr.msra.gmra.mxu1 %vm471_vm8, %v457_v21 }
 0x247   : > { %v495_v23 = vpop.f32.mrf.mxu1 }
 0x248   : > { %v496_v24 = vadd.f32 %v691_v22, %v495_v23 }
 0x24a   : > { %v501_v25 = vadd.f32 %v496_v24, %v958_v2 }
 0x24b   : > { %v498_v26 = vpop.f32.mrf.mxu2 }
 0x24c   : > { %503 = vst.msk [vmem:[%s337_s14] sm:$0xff] %vm342_vm0, %v501_v25  ;;  %v499_v27 = vadd.f32 %v691_v22, %v498_v26 }
 0x24e   : > { %v502_v28 = vadd.f32 %v499_v27, %v954_v0 }
 0x250   : > { %504 = vst.msk [vmem:[%s337_s14 + $0x8] sm:$0xff] %vm342_vm0, %v502_v28 }
 0x251 PF: > { %s20_s24 = sadd.s32 1, %s840_s24  }
 0x252   : > { %p17_p7 = scmp.ge.s32.totalorder %s20_s24, 4  }
 0x254   :  { %19 = sbr.rel (!%p17_p7) target bundleno = 3 (0x3), region = 95 }
 0x259   :  { %526 = vsyncpa [#allocation3], 1 }
 0x25a   :  { %528 = vsyncpa [#allocation3 + $0x1], 1 }
 0x25b   :  { %529 = vsyncpa [#allocation5], 1 }
 0x25c   :  { %530 = vsyncpa [#allocation8], 1 }

// kernel: perceiver_io_forward.9
= control target key start
LH: loop header
LB: loop body
LE: loop exit
PB: predicated region body
PF: predicated region fallthrough
CT: control target
= control target key end

     0   :  { %s1437_s0 = inlined_call_operand.vmem [shape: f32[2,16,32], index: 0, kind: input, shape index: {}]   ;;  %s1438_s1 = inlined_call_operand.hbm [shape: f32[2,8,16], index: 1, kind: input, shape index: {}]   ;;  %s1439_s2 = inlined_call_operand.vmem [shape: f32[1,32], index: 2, kind: input, shape index: {}]   ;;  %s1440_s3 = inlined_call_operand.vmem [shape: f32[1,32], index: 3, kind: input, shape index: {}]   ;;  %s1441_s4 = inlined_call_operand.vmem [shape: f32[1,16], index: 4, kind: input, shape index: {}]   ;;  %s1442_s5 = inlined_call_operand.vmem [shape: f32[1,16], index: 5, kind: input, shape index: {}]   ;;  %s1443_s6 = inlined_call_operand.vmem [shape: f32[32,32], index: 6, kind: input, shape index: {}]   ;;  %s1444_s7 = inlined_call_operand.vmem [shape: f32[1,32], index: 7, kind: input, shape index: {}]   ;;  %s1445_s8 = inlined_call_operand.vmem [shape: f32[16,32], index: 8, kind: input, shape index: {}]   ;;  %s1446_s9 = inlined_call_operand.vmem [shape: f32[1,32], index: 9, kind: input, shape index: {}]   ;;  %s1447_s10 = inlined_call_operand.hbm [shape: f32[16,32], index: 10, kind: input, shape index: {}]   ;;  %s1448_s11 = inlined_call_operand.vmem [shape: f32[1,32], index: 11, kind: input, shape index: {}]   ;;  %s1449_s12 = inlined_call_operand.vmem [shape: f32[32,32], index: 12, kind: input, shape index: {}]   ;;  %s1450_s13 = inlined_call_operand.vmem [shape: f32[1,32], index: 13, kind: input, shape index: {}]   ;;  %s1451_s14 = inlined_call_operand.vmem [shape: f32[2,16,32], index: 14, kind: output, shape index: {}]  }
   0x1   :  { %1455 = sst [smem:[#allocation11_spill]] %s1447_s10 }
   0x2   :  { %1456 = sst [smem:[#allocation12_spill]] %s1451_s14 }
   0x3   :  { %19 = vsyncpa [#allocation3], 0 }
   0x4   :  { %21 = vsyncpa [#allocation3 + $0x1], 0 }
   0x5   :  { %22 = vsyncpa [#allocation5], 0  ;;  %s1227_s29 = smov 0   ;;  %s1229_s30 = smov 0  }
   0x6   :  { %s1231_s15 = smov 0   ;;  %s1233_s16 = smov 0  }
   0x7 LB: > { %1457 = sst [smem:[#allocation8_spill]] %s1141_s15  ;;  %s1249_s20 = sadd.s32 4294967295, %s1145_s16   ;;  %s1145_s16 = sphi %s1233_s16, %s1465_s16   ;;  %s1141_s15 = sphi %s1231_s15, %s1467_s15   ;;  %s1137_s30 = sphi %s1229_s30, %s1469_s30   ;;  %s1133_s29 = sphi %s1227_s29, %s1468_s29  }
   0x8   : > { %s1458_s10 = sld [smem:[#allocation11_spill]]  ;;  %p940_p0 = scmp.ge.s32.totalorder %s1145_s16, 1 }
   0x9   : > { %p75_p1 = scmp.eq.s32.totalorder %s1249_s20, 0  ;;  %p363_p2 = scmp.lt.s32.totalorder %s1145_s16, 3 }
   0xa   : > { %s1147_s22 = smov [#allocation4]   ;;  %s1148_s24 = smov 128  }
   0xb   : > { %p1254_p3 = pnand %p940_p0, %p363_p2  ;;  %s400_s23 = sshll.u32 %s1147_s22, 4  ;;  %s401_s23 = int_to_ptr.vmem [resolvable:$true] %s400_s23 }
   0xc   : > { %s1149_s25 = smov 8   ;;  %s1263_s26 = sadd.s32 1, %s1145_s16  }
   0xd   : > { %p973_p4 = pneg %p1254_p3  ;;  %1460 = sst [smem:[#allocation9_spill]] %s1263_s26 }
   0xe   : > { %s398_s19 = sshll.u32 %s1458_s10, 4  ;;  %s58_s27 = ssub.s32 %s1145_s16, %s1263_s26  ;;  %s399_s19 = int_to_ptr.hbm [resolvable:$true] %s398_s19 }
   0xf   : > { %p974_p5 = pnand %p973_p4, %p75_p1  ;;  %s61_s28 = sadd.s32 1, %s1141_s15 }
  0x10   : > { %p59_p6 = scmp.eq.s32.totalorder %s58_s27, 0  ;;  %p68_p7 = scmp.ne.s32.totalorder %s1141_s15, %s1137_s30 }
  0x11   : > { %976 = dma.hbm_to_vmem [thread:$0]  (!%p974_p5), %s399_s19, 256, %s401_s23, [#allocation5], %s1148_s24, %s1148_s24, %s1149_s25  }
  0x12   : > { %p69_p8 = scmp.eq.s32.totalorder %s1145_s16, 0  ;;  %p74_p9 = scmp.ne.s32.totalorder %s1137_s30, %s1133_s29 }
  0x13   : > { %s1273_s17 = scalar_select %p59_p6, %s1141_s15, %s61_s28  }
  0x14   : > { %p70_p10 = por %p69_p8, %p68_p7  ;;  %p1277_p11 = por %p75_p1, %p74_p9 }
  0x15   : > { %1461 = sst [smem:[#allocation10_spill]] %s1273_s17  ;;  %p982_p12 = scmp.lt.s32.totalorder %s1145_s16, 2 }
  0x16   : > { %s431_s22 = sand.u32 1, %s1141_s15   ;;  %s944_s23 = sshll.u32 %s1145_s16, 3 }
  0x17   : > { %s943_s19 = sshll.u32 %s431_s22, 3  ;;  %s439_s10 = scalar_lea.hbm %s1438_s1, %s944_s23 }
  0x18   : > { %s435_s27 = scalar_lea.vmem [#allocation2], %s943_s19  ;;  %s441_s14 = sshll.u32 %s439_s10, 4  ;;  %s442_s14 = int_to_ptr.hbm [resolvable:$true] %s441_s14 }
  0x19   : > { %s443_s26 = sshll.u32 %s435_s27, 4  ;;  %p1287_p13 = pnand %p982_p12, %p70_p10  ;;  %s444_s26 = int_to_ptr.vmem [resolvable:$true] %s443_s26 }
  0x1a   : > { %s432_s28 = scalar_lea.sflag [#allocation3], %s431_s22  ;;  %s1077_s17 = sshra.s32 %s442_s14, 4  ;;  %s1078_s17 = int_to_ptr.hbm [resolvable:$true] %s1077_s17 }
  0x1b   : > { %s1079_s15 = scalar_lea.hbm %s1078_s17, 8  ;;  %p1081_p2 = pneg %p1287_p13 }
  0x1c   : > { %p1080_p0 = scmp.ne.s32.totalorder %s1078_s17, %s1079_s15  ;;  %s1084_s10 = scalar_lea.hbm %s1438_s1, 16 }
  0x1d   : > { %p1085_p6 = scmp.lt.s32.totalorder %s1078_s17, %s1438_s1  ;;  %p1086_p7 = scmp.lt.s32.totalorder %s1084_s10, %s1079_s15 }
  0x1e   : > { %p1082_p4 = pnand %p1081_p2, %p1080_p0 }
  0x1f   : > { %p1087_p8 = por %p1086_p7, %p1085_p6 }
  0x20   : > { %p1083_p5 = pneg %p1082_p4 }
  0x22   : > { %p1088_p9 = pnand %p1087_p8, %p1083_p5 }
  0x24   : > { %1091 = shalt.err (!%p1088_p9)
}
  0x25   : > { %980 = dma.hbm_to_vmem [thread:$0]  (!%p1287_p13), %s442_s14, 128, %s444_s26, %s432_s28  }
  0x26   : > { %452 = sbr.rel (%p1254_p3) target bundleno = 1110 (0x456), region = 76  ;;  %s454_s22 = sand.u32 (!%p1254_p3), 1, %s1137_s30  }
  0x27   : > { %s946_s25 = sshll.u32 (!%p1254_p3), %s454_s22, 3  ;;  %s455_s27 = scalar_lea.sflag (!%p1254_p3), [#allocation3], %s454_s22 }
  0x28   : > { %s458_s16 = scalar_lea.vmem (!%p1254_p3), [#allocation2], %s946_s25 }
  0x2b   : > { %1124 = dma.done.wait (%p1277_p11), %s455_s27, 128  }
  0x2c   : > { %1126 = vsyncadd (%p1277_p11), %s455_s27, 4294967168 }
  0x2d   : > { %1128 = dma.done.wait (%p75_p1), [#allocation5], 256  }
  0x2e   : > { %1130 = vsyncadd (%p75_p1), [#allocation5], 4294967040  ;;  %p514_p3 = scmp.lt.s32.totalorder %s1249_s20, 1  ;;  %vm593_vm0 = vcmask 130048   ;;  %v590_v0 = vld [vmem:[%s458_s16] sm:$0xff]  ;;  %vm528_vm1 = vcmask 261120  }
  0x2f   : > { %v594_v2 = vsel %vm593_vm0, %v590_v0, 0.0  ;;  %v1150_v6 = vmov 16.0   ;;  %v1151_v8 = vmov 32.0   ;;  %v669_v35 = vld [vmem:[%s1445_s8 + $0x8] sm:$0xff]  ;;  %v698_v36 = vld [vmem:[#allocation4 + $0x8] sm:$0xff]  ;;  %v668_v37 = vld [vmem:[%s1445_s8] sm:$0xff] }
  0x30   : > { %s1471_s20 = smov (!%p514_p3, %s1249_s20), 1  ;;  %595 = vadd.xlane.f32.xlu0 %v594_v2  ;;  %1029 = vrcp.f32 %v1150_v6  ;;  %691 = vmatpush.msra.mxu1 %v669_v35  ;;  %v697_v38 = vld [vmem:[#allocation4] sm:$0xff]  ;;  %v634_v39 = vld [vmem:[%s1443_s6 + $0x18] sm:$0xff]  ;;  %v632_v43 = vld [vmem:[%s1443_s6 + $0x8] sm:$0xff]  ;;  %vm757_vm13 = vcmask 64512   ;;  %s1464_s22 = sld [smem:[#allocation12_spill]] }
  0x31   : > { %s965_s14 = sshll.u32 %s1471_s20, 4  ;;  %1031 = vrcp.f32 %v1151_v8  ;;  %717 = vmatpush.msra.mxu2 %v698_v36  ;;  %657 = vmatpush.msra.mxu0 %v634_v39  ;;  %v633_v40 = vld [vmem:[%s1443_s6 + $0x10] sm:$0xff]  ;;  %v631_v45 = vld [vmem:[%s1443_s6] sm:$0xff] }
  0x32   : > { %s518_s26 = scalar_lea.vmem %s1437_s0, %s965_s14  ;;  %692 = vmatpush.msra.mxu1 %v668_v37  ;;  %v1021_v60 = vld [vmem:[%s1441_s4] ss:$0 sm:$0xff] }
  0x33   : > { %v1322_v1 = vld [vmem:[%s518_s26 + $0x8] sm:$0xff]  ;;  %v1327_v4 = vld [vmem:[%s518_s26] sm:$0xff]  ;;  %718 = vmatpush.msra.mxu2 %v697_v38  ;;  %658 = vmatpush.msra.mxu0 %v633_v40 }
  0x34   : > { %v532_v3 = vsel %vm528_vm1, %v1322_v1, 0.0  ;;  %v529_v5 = vsel %vm528_vm1, %v1327_v4, 0.0 }
  0x35   : > { %533 = vadd.xlane.f32.xlu1 %v532_v3  ;;  %659 = vmatpush.msra.mxu0 %v632_v43 }
  0x36   : > { %v1030_v7 = vpop.eup %1029  ;;  %s523_s25 = scalar_lea.vmem %s1464_s22, %s965_s14 }
  0x37   : > { %v598_v9 = vmul.f32 16.0, %v1030_v7  ;;  %v1032_v11 = vpop.eup %1031  ;;  %vm602_vm2 = vweird.f32 %v1030_v7  ;;  %660 = vmatpush.msra.mxu0 %v631_v45 }
  0x38   : > { %530 = vadd.xlane.f32.xlu0 %v529_v5  ;;  %v536_v13 = vmul.f32 32.0, %v1032_v11  ;;  %vm540_vm3 = vweird.f32 %v1032_v11 }
  0x39   : > { %v599_v10 = vsub.f32 1.0, %v598_v9 }
  0x3a   : > { %v537_v15 = vsub.f32 1.0, %v536_v13 }
  0x3b   : > { %v600_v12 = vmul.f32 %v1030_v7, %v599_v10  ;;  %v1023_v10 = vld [vmem:[%s1439_s2] ss:$0 sm:$0xff] }
  0x3c   : > { %v538_v17 = vmul.f32 %v1032_v11, %v537_v15 }
  0x3d   : > { %v601_v14 = vadd.f32 %v1030_v7, %v600_v12 }
  0x3e   : > { %v539_v20 = vadd.f32 %v1032_v11, %v538_v17 }
  0x3f   : > { %v603_v16 = vsel %vm602_vm2, %v1030_v7, %v601_v14  ;;  %v1024_v14 = vld [vmem:[%s1440_s3] ss:$0 sm:$0xff] }
  0x40   : > { %v541_v23 = vsel %vm540_vm3, %v1032_v11, %v539_v20 }
  0xa3   : > { %v596_v18 = vpop.xlane.xlu0 %595 }
  0xa4   : > { %v604_v19 = vmul.f32 %v603_v16, %v596_v18 }
  0xa6   : > { %v605_v21 = vsub.f32 %v590_v0, %v604_v19  ;;  %v1022_v0 = vld [vmem:[%s1442_s5] ss:$0 sm:$0xff] }
  0xa8   : > { %v606_v22 = vmul.f32 %v605_v21, %v605_v21  ;;  %v534_v24 = vpop.xlane.xlu1 %533 }
  0xa9   : > { %v543_v28 = vmul.f32 %v541_v23, %v534_v24  ;;  %v1025_v24 = vld [vmem:[%s1446_s9] ss:$0 sm:$0xff] }
  0xaa   : > { %v607_v25 = vsel %vm593_vm0, %v606_v22, 0.0 }
  0xab   : > { %608 = vadd.xlane.f32.xlu1 %v607_v25  ;;  %v531_v26 = vpop.xlane.xlu0 %530  ;;  %v1336_v30 = vsub.f32 %v1322_v1, %v543_v28  ;;  %v1027_v28 = vld [vmem:[%s1444_s7] ss:$0 sm:$0xff] }
  0xac   : > { %v542_v27 = vmul.f32 %v541_v23, %v531_v26 }
  0xad   : > { %v547_v33 = vmul.f32 %v1336_v30, %v1336_v30 }
  0xae   : > { %v1333_v29 = vsub.f32 %v1327_v4, %v542_v27  ;;  %v1026_v27 = vld [vmem:[%s1448_s11] ss:$0 sm:$0xff] }
  0xaf   : > { %v551_v34 = vsel %vm528_vm1, %v547_v33, 0.0 }
  0xb0   : > { %v546_v31 = vmul.f32 %v1333_v29, %v1333_v29 }
  0xb2   : > { %v548_v32 = vsel %vm528_vm1, %v546_v31, 0.0 }
  0xb3   : > { %549 = vadd.xlane.f32.xlu2 %v548_v32 }
  0xbb   : > { %552 = vadd.xlane.f32.xlu2 %v551_v34 }
 0x11e   : > { %v609_v41 = vpop.xlane.xlu1 %608 }
 0x11f   : > { %v610_v42 = vmul.f32 %v609_v41, %v603_v16 }
 0x121   : > { %v611_v44 = vadd.f32 1e-05, %v610_v42 }
 0x123   : > { %1033 = vrsqrt.f32 %v611_v44  ;;  %vm618_vm5 = vweird.f32 %v611_v44 }
 0x126   : > { %v550_v46 = vpop.xlane.xlu2 %549 }
 0x127   : > { %v554_v47 = vmul.f32 %v550_v46, %v541_v23 }
 0x129   : > { %v1034_v48 = vpop.eup %1033  ;;  %v556_v49 = vadd.f32 1e-05, %v554_v47 }
 0x12a   : > { %v613_v50 = vmul.f32 %v1034_v48, %v611_v44  ;;  %vm619_vm4 = vweird.f32 %v1034_v48 }
 0x12b   : > { %1035 = vrsqrt.f32 %v556_v49  ;;  %vm620_vm6 = vmor %vm618_vm5, %vm619_vm4  ;;  %vm564_vm8 = vweird.f32 %v556_v49 }
 0x12c   : > { %v614_v51 = vmul.f32 %v1034_v48, %v613_v50 }
 0x12e   : > { %v615_v52 = vmul.f32 0.5, %v614_v51  ;;  %v553_v53 = vpop.xlane.xlu2 %552  ;;  %v812_v51 = vld [vmem:[%s1449_s12 + $0x18] sm:$0xff] }
 0x12f   : > { %v555_v54 = vmul.f32 %v553_v53, %v541_v23  ;;  %835 = vmatpush.msrb.mxu2 %v812_v51  ;;  %v810_v53 = vld [vmem:[%s1449_s12 + $0x8] sm:$0xff] }
 0x130   : > { %v616_v55 = vsub.f32 1.5, %v615_v52  ;;  %v811_v52 = vld [vmem:[%s1449_s12 + $0x10] sm:$0xff] }
 0x131   : > { %v1036_v56 = vpop.eup %1035  ;;  %v557_v57 = vadd.f32 1e-05, %v555_v54  ;;  %836 = vmatpush.msrb.mxu2 %v811_v52  ;;  %v809_v54 = vld [vmem:[%s1449_s12] sm:$0xff] }
 0x132   : > { %v617_v58 = vmul.f32 %v1034_v48, %v616_v55  ;;  %v559_v59 = vmul.f32 %v1036_v56, %v556_v49  ;;  %vm565_vm7 = vweird.f32 %v1036_v56 }
 0x133   : > { %1037 = vrsqrt.f32 %v557_v57  ;;  %vm566_vm9 = vmor %vm564_vm8, %vm565_vm7  ;;  %vm574_vm11 = vweird.f32 %v557_v57  ;;  %837 = vmatpush.msrb.mxu2 %v810_v53 }
 0x134   : > { %v621_v61 = vsel %vm620_vm6, %v1034_v48, %v617_v58  ;;  %v560_v62 = vmul.f32 %v1036_v56, %v559_v59 }
 0x135   : > { %v622_v63 = vmul.f32 %v621_v61, %v605_v21  ;;  %838 = vmatpush.msrb.mxu2 %v809_v54 }
 0x136   : > { %v561_v2 = vmul.f32 0.5, %v560_v62 }
 0x137   : > { %v626_v3 = vmul.f32 %v1021_v60, %v622_v63  ;;  %v1028_v63 = vld [vmem:[%s1450_s13] ss:$0 sm:$0xff] }
 0x138   : > { %v562_v5 = vsub.f32 1.5, %v561_v2 }
 0x139   : > { %v1038_v6 = vpop.eup %1037  ;;  %v630_v7 = vadd.f32 %v1022_v0, %v626_v3 }
 0x13a   : > { %v563_v8 = vmul.f32 %v1036_v56, %v562_v5  ;;  %v569_v9 = vmul.f32 %v1038_v6, %v557_v57  ;;  %vm575_vm10 = vweird.f32 %v1038_v6 }
 0x13b   : > { %954 = vmatmul.msk.f32.vlgmr.msra.gmra.mxu1 %vm593_vm0, %v630_v7  ;;  %955 = vmatmul.msk.f32.vlgmr.msra.gmra.mxu2 %vm593_vm0, %v630_v7  ;;  %vm576_vm12 = vmor %vm574_vm11, %vm575_vm10 }
 0x13c   : > { %v567_v11 = vsel %vm566_vm9, %v1036_v56, %v563_v8  ;;  %v570_v12 = vmul.f32 %v1038_v6, %v569_v9 }
 0x13d   : > { %v578_v13 = vmul.f32 %v567_v11, %v1333_v29 }
 0x13e   : > { %v571_v15 = vmul.f32 0.5, %v570_v12 }
 0x13f   : > { %v583_v16 = vmul.f32 %v1023_v10, %v578_v13 }
 0x140   : > { %v572_v17 = vsub.f32 1.5, %v571_v15 }
 0x141   : > { %v588_v18 = vadd.f32 %v1024_v14, %v583_v16 }
 0x142   : > { %v573_v19 = vmul.f32 %v1038_v6, %v572_v17 }
 0x143   : > { %952 = vmatmul.msk.f32.vlgmr.msra.gmra.mxu0 %vm528_vm1, %v588_v18 }
 0x144   : > { %v577_v20 = vsel %vm576_vm12, %v1038_v6, %v573_v19 }
 0x145   : > { %v579_v21 = vmul.f32 %v577_v20, %v1336_v30 }
 0x147   : > { %v584_v22 = vmul.f32 %v1023_v10, %v579_v21 }
 0x149   : > { %v589_v23 = vadd.f32 %v1024_v14, %v584_v22 }
 0x14b   : > { %953 = vmatmul.msk.f32.gmra.mxu0 %vm528_vm1, %v589_v23 }
 0x1b8   : > { %v694_v25 = vpop.f32.mrf.mxu1 }
 0x1b9   : > { %v695_v26 = vadd.f32 %v1025_v24, %v694_v25 }
 0x1bb   : > { %956 = vmatpush.xpose.msk.msra.mxu3 %vm528_vm1, %v695_v26 }
 0x1be   : > { %v720_v29 = vpop.f32.mrf.mxu2 }
 0x1bf   : > { %v721_v30 = vadd.f32 %v1026_v27, %v720_v29 }
 0x1c0   : > { %v662_v31 = vpop.f32.mrf.mxu0 }
 0x1c1   : > { %v663_v32 = vadd.f32 %v1027_v28, %v662_v31  ;;  %801 = vmatpush.msrb.mxu1 %v721_v30 }
 0x1c3   : > { %957 = vmatmul.msk.f32.vlgmr.msra.gmra.mxu3 %vm528_vm1, %v663_v32 }
 0x1c8   : > { %v665_v33 = vpop.f32.mrf.mxu0 }
 0x1c9   : > { %v666_v34 = vadd.f32 %v1027_v28, %v665_v33 }
 0x1cb   : > { %958 = vmatmul.msk.f32.gmra.mxu3 %vm528_vm1, %v666_v34 }
 0x246   : > { %v749_v35 = vpop.f32.mrf.mxu3 }
 0x247   : > { %v755_v36 = vmul.f32 0.17677669, %v749_v35 }
 0x249   : > { %v758_v37 = vsel %vm757_vm13, %v755_v36, -inf }
 0x24a   : > { %759 = vmax.xlane.f32.xlu0 %v758_v37 }
 0x24e   : > { %v752_v38 = vpop.f32.mrf.mxu3 }
 0x24f   : > { %v756_v39 = vmul.f32 0.17677669, %v752_v38 }
 0x251   : > { %v761_v40 = vsel %vm757_vm13, %v756_v39, -inf }
 0x252   : > { %762 = vmax.xlane.f32.xlu1 %v761_v40 }
 0x2bd   : > { %v760_v41 = vpop.xlane.xlu0 %759 }
 0x2be   : > { %v764_v42 = vsub.f32 %v755_v36, %v760_v41 }
 0x2c0   : > { %v766_v43 = vmul.f32 1.442695, %v764_v42 }
 0x2c2   : > { %1039 = vpow2.f32 %v766_v43 }
 0x2c5   : > { %v763_v44 = vpop.xlane.xlu1 %762 }
 0x2c6   : > { %v765_v45 = vsub.f32 %v756_v39, %v763_v44 }
 0x2c8   : > { %v1040_v46 = vpop.eup %1039  ;;  %v768_v47 = vmul.f32 1.442695, %v765_v45 }
 0x2c9   : > { %v770_v48 = vsel %vm757_vm13, %v1040_v46, 0.0 }
 0x2ca   : > { %1041 = vpow2.f32 %v768_v47  ;;  %771 = vadd.xlane.f32.xlu2 %v770_v48 }
 0x2d0   : > { %v1042_v49 = vpop.eup %1041 }
 0x2d1   : > { %v773_v50 = vsel %vm757_vm13, %v1042_v49, 0.0 }
 0x2d2   : > { %774 = vadd.xlane.f32.xlu0 %v773_v50 }
 0x33d   : > { %v772_v55 = vpop.xlane.xlu2 %771 }
 0x33e   : > { %1043 = vrcp.f32 %v772_v55 }
 0x344   : > { %v1044_v56 = vpop.eup %1043 }
 0x345   : > { %v778_v57 = vmul.f32 %v1044_v56, %v1040_v46  ;;  %v775_v58 = vpop.xlane.xlu0 %774 }
 0x346   : > { %1045 = vrcp.f32 %v775_v58 }
 0x347   : > { %959 = vmatmul.msk.f32.vlgmr.msrb.gmra.mxu1 %vm757_vm13, %v778_v57 }
 0x34c   : > { %v1046_v59 = vpop.eup %1045 }
 0x34d   : > { %v779_v60 = vmul.f32 %v1046_v59, %v1042_v49 }
 0x34f   : > { %960 = vmatmul.msk.f32.gmra.mxu1 %vm757_vm13, %v779_v60 }
 0x3c4   : > { %v803_v61 = vpop.f32.mrf.mxu1 }
 0x3c5   : > { %961 = vmatmul.msk.f32.vlgmr.msrb.gmra.mxu2 %vm528_vm1, %v803_v61 }
 0x3cc   : > { %v806_v62 = vpop.f32.mrf.mxu1 }
 0x3cd   : > { %962 = vmatmul.msk.f32.gmra.mxu2 %vm528_vm1, %v806_v62 }
 0x448   : > { %v840_v0 = vpop.f32.mrf.mxu2 }
 0x449   : > { %v841_v2 = vadd.f32 %v1028_v63, %v840_v0 }
 0x44b   : > { %v846_v3 = vadd.f32 %v841_v2, %v1327_v4 }
 0x44d   : > { %848 = vst.msk [vmem:[%s523_s25] sm:$0xff] %vm528_vm1, %v846_v3 }
 0x450   : > { %v843_v5 = vpop.f32.mrf.mxu2 }
 0x451   : > { %v844_v6 = vadd.f32 %v1028_v63, %v843_v5 }
 0x453   : > { %v847_v7 = vadd.f32 %v844_v6, %v1322_v1 }
 0x455   : > { %849 = vst.msk [vmem:[%s523_s25 + $0x8] sm:$0xff] %vm528_vm1, %v847_v7 }
 0x456 PF: > { %s1465_s16 = sld [smem:[#allocation9_spill]]  ;;  %s1468_s29 = smov %s1137_s30 }
 0x457   : > { %s1466_s27 = sld [smem:[#allocation8_spill]] }
 0x458   : > { %s1467_s15 = sld [smem:[#allocation10_spill]] }
 0x45c   : > { %p25_p1 = scmp.ge.s32.totalorder %s1465_s16, 4  }
 0x45d   : > { %s1469_s30 = smov %s1466_s27 }
 0x45e   :  { %27 = sbr.rel (!%p25_p1) target bundleno = 7 (0x7), region = 123 }
 0x463   :  { %871 = vsyncpa [#allocation3], 1 }
 0x464   :  { %873 = vsyncpa [#allocation3 + $0x1], 1 }
 0x465   :  { %874 = vsyncpa [#allocation5], 1 }

// kernel: perceiver_io_forward.12
= control target key start
LH: loop header
LB: loop body
LE: loop exit
PB: predicated region body
PF: predicated region fallthrough
CT: control target
= control target key end

     0   :  { %s602_s24 = smov 0   ;;  %s692_s0 = inlined_call_operand.vmem [shape: f32[2,16,32], index: 0, kind: input, shape index: {}]   ;;  %s693_s1 = inlined_call_operand.vmem [shape: f32[1,32], index: 1, kind: input, shape index: {}]   ;;  %s694_s2 = inlined_call_operand.vmem [shape: f32[1,32], index: 2, kind: input, shape index: {}]   ;;  %s695_s3 = inlined_call_operand.vmem [shape: f32[32,64], index: 3, kind: input, shape index: {}]   ;;  %s696_s4 = inlined_call_operand.vmem [shape: f32[1,64], index: 4, kind: input, shape index: {}]   ;;  %s697_s5 = inlined_call_operand.vmem [shape: f32[64,32], index: 5, kind: input, shape index: {}]   ;;  %s698_s6 = inlined_call_operand.vmem [shape: f32[1,32], index: 6, kind: input, shape index: {}]   ;;  %s699_s7 = inlined_call_operand.vmem [shape: f32[2,16,32], index: 7, kind: output, shape index: {}]  }
   0x1 LB: > { %s501_s25 = sadd.s32 4294967295, %s559_s24   ;;  %p505_p0 = scmp.ge.s32.totalorder %s559_s24, 1  ;;  %s559_s24 = sphi %s602_s24, %s17_s24  }
   0x2   : > { %p237_p1 = scmp.lt.s32.totalorder %s559_s24, 3 }
   0x4   : > { %p238_p2 = pnand %p505_p0, %p237_p1 }
   0x5   : > { %p269_p3 = scmp.lt.s32.totalorder (!%p238_p2), %s501_s25, 1 }
   0x6   : > { %241 = sbr.rel (%p238_p2) target bundleno = 577 (0x241), region = 48 }
   0xb   : > { %s701_s25 = smov (!%p269_p3, %s501_s25), 1  ;;  %vm283_vm0 = vcmask 261120   ;;  %v561_v4 = vmov 32.0   ;;  %v348_v21 = vld [vmem:[%s695_s3 + $0x18] sm:$0xff]  ;;  %v347_v22 = vld [vmem:[%s695_s3 + $0x10] sm:$0xff]  ;;  %v346_v23 = vld [vmem:[%s695_s3 + $0x8] sm:$0xff] }
   0xc   : > { %s516_s26 = sshll.u32 %s701_s25, 4  ;;  %543 = vrcp.f32 %v561_v4  ;;  %518 = vmatpush.msra.mxu3 %v348_v21  ;;  %371 = vmatpush.msra.mxu0 %v348_v21  ;;  %v345_v24 = vld [vmem:[%s695_s3] sm:$0xff]  ;;  %v407_v53 = vld [vmem:[%s697_s5 + $0x38] sm:$0xff]  ;;  %v406_v54 = vld [vmem:[%s697_s5 + $0x30] sm:$0xff]  ;;  %vm412_vm8 = vcmask 523264  }
   0xd   : > { %s273_s29 = scalar_lea.vmem %s692_s0, %s516_s26  ;;  %v539_v39 = vld [vmem:[%s693_s1] ss:$0 sm:$0xff]  ;;  %522 = vmatpush.msra.mxu2 %v407_v53  ;;  %427 = vmatpush.msra.mxu1 %v407_v53  ;;  %v405_v55 = vld [vmem:[%s697_s5 + $0x28] sm:$0xff]  ;;  %v403_v57 = vld [vmem:[%s697_s5 + $0x18] sm:$0xff]  ;;  %s278_s21 = scalar_lea.vmem %s699_s7, %s516_s26 }
   0xe   : > { %v618_v0 = vld [vmem:[%s273_s29 + $0x8] sm:$0xff]  ;;  %v622_v2 = vld [vmem:[%s273_s29] sm:$0xff]  ;;  %519 = vmatpush.msra.mxu3 %v347_v22  ;;  %372 = vmatpush.msra.mxu0 %v347_v22  ;;  %v402_v58 = vld [vmem:[%s697_s5 + $0x10] sm:$0xff] }
   0xf   : > { %v287_v1 = vsel %vm283_vm0, %v618_v0, 0.0  ;;  %v284_v3 = vsel %vm283_vm0, %v622_v2, 0.0  ;;  %v540_v43 = vld [vmem:[%s694_s2] ss:$0 sm:$0xff]  ;;  %523 = vmatpush.msra.mxu2 %v406_v54  ;;  %428 = vmatpush.msra.mxu1 %v406_v54  ;;  %v401_v59 = vld [vmem:[%s697_s5 + $0x8] sm:$0xff] }
  0x10   : > { %288 = vadd.xlane.f32.xlu0 %v287_v1  ;;  %520 = vmatpush.msra.mxu3 %v346_v23  ;;  %v404_v56 = vld [vmem:[%s697_s5 + $0x20] sm:$0xff] }
  0x11   : > { %373 = vmatpush.msra.mxu0 %v346_v23  ;;  %524 = vmatpush.msra.mxu2 %v405_v55  ;;  %v400_v60 = vld [vmem:[%s697_s5] sm:$0xff] }
  0x12   : > { %v544_v5 = vpop.eup %543  ;;  %521 = vmatpush.msra.mxu3 %v345_v24  ;;  %429 = vmatpush.msra.mxu1 %v405_v55  ;;  %v541_v61 = vld [vmem:[%s696_s4] ss:$0 sm:$0xff] }
  0x13   : > { %v291_v6 = vmul.f32 32.0, %v544_v5  ;;  %vm295_vm1 = vweird.f32 %v544_v5  ;;  %374 = vmatpush.msra.mxu0 %v345_v24  ;;  %525 = vmatpush.msra.mxu2 %v404_v56  ;;  %v542_v22 = vld [vmem:[%s698_s6] ss:$0 sm:$0xff] }
  0x14   : > { %430 = vmatpush.msra.mxu1 %v404_v56 }
  0x15   : > { %v292_v7 = vsub.f32 1.0, %v291_v6  ;;  %526 = vmatpush.msra.mxu2 %v403_v57 }
  0x16   : > { %431 = vmatpush.msra.mxu1 %v403_v57 }
  0x17   : > { %v293_v8 = vmul.f32 %v544_v5, %v292_v7  ;;  %527 = vmatpush.msra.mxu2 %v402_v58 }
  0x18   : > { %285 = vadd.xlane.f32.xlu0 %v284_v3  ;;  %432 = vmatpush.msra.mxu1 %v402_v58 }
  0x19   : > { %v294_v9 = vadd.f32 %v544_v5, %v293_v8  ;;  %528 = vmatpush.msra.mxu2 %v401_v59 }
  0x1a   : > { %433 = vmatpush.msra.mxu1 %v401_v59 }
  0x1b   : > { %v296_v10 = vsel %vm295_vm1, %v544_v5, %v294_v9  ;;  %529 = vmatpush.msra.mxu2 %v400_v60 }
  0x1c   : > { %434 = vmatpush.msra.mxu1 %v400_v60 }
  0x83   : > { %v289_v11 = vpop.xlane.xlu0 %288 }
  0x84   : > { %v298_v12 = vmul.f32 %v296_v10, %v289_v11 }
  0x86   : > { %v300_v13 = vsub.f32 %v618_v0, %v298_v12 }
  0x88   : > { %v302_v14 = vmul.f32 %v300_v13, %v300_v13 }
  0x8a   : > { %v306_v15 = vsel %vm283_vm0, %v302_v14, 0.0 }
  0x8b   : > { %307 = vadd.xlane.f32.xlu1 %v306_v15  ;;  %v286_v16 = vpop.xlane.xlu0 %285 }
  0x8c   : > { %v297_v17 = vmul.f32 %v296_v10, %v286_v16 }
  0x8e   : > { %v299_v18 = vsub.f32 %v622_v2, %v297_v17 }
  0x90   : > { %v301_v19 = vmul.f32 %v299_v18, %v299_v18 }
  0x92   : > { %v303_v20 = vsel %vm283_vm0, %v301_v19, 0.0 }
  0x93   : > { %304 = vadd.xlane.f32.xlu1 %v303_v20 }
  0xfe   : > { %v308_v25 = vpop.xlane.xlu1 %307 }
  0xff   : > { %v310_v26 = vmul.f32 %v308_v25, %v296_v10 }
 0x101   : > { %v312_v27 = vadd.f32 1e-05, %v310_v26 }
 0x103   : > { %545 = vrsqrt.f32 %v312_v27  ;;  %vm329_vm3 = vweird.f32 %v312_v27 }
 0x106   : > { %v305_v28 = vpop.xlane.xlu1 %304 }
 0x107   : > { %v309_v29 = vmul.f32 %v305_v28, %v296_v10 }
 0x109   : > { %v546_v30 = vpop.eup %545  ;;  %v311_v31 = vadd.f32 1e-05, %v309_v29 }
 0x10a   : > { %v324_v32 = vmul.f32 %v546_v30, %v312_v27  ;;  %vm330_vm2 = vweird.f32 %v546_v30 }
 0x10b   : > { %547 = vrsqrt.f32 %v311_v31  ;;  %vm331_vm4 = vmor %vm329_vm3, %vm330_vm2  ;;  %vm319_vm6 = vweird.f32 %v311_v31 }
 0x10c   : > { %v325_v33 = vmul.f32 %v546_v30, %v324_v32 }
 0x10e   : > { %v326_v34 = vmul.f32 0.5, %v325_v33 }
 0x110   : > { %v327_v35 = vsub.f32 1.5, %v326_v34 }
 0x111   : > { %v548_v36 = vpop.eup %547 }
 0x112   : > { %v328_v37 = vmul.f32 %v546_v30, %v327_v35  ;;  %v314_v38 = vmul.f32 %v548_v36, %v311_v31  ;;  %vm320_vm5 = vweird.f32 %v548_v36 }
 0x113   : > { %vm321_vm7 = vmor %vm319_vm6, %vm320_vm5 }
 0x114   : > { %v332_v40 = vsel %vm331_vm4, %v546_v30, %v328_v37  ;;  %v315_v41 = vmul.f32 %v548_v36, %v314_v38 }
 0x115   : > { %v334_v42 = vmul.f32 %v332_v40, %v300_v13 }
 0x116   : > { %v316_v44 = vmul.f32 0.5, %v315_v41 }
 0x117   : > { %v339_v45 = vmul.f32 %v539_v39, %v334_v42 }
 0x118   : > { %v317_v46 = vsub.f32 1.5, %v316_v44 }
 0x119   : > { %v344_v47 = vadd.f32 %v540_v43, %v339_v45 }
 0x11a   : > { %v318_v48 = vmul.f32 %v548_v36, %v317_v46 }
 0x11b   : > { %511 = vmatmul.msk.f32.vlgmr.msra.gmra.mxu3 %vm283_vm0, %v344_v47 }
 0x11c   : > { %v322_v49 = vsel %vm321_vm7, %v548_v36, %v318_v48 }
 0x11d   : > { %v333_v50 = vmul.f32 %v322_v49, %v299_v18 }
 0x11f   : > { %v338_v51 = vmul.f32 %v539_v39, %v333_v50 }
 0x121   : > { %v343_v52 = vadd.f32 %v540_v43, %v338_v51 }
 0x123   : > { %510 = vmatmul.msk.f32.vlgmr.msra.gmra.mxu0 %vm283_vm0, %v343_v52 }
 0x19e   : > { %v379_v62 = vpop.f32.mrf.mxu3 }
 0x19f   : > { %v380_v63 = vadd.f32 %v541_v61, %v379_v62 }
 0x1a0   : > { %v376_v1 = vpop.f32.mrf.mxu0 }
 0x1a1   : > { %v383_v3 = vmul.f32 %v380_v63, %v380_v63  ;;  %v377_v4 = vadd.f32 %v541_v61, %v376_v1 }
 0x1a3   : > { %v385_v5 = vmul.f32 %v383_v3, %v380_v63  ;;  %v382_v6 = vmul.f32 %v377_v4, %v377_v4 }
 0x1a5   : > { %v387_v7 = vmul.f32 0.044715, %v385_v5  ;;  %v384_v8 = vmul.f32 %v382_v6, %v377_v4 }
 0x1a7   : > { %v389_v9 = vadd.f32 %v387_v7, %v380_v63  ;;  %v386_v10 = vmul.f32 0.044715, %v384_v8 }
 0x1a9   : > { %v388_v11 = vadd.f32 %v386_v10, %v377_v4  ;;  %v391_v12 = vmul.f32 0.7978846, %v389_v9 }
 0x1ab   : > { %549 = vtanh.f32 %v391_v12  ;;  %v390_v13 = vmul.f32 0.7978846, %v388_v11 }
 0x1ad   : > { %551 = vtanh.f32 %v390_v13 }
 0x1b1   : > { %v550_v14 = vpop.eup %549 }
 0x1b2   : > { %v395_v15 = vadd.f32 1.0, %v550_v14 }
 0x1b3   : > { %v552_v16 = vpop.eup %551 }
 0x1b4   : > { %v397_v17 = vmul.f32 0.5, %v395_v15  ;;  %v394_v18 = vadd.f32 1.0, %v552_v16 }
 0x1b6   : > { %v399_v19 = vmul.f32 %v397_v17, %v380_v63  ;;  %v396_v20 = vmul.f32 0.5, %v394_v18 }
 0x1b8   : > { %513 = vmatmul.msk.f32.vlgmr.msra.gmra.mxu2 %vm412_vm8, %v399_v19  ;;  %v398_v21 = vmul.f32 %v396_v20, %v377_v4 }
 0x1ba   : > { %512 = vmatmul.msk.f32.vlgmr.msra.gmra.mxu1 %vm412_vm8, %v398_v21 }
 0x237   : > { %v436_v23 = vpop.f32.mrf.mxu1 }
 0x238   : > { %v437_v24 = vadd.f32 %v542_v22, %v436_v23 }
 0x23a   : > { %v442_v25 = vadd.f32 %v437_v24, %v622_v2 }
 0x23b   : > { %v439_v26 = vpop.f32.mrf.mxu2 }
 0x23c   : > { %444 = vst.msk [vmem:[%s278_s21] sm:$0xff] %vm283_vm0, %v442_v25  ;;  %v440_v27 = vadd.f32 %v542_v22, %v439_v26 }
 0x23e   : > { %v443_v28 = vadd.f32 %v440_v27, %v618_v0 }
 0x240   : > { %445 = vst.msk [vmem:[%s278_s21 + $0x8] sm:$0xff] %vm283_vm0, %v443_v28 }
 0x241 PF: > { %s17_s24 = sadd.s32 1, %s559_s24  }
 0x242   : > { %p14_p4 = scmp.ge.s32.totalorder %s17_s24, 4  }
 0x244   :  { %16 = sbr.rel (!%p14_p4) target bundleno = 1 (0x1), region = 78 }

// kernel: perceiver_io_forward.11
= control target key start
LH: loop header
LB: loop body
LE: loop exit
PB: predicated region body
PF: predicated region fallthrough
CT: control target
= control target key end

     0   :  { %16 = vsyncpa [#allocation3], 0  ;;  %s2117_s0 = inlined_call_operand.vmem [shape: f32[2,16,32], index: 0, kind: input, shape index: {}]   ;;  %s2118_s1 = inlined_call_operand.hbm [shape: f32[1,32], index: 1, kind: input, shape index: {}]   ;;  %s2119_s2 = inlined_call_operand.hbm [shape: f32[1,32], index: 2, kind: input, shape index: {}]   ;;  %s2120_s3 = inlined_call_operand.vmem [shape: f32[32,32], index: 3, kind: input, shape index: {}]   ;;  %s2121_s4 = inlined_call_operand.hbm [shape: f32[1,32], index: 4, kind: input, shape index: {}]   ;;  %s2122_s5 = inlined_call_operand.hbm [shape: f32[32,32], index: 5, kind: input, shape index: {}]   ;;  %s2123_s6 = inlined_call_operand.hbm [shape: f32[1,32], index: 6, kind: input, shape index: {}]   ;;  %s2124_s7 = inlined_call_operand.hbm [shape: f32[32,32], index: 7, kind: input, shape index: {}]   ;;  %s2125_s8 = inlined_call_operand.hbm [shape: f32[1,32], index: 8, kind: input, shape index: {}]   ;;  %s2126_s9 = inlined_call_operand.hbm [shape: f32[32,32], index: 9, kind: input, shape index: {}]   ;;  %s2127_s10 = inlined_call_operand.hbm [shape: f32[1,32], index: 10, kind: input, shape index: {}]   ;;  %s2128_s11 = inlined_call_operand.vmem [shape: f32[2,16,32], index: 11, kind: output, shape index: {}]  }
   0x1   :  { %17 = vsyncpa [#allocation5], 0 }
   0x2   :  { %18 = vsyncpa [#allocation8], 0 }
   0x3   :  { %19 = vsyncpa [#allocation11], 0 }
   0x4   :  { %20 = vsyncpa [#allocation14], 0  ;;  %s1896_s17 = smov 0  }
   0x5 LB: > { %s317_s20 = sshll.u32 %s2119_s2, 4  ;;  %s1905_s21 = sadd.s32 4294967295, %s1816_s17   ;;  %s1816_s17 = sphi %s1896_s17, %s26_s17   ;;  %s318_s20 = int_to_ptr.hbm [resolvable:$true] %s317_s20 }
   0x6   : > { %p1292_p0 = scmp.ge.s32.totalorder %s1816_s17, 1  ;;  %p293_p1 = scmp.lt.s32.totalorder %s1816_s17, 3 }
   0x7   : > { %p1417_p2 = scmp.eq.s32.totalorder %s1905_s21, 0  ;;  %s1818_s23 = smov [#allocation4]  }
   0x8   : > { %p1910_p3 = pnand %p1292_p0, %p293_p1  ;;  %s319_s24 = sshll.u32 %s1818_s23, 4  ;;  %s320_s24 = int_to_ptr.vmem [resolvable:$true] %s319_s24 }
   0x9   : > { %s343_s27 = sshll.u32 %s2122_s5, 4  ;;  %s1819_s29 = smov [#allocation7]   ;;  %s344_s27 = int_to_ptr.hbm [resolvable:$true] %s343_s27 }
   0xa   : > { %p1389_p4 = pneg %p1910_p3  ;;  %s345_s30 = sshll.u32 %s1819_s29, 4  ;;  %s346_s30 = int_to_ptr.vmem [resolvable:$true] %s345_s30 }
   0xb   : > { %s369_s14 = sshll.u32 %s2124_s7, 4  ;;  %s1820_s15 = smov 128   ;;  %s370_s14 = int_to_ptr.hbm [resolvable:$true] %s369_s14 }
   0xc   : > { %p1921_p5 = pnand %p1417_p2, %p1389_p4  ;;  %s1821_s16 = smov 8  }
   0xd   : > { %s1822_s18 = smov [#allocation10]   ;;  %s395_s26 = sshll.u32 %s2126_s9, 4  ;;  %s396_s26 = int_to_ptr.hbm [resolvable:$true] %s395_s26 }
   0xe   : > { %1395 = dma.hbm_to_vmem [thread:$0]  (!%p1921_p5), %s318_s20, 16, %s320_s24, [#allocation5]  }
   0xf   : > { %1401 = dma.hbm_to_vmem [thread:$0]  (!%p1921_p5), %s344_s27, 512, %s346_s30, [#allocation8], %s1820_s15, %s1820_s15, %s1821_s16  }
  0x10   : > { %s371_s19 = sshll.u32 %s1822_s18, 4  ;;  %s305_s20 = sshll.u32 %s2118_s1, 4  ;;  %s372_s19 = int_to_ptr.vmem [resolvable:$true] %s371_s19  ;;  %s306_s20 = int_to_ptr.hbm [resolvable:$true] %s305_s20 }
  0x11   : > { %1407 = dma.hbm_to_vmem [thread:$0]  (!%p1921_p5), %s370_s14, 512, %s372_s19, [#allocation11], %s1820_s15, %s1820_s15, %s1821_s16  }
  0x12   : > { %s1823_s24 = smov [#allocation13]   ;;  %s1824_s27 = smov [#allocation2]  }
  0x13   : > { %s397_s13 = sshll.u32 %s1823_s24, 4  ;;  %s307_s30 = sshll.u32 %s1824_s27, 4  ;;  %s398_s13 = int_to_ptr.vmem [resolvable:$true] %s397_s13  ;;  %s308_s30 = int_to_ptr.vmem [resolvable:$true] %s307_s30 }
  0x14   : > { %1413 = dma.hbm_to_vmem [thread:$0]  (!%p1921_p5), %s396_s26, 512, %s398_s13, [#allocation14], %s1820_s15, %s1820_s15, %s1821_s16  }
  0x15   : > { %s332_s25 = sshll.u32 %s2121_s4, 4  ;;  %s358_s29 = sshll.u32 %s2123_s6, 4  ;;  %s333_s25 = int_to_ptr.hbm [resolvable:$true] %s332_s25  ;;  %s359_s29 = int_to_ptr.hbm [resolvable:$true] %s358_s29 }
  0x16   : > { %1392 = dma.hbm_to_vmem [thread:$0]  (!%p1921_p5), %s306_s20, 16, %s308_s30, [#allocation3]  }
  0x17   : > { %s1825_s12 = smov [#allocation6]   ;;  %s1826_s15 = smov [#allocation9]  }
  0x18   : > { %s334_s24 = sshll.u32 %s1825_s12, 4  ;;  %s360_s16 = sshll.u32 %s1826_s15, 4  ;;  %s335_s24 = int_to_ptr.vmem [resolvable:$true] %s334_s24  ;;  %s361_s16 = int_to_ptr.vmem [resolvable:$true] %s360_s16 }
  0x19   : > { %1398 = dma.hbm_to_vmem [thread:$0]  (!%p1921_p5), %s333_s25, 16, %s335_s24, [#allocation5]  }
  0x1a   : > { %s384_s27 = sshll.u32 %s2125_s8, 4  ;;  %s410_s18 = sshll.u32 %s2127_s10, 4  ;;  %s385_s27 = int_to_ptr.hbm [resolvable:$true] %s384_s27  ;;  %s411_s18 = int_to_ptr.hbm [resolvable:$true] %s410_s18 }
  0x1b   : > { %1404 = dma.hbm_to_vmem [thread:$0]  (!%p1921_p5), %s359_s29, 16, %s361_s16, [#allocation8]  }
  0x1c   : > { %s1827_s23 = smov [#allocation12]   ;;  %s1828_s25 = smov [#allocation15]  }
  0x1d   : > { %s386_s14 = sshll.u32 %s1827_s23, 4  ;;  %s412_s19 = sshll.u32 %s1828_s25, 4  ;;  %s387_s14 = int_to_ptr.vmem [resolvable:$true] %s386_s14  ;;  %s413_s19 = int_to_ptr.vmem [resolvable:$true] %s412_s19 }
  0x1e   : > { %1410 = dma.hbm_to_vmem [thread:$0]  (!%p1921_p5), %s385_s27, 16, %s387_s14, [#allocation11]  }
  0x1f   : > { %1416 = dma.hbm_to_vmem [thread:$0]  (!%p1921_p5), %s411_s18, 16, %s413_s19, [#allocation14]  }
  0x20   : > { %433 = sbr.rel (%p1910_p3) target bundleno = 1435 (0x59b), region = 64 }
  0x25   : > { %1795 = dma.done.wait (%p1417_p2), [#allocation3], 16  }
  0x26   : > { %1797 = vsyncadd (%p1417_p2), [#allocation3], 4294967280 }
  0x27   : > { %1799 = dma.done.wait (%p1417_p2), [#allocation5], 32  }
  0x28   : > { %1801 = vsyncadd (%p1417_p2), [#allocation5], 4294967264 }
  0x29   : > { %1803 = dma.done.wait (%p1417_p2), [#allocation8], 528  }
  0x2a   : > { %1805 = vsyncadd (%p1417_p2), [#allocation8], 4294966768 }
  0x2b   : > { %1807 = dma.done.wait (%p1417_p2), [#allocation11], 528  }
  0x2c   : > { %1809 = vsyncadd (%p1417_p2), [#allocation11], 4294966768 }
  0x2d   : > { %1811 = dma.done.wait (%p1417_p2), [#allocation14], 528  }
  0x2e   : > { %1813 = vsyncadd (%p1417_p2), [#allocation14], 4294966768  ;;  %p514_p6 = scmp.lt.s32.totalorder %s1905_s21, 1  ;;  %vm528_vm0 = vcmask 261120   ;;  %v1829_v4 = vmov 32.0   ;;  %v593_v21 = vld [vmem:[%s2120_s3 + $0x18] sm:$0xff] }
  0x2f   : > { %1482 = vrcp.f32 %v1829_v4  ;;  %v630_v22 = vld [vmem:[#allocation7 + $0x18] sm:$0xff]  ;;  %616 = vmatpush.msra.mxu0 %v593_v21  ;;  %v592_v24 = vld [vmem:[%s2120_s3 + $0x10] sm:$0xff]  ;;  %v591_v27 = vld [vmem:[%s2120_s3 + $0x8] sm:$0xff]  ;;  %s1830_s18 = smov 120   ;;  %vm689_vm8 = vcmask 64512   ;;  %s1831_s23 = smov 112  }
  0x30   : > { %s2132_s21 = smov (!%p514_p6, %s1905_s21), 1  ;;  %v661_v23 = vld [vmem:[#allocation10 + $0x18] sm:$0xff]  ;;  %647 = vmatpush.msra.mxu1 %v630_v22  ;;  %v629_v25 = vld [vmem:[#allocation7 + $0x10] sm:$0xff]  ;;  %v628_v28 = vld [vmem:[#allocation7 + $0x8] sm:$0xff]  ;;  %s1832_s14 = smov 104   ;;  %vm727_vm9 = vcmask 130048  }
  0x31   : > { %s1351_s22 = sshll.u32 %s2132_s21, 4  ;;  %678 = vmatpush.msra.mxu2 %v661_v23  ;;  %v660_v26 = vld [vmem:[#allocation10 + $0x10] sm:$0xff]  ;;  %617 = vmatpush.msra.mxu0 %v592_v24  ;;  %v659_v29 = vld [vmem:[#allocation10 + $0x8] sm:$0xff]  ;;  %v590_v30 = vld [vmem:[%s2120_s3] sm:$0xff]  ;;  %s1833_s25 = smov 8   ;;  %vm1103_vm10 = vcmask 195584  }
  0x32   : > { %s518_s12 = scalar_lea.vmem %s2117_s0, %s1351_s22  ;;  %648 = vmatpush.msra.mxu1 %v629_v25  ;;  %v627_v31 = vld [vmem:[#allocation7] sm:$0xff]  ;;  %v1476_v47 = vld [vmem:[#allocation2] ss:$0 sm:$0xff]  ;;  %v1477_v51 = vld [vmem:[#allocation4] ss:$0 sm:$0xff]  ;;  %s1834_s19 = smov 16  }
  0x33   : > { %v1996_v0 = vld [vmem:[%s518_s12] sm:$0xff]  ;;  %v2000_v2 = vld [vmem:[%s518_s12 + $0x8] sm:$0xff]  ;;  %679 = vmatpush.msra.mxu2 %v660_v26  ;;  %618 = vmatpush.msra.mxu0 %v591_v27  ;;  %s1835_s28 = smov 24   ;;  %s523_s24 = scalar_lea.vmem %s2128_s11, %s1351_s22 }
  0x34   : > { %v529_v1 = vsel %vm528_vm0, %v1996_v0, 0.0  ;;  %v532_v3 = vsel %vm528_vm0, %v2000_v2, 0.0  ;;  %649 = vmatpush.msra.mxu1 %v628_v28  ;;  %v658_v32 = vld [vmem:[#allocation10] sm:$0xff]  ;;  %v1478_v61 = vld [vmem:[#allocation6] ss:$0 sm:$0xff] }
  0x35   : > { %530 = vadd.xlane.f32.xlu0 %v529_v1  ;;  %v1483_v5 = vpop.eup %1482  ;;  %680 = vmatpush.msra.mxu2 %v659_v29  ;;  %v1479_v62 = vld [vmem:[#allocation9] ss:$0 sm:$0xff] }
  0x36   : > { %v536_v6 = vmul.f32 32.0, %v1483_v5  ;;  %vm540_vm1 = vweird.f32 %v1483_v5  ;;  %619 = vmatpush.msra.mxu0 %v590_v30  ;;  %650 = vmatpush.msra.mxu1 %v627_v31 }
  0x37   : > { %681 = vmatpush.msra.mxu2 %v658_v32 }
  0x38   : > { %v537_v7 = vsub.f32 1.0, %v536_v6 }
  0x3a   : > { %v538_v8 = vmul.f32 %v1483_v5, %v537_v7 }
  0x3c   : > { %v539_v9 = vadd.f32 %v1483_v5, %v538_v8 }
  0x3d   : > { %533 = vadd.xlane.f32.xlu0 %v532_v3 }
  0x3e   : > { %v541_v10 = vsel %vm540_vm1, %v1483_v5, %v539_v9 }
  0xa8   : > { %v531_v11 = vpop.xlane.xlu0 %530 }
  0xa9   : > { %v542_v12 = vmul.f32 %v541_v10, %v531_v11 }
  0xab   : > { %v544_v13 = vsub.f32 %v1996_v0, %v542_v12 }
  0xad   : > { %v546_v14 = vmul.f32 %v544_v13, %v544_v13 }
  0xaf   : > { %v548_v15 = vsel %vm528_vm0, %v546_v14, 0.0 }
  0xb0   : > { %549 = vadd.xlane.f32.xlu1 %v548_v15  ;;  %v534_v16 = vpop.xlane.xlu0 %533 }
  0xb1   : > { %v543_v17 = vmul.f32 %v541_v10, %v534_v16 }
  0xb3   : > { %v2007_v18 = vsub.f32 %v2000_v2, %v543_v17 }
  0xb5   : > { %v547_v19 = vmul.f32 %v2007_v18, %v2007_v18 }
  0xb7   : > { %v551_v20 = vsel %vm528_vm0, %v547_v19, 0.0 }
  0xb8   : > { %552 = vadd.xlane.f32.xlu1 %v551_v20 }
 0x123   : > { %v550_v33 = vpop.xlane.xlu1 %549 }
 0x124   : > { %v554_v34 = vmul.f32 %v550_v33, %v541_v10 }
 0x126   : > { %v556_v35 = vadd.f32 1e-05, %v554_v34 }
 0x128   : > { %1484 = vrsqrt.f32 %v556_v35  ;;  %vm564_vm3 = vweird.f32 %v556_v35 }
 0x12b   : > { %v553_v36 = vpop.xlane.xlu1 %552 }
 0x12c   : > { %v555_v37 = vmul.f32 %v553_v36, %v541_v10  ;;  %v1480_v10 = vld [vmem:[#allocation12] ss:$0 sm:$0xff] }
 0x12e   : > { %v1485_v38 = vpop.eup %1484  ;;  %v557_v39 = vadd.f32 1e-05, %v555_v37 }
 0x12f   : > { %v559_v40 = vmul.f32 %v1485_v38, %v556_v35  ;;  %vm565_vm2 = vweird.f32 %v1485_v38 }
 0x130   : > { %1486 = vrsqrt.f32 %v557_v39  ;;  %vm566_vm4 = vmor %vm564_vm3, %vm565_vm2  ;;  %vm574_vm5 = vweird.f32 %v557_v39 }
 0x131   : > { %v560_v41 = vmul.f32 %v1485_v38, %v559_v40 }
 0x133   : > { %v561_v42 = vmul.f32 0.5, %v560_v41 }
 0x135   : > { %v562_v43 = vsub.f32 1.5, %v561_v42 }
 0x136   : > { %v1487_v44 = vpop.eup %1486 }
 0x137   : > { %v563_v45 = vmul.f32 %v1485_v38, %v562_v43  ;;  %v569_v46 = vmul.f32 %v1487_v44, %v557_v39  ;;  %vm575_vm6 = vweird.f32 %v1487_v44 }
 0x138   : > { %vm576_vm7 = vmor %vm574_vm5, %vm575_vm6 }
 0x139   : > { %v567_v48 = vsel %vm566_vm4, %v1485_v38, %v563_v45  ;;  %v570_v49 = vmul.f32 %v1487_v44, %v569_v46 }
 0x13a   : > { %v578_v50 = vmul.f32 %v567_v48, %v544_v13 }
 0x13b   : > { %v571_v52 = vmul.f32 0.5, %v570_v49 }
 0x13c   : > { %v583_v53 = vmul.f32 %v1476_v47, %v578_v50 }
 0x13d   : > { %v572_v54 = vsub.f32 1.5, %v571_v52 }
 0x13e   : > { %v588_v55 = vadd.f32 %v1477_v51, %v583_v53 }
 0x13f   : > { %v573_v56 = vmul.f32 %v1487_v44, %v572_v54 }
 0x140   : > { %1317 = vmatmul.msk.f32.vlgmr.msra.gmra.mxu0 %vm528_vm0, %v588_v55  ;;  %1319 = vmatmul.msk.f32.vlgmr.msra.gmra.mxu1 %vm528_vm0, %v588_v55 }
 0x141   : > { %v577_v57 = vsel %vm576_vm7, %v1487_v44, %v573_v56  ;;  %1321 = vmatmul.msk.f32.vlgmr.msra.gmra.mxu2 %vm528_vm0, %v588_v55 }
 0x142   : > { %v579_v58 = vmul.f32 %v577_v57, %v2007_v18 }
 0x144   : > { %v584_v59 = vmul.f32 %v1476_v47, %v579_v58 }
 0x146   : > { %v589_v60 = vadd.f32 %v1477_v51, %v584_v59 }
 0x148   : > { %1318 = vmatmul.msk.f32.gmra.mxu0 %vm528_vm0, %v589_v60  ;;  %1320 = vmatmul.msk.f32.gmra.mxu1 %vm528_vm0, %v589_v60 }
 0x149   : > { %1322 = vmatmul.msk.f32.gmra.mxu2 %vm528_vm0, %v589_v60 }
 0x1bd   : > { %v621_v63 = vpop.f32.mrf.mxu0  ;;  %v652_v1 = vpop.f32.mrf.mxu1 }
 0x1be   : > { %v622_v3 = vadd.f32 %v1478_v61, %v621_v63  ;;  %v653_v4 = vadd.f32 %v1479_v62, %v652_v1 }
 0x1c0   : > { %783 = vrot.lane.b32.xlu2 %v653_v4, %s1830_s18  ;;  %779 = vrot.lane.b32.xlu0 %v622_v3, %s1830_s18 }
 0x1c4   : > { %v683_v5 = vpop.f32.mrf.mxu2 }
 0x1c5   : > { %v624_v6 = vpop.f32.mrf.mxu0  ;;  %v655_v7 = vpop.f32.mrf.mxu1  ;;  %v684_v12 = vadd.f32 %v1480_v10, %v683_v5 }
 0x1c6   : > { %v625_v8 = vadd.f32 %v1478_v61, %v624_v6  ;;  %v656_v9 = vadd.f32 %v1479_v62, %v655_v7 }
 0x1c8   : > { %883 = vrot.lane.b32.xlu2 %v653_v4, %s1831_s23  ;;  %981 = vrot.lane.b32.xlu0 %v653_v4, %s1832_s14 }
 0x1c9   : > { %1323 = vmatpush.xpose.msk.msra.mxu3 %vm689_vm8, %v656_v9  ;;  %781 = vrot.lane.b32.xlu1 %v625_v8, %s1830_s18 }
 0x1cc   : > { %v686_v11 = vpop.f32.mrf.mxu2 }
 0x1cd   : > { %v687_v13 = vadd.f32 %v1480_v10, %v686_v11  ;;  %1324 = vmatpush.xpose.msk.msra.mxu3 %vm689_vm8, %v653_v4 }
 0x1cf   : > { %770 = vmatpush.msrb.mxu0 %v687_v13  ;;  %v2038_v14 = vpack.i.bf16 %v684_v12, %v687_v13 }
 0x1d0   : > { %1325 = vmatmul.msk.f32.vlgmr.msra.gmra.mxu3 %vm689_vm8, %v622_v3  ;;  %785 = vrot.lane.b32.xlu2 %v656_v9, %s1830_s18 }
 0x1d1   : > { %771 = vmatpush.msrb.mxu0 %v684_v12  ;;  %881 = vrot.lane.b32.xlu0 %v625_v8, %s1831_s23 }
 0x1d2   : > { %977 = vrot.lane.b32.xlu1 %v622_v3, %s1832_s14 }
 0x1d8   : > { %1326 = vmatmul.msk.f32.gmra.mxu3 %vm689_vm8, %v625_v8  ;;  %885 = vrot.lane.b32.xlu2 %v656_v9, %s1831_s23 }
 0x1e0   : > { %983 = vrot.lane.b32.xlu2 %v656_v9, %s1832_s14 }
 0x1e8   : > { %879 = vrot.lane.b32.xlu2 %v622_v3, %s1831_s23 }
 0x1f0   : > { %979 = vrot.lane.b32.xlu2 %v625_v8, %s1832_s14 }
 0x21a   : > { %v784_v15 = vpop.permute.xlu2 %783 }
 0x222   : > { %v884_v16 = vpop.permute.xlu2 %883 }
 0x22a   : > { %v786_v17 = vpop.permute.xlu2 %785 }
 0x22b   : > { %1329 = vmatpush.xpose.msk.msrb.mxu1 %vm689_vm8, %v786_v17 }
 0x22f   : > { %1330 = vmatpush.xpose.msk.msrb.mxu1 %vm689_vm8, %v784_v15 }
 0x232   : > { %v886_v18 = vpop.permute.xlu2 %885  ;;  %v780_v19 = vpop.permute.xlu0 %779 }
 0x233   : > { %1331 = vmatmul.msk.f32.vlgmr.msrb.gmra.mxu1 %vm689_vm8, %v780_v19  ;;  %1335 = vmatpush.xpose.msk.msrb.mxu3 %vm689_vm8, %v886_v18 }
 0x237   : > { %1336 = vmatpush.xpose.msk.msrb.mxu3 %vm689_vm8, %v884_v16 }
 0x23a   : > { %v984_v20 = vpop.permute.xlu2 %983  ;;  %v982_v22 = vpop.permute.xlu0 %981 }
 0x23b   : > { %v782_v21 = vpop.permute.xlu1 %781  ;;  %1341 = vmatpush.xpose.msk.msra.mxu1 %vm689_vm8, %v984_v20 }
 0x23c   : > { %1332 = vmatmul.msk.f32.gmra.mxu1 %vm689_vm8, %v782_v21 }
 0x23f   : > { %1342 = vmatpush.xpose.msk.msra.mxu1 %vm689_vm8, %v982_v22 }
 0x242   : > { %v880_v23 = vpop.permute.xlu2 %879 }
 0x243   : > { %1337 = vmatmul.msk.f32.vlgmr.msrb.gmra.mxu3 %vm689_vm8, %v880_v23  ;;  %v882_v25 = vpop.permute.xlu0 %881 }
 0x244   : > { %v978_v24 = vpop.permute.xlu1 %977 }
 0x245   : > { %1343 = vmatmul.msk.f32.vlgmr.msra.gmra.mxu1 %vm689_vm8, %v978_v24 }
 0x24a   : > { %v980_v26 = vpop.permute.xlu2 %979 }
 0x24b   : > { %1338 = vmatmul.msk.f32.gmra.mxu3 %vm689_vm8, %v882_v25 }
 0x24d   : > { %1344 = vmatmul.msk.f32.gmra.mxu1 %vm689_vm8, %v980_v26 }
 0x253   : > { %v719_v27 = vpop.f32.mrf.mxu3 }
 0x254   : > { %v725_v28 = vmul.f32 0.35355338, %v719_v27 }
 0x256   : > { %v728_v29 = vsel %vm727_vm9, %v725_v28, -inf }
 0x257   : > { %729 = vmax.xlane.f32.xlu0 %v728_v29 }
 0x25b   : > { %v722_v33 = vpop.f32.mrf.mxu3 }
 0x25c   : > { %v726_v34 = vmul.f32 0.35355338, %v722_v33 }
 0x25e   : > { %v731_v35 = vsel %vm727_vm9, %v726_v34, -inf }
 0x2b0   : > { %v812_v30 = vpop.f32.mrf.mxu1 }
 0x2b1   : > { %v818_v31 = vmul.f32 0.35355338, %v812_v30 }
 0x2b3   : > { %v820_v32 = vsel %vm727_vm9, %v818_v31, -inf }
 0x2b4   : > { %821 = vmax.xlane.f32.xlu1 %v820_v32 }
 0x2b9   : > { %v815_v36 = vpop.f32.mrf.mxu1 }
 0x2ba   : > { %v819_v42 = vmul.f32 0.35355338, %v815_v36 }
 0x2bc   : > { %732 = vmax.xlane.f32.xlu1 %v731_v35  ;;  %v823_v47 = vsel %vm727_vm9, %v819_v42, -inf }
 0x2c2   : > { %v1010_v43 = vpop.f32.mrf.mxu1 }
 0x2c3   : > { %v1016_v50 = vmul.f32 0.35355338, %v1010_v43 }
 0x2c5   : > { %v1018_v53 = vsel %vm727_vm9, %v1016_v50, -inf }
 0x2c6   : > { %v912_v37 = vpop.f32.mrf.mxu3 }
 0x2c7   : > { %v918_v38 = vmul.f32 0.35355338, %v912_v37 }
 0x2c9   : > { %v920_v39 = vsel %vm727_vm9, %v918_v38, -inf }
 0x2ca   : > { %v730_v40 = vpop.xlane.xlu0 %729  ;;  %921 = vmax.xlane.f32.xlu2 %v920_v39  ;;  %v1013_v52 = vpop.f32.mrf.mxu1 }
 0x2cb   : > { %v734_v41 = vsub.f32 %v725_v28, %v730_v40  ;;  %v1017_v54 = vmul.f32 0.35355338, %v1013_v52 }
 0x2cd   : > { %v736_v44 = vmul.f32 1.442695, %v734_v41  ;;  %v1021_v55 = vsel %vm727_vm9, %v1017_v54, -inf }
 0x2ce   : > { %v915_v45 = vpop.f32.mrf.mxu3 }
 0x2cf   : > { %1488 = vpow2.f32 %v736_v44  ;;  %v2065_v46 = vmul.f32 0.35355338, %v915_v45 }
 0x2d1   : > { %v923_v48 = vsel %vm727_vm9, %v2065_v46, -inf }
 0x2d2   : > { %824 = vmax.xlane.f32.xlu2 %v823_v47  ;;  %924 = vmax.xlane.f32.xlu0 %v923_v48 }
 0x2d5   : > { %v1489_v49 = vpop.eup %1488 }
 0x2d6   : > { %v740_v51 = vsel %vm727_vm9, %v1489_v49, 0.0 }
 0x2d7   : > { %741 = vadd.xlane.f32.xlu1 %v740_v51 }
 0x2da   : > { %1019 = vmax.xlane.f32.xlu0 %v1018_v53 }
 0x2df   : > { %1022 = vmax.xlane.f32.xlu1 %v1021_v55 }
 0x2ee   : > { %1462 = vrot.lane.b32.xlu0 %v2038_v14, %s1830_s18 }
 0x327   : > { %v822_v56 = vpop.xlane.xlu1 %821 }
 0x328   : > { %v826_v57 = vsub.f32 %v818_v31, %v822_v56 }
 0x32a   : > { %v828_v58 = vmul.f32 1.442695, %v826_v57 }
 0x32c   : > { %1490 = vpow2.f32 %v828_v58 }
 0x32f   : > { %v733_v59 = vpop.xlane.xlu1 %732 }
 0x330   : > { %v735_v60 = vsub.f32 %v726_v34, %v733_v59 }
 0x332   : > { %v1491_v61 = vpop.eup %1490  ;;  %v738_v62 = vmul.f32 1.442695, %v735_v60 }
 0x333   : > { %v832_v63 = vsel %vm727_vm9, %v1491_v61, 0.0 }
 0x334   : > { %1492 = vpow2.f32 %v738_v62  ;;  %833 = vadd.xlane.f32.xlu2 %v832_v63 }
 0x33a   : > { %v1493_v1 = vpop.eup %1492 }
 0x33b   : > { %v743_v3 = vsel %vm727_vm9, %v1493_v1, 0.0 }
 0x33c   : > { %744 = vadd.xlane.f32.xlu1 %v743_v3 }
 0x33d   : > { %v922_v4 = vpop.xlane.xlu2 %921 }
 0x33e   : > { %v926_v5 = vsub.f32 %v918_v38, %v922_v4 }
 0x340   : > { %v928_v6 = vmul.f32 1.442695, %v926_v5 }
 0x342   : > { %1494 = vpow2.f32 %v928_v6 }
 0x345   : > { %v825_v7 = vpop.xlane.xlu2 %824  ;;  %v925_v8 = vpop.xlane.xlu0 %924 }
 0x346   : > { %v827_v9 = vsub.f32 %v819_v42, %v825_v7  ;;  %v927_v32 = vsub.f32 %v2065_v46, %v925_v8  ;;  %v1109_v8 = vld [vmem:[#allocation13 + $0x18] sm:$0xff] }
 0x347   : > { %1132 = vmatpush.msra.mxu3 %v1109_v8 }
 0x348   : > { %v2077_v10 = vpop.eup %1494  ;;  %v830_v11 = vmul.f32 1.442695, %v827_v9  ;;  %v930_v33 = vmul.f32 1.442695, %v927_v32  ;;  %v1108_v9 = vld [vmem:[#allocation13 + $0x10] sm:$0xff] }
 0x349   : > { %v932_v12 = vsel %vm727_vm9, %v2077_v10, 0.0  ;;  %1133 = vmatpush.msra.mxu3 %v1108_v9 }
 0x34a   : > { %1496 = vpow2.f32 %v830_v11  ;;  %v742_v13 = vpop.xlane.xlu1 %741  ;;  %933 = vadd.xlane.f32.xlu1 %v932_v12  ;;  %v1106_v11 = vld [vmem:[#allocation13] sm:$0xff] }
 0x34b   : > { %1498 = vrcp.f32 %v742_v13 }
 0x34d   : > { %v1020_v15 = vpop.xlane.xlu0 %1019 }
 0x34e   : > { %v1024_v16 = vsub.f32 %v1016_v50, %v1020_v15 }
 0x350   : > { %v1497_v17 = vpop.eup %1496  ;;  %v1026_v18 = vmul.f32 1.442695, %v1024_v16 }
 0x351   : > { %v835_v19 = vsel %vm727_vm9, %v1497_v17, 0.0  ;;  %v1499_v20 = vpop.eup %1498 }
 0x352   : > { %1500 = vpow2.f32 %v1026_v18  ;;  %v1023_v21 = vpop.xlane.xlu1 %1022  ;;  %836 = vadd.xlane.f32.xlu2 %v835_v19  ;;  %v748_v23 = vmul.f32 %v1499_v20, %v1489_v49 }
 0x353   : > { %v1025_v22 = vsub.f32 %v1017_v54, %v1023_v21 }
 0x354   : > { %1327 = vmatmul.msk.f32.vlgmr.msrb.gmra.mxu0 %vm727_vm9, %v748_v23 }
 0x355   : > { %v1028_v24 = vmul.f32 1.442695, %v1025_v22 }
 0x357   : > { %1502 = vpow2.f32 %v1028_v24 }
 0x358   : > { %v1501_v25 = vpop.eup %1500  ;;  %1504 = vpow2.f32 %v930_v33 }
 0x359   : > { %v1030_v26 = vsel %vm727_vm9, %v1501_v25, 0.0 }
 0x35a   : > { %1031 = vadd.xlane.f32.xlu2 %v1030_v26 }
 0x35d   : > { %v1503_v27 = vpop.eup %1502 }
 0x35e   : > { %v1033_v28 = vsel %vm727_vm9, %v1503_v27, 0.0  ;;  %v1505_v34 = vpop.eup %1504 }
 0x35f   : > { %1034 = vadd.xlane.f32.xlu0 %v1033_v28  ;;  %v935_v35 = vsel %vm727_vm9, %v1505_v34, 0.0 }
 0x360   : > { %v1463_v29 = vpop.permute.xlu0 %1462 }
 0x361   : > { %v1464_v30 = vunpack.i.l.bf16 %v1463_v29  ;;  %v1465_v31 = vunpack.i.h.bf16 %v1463_v29 }
 0x363   : > { %1472 = vrot.lane.b32.xlu1 %v2038_v14, %s1831_s23  ;;  %870 = vmatpush.msrb.mxu2 %v1464_v30 }
 0x365   : > { %871 = vmatpush.msrb.mxu2 %v1465_v31 }
 0x372   : > { %1467 = vrot.lane.b32.xlu2 %v2038_v14, %s1832_s14 }
 0x39b   : > { %936 = vadd.xlane.f32.xlu2 %v935_v35 }
 0x3a7   : > { %v834_v36 = vpop.xlane.xlu2 %833 }
 0x3a8   : > { %1506 = vrcp.f32 %v834_v36 }
 0x3ae   : > { %v1507_v37 = vpop.eup %1506 }
 0x3af   : > { %v745_v38 = vpop.xlane.xlu1 %744  ;;  %v840_v39 = vmul.f32 %v1507_v37, %v1491_v61 }
 0x3b0   : > { %1508 = vrcp.f32 %v745_v38 }
 0x3b1   : > { %1333 = vmatmul.msk.f32.vlgmr.msrb.gmra.mxu2 %vm727_vm9, %v840_v39 }
 0x3b6   : > { %v1509_v40 = vpop.eup %1508 }
 0x3b7   : > { %v749_v41 = vmul.f32 %v1509_v40, %v1493_v1 }
 0x3b9   : > { %1328 = vmatmul.msk.f32.gmra.mxu0 %vm727_vm9, %v749_v41 }
 0x3bd   : > { %v934_v43 = vpop.xlane.xlu1 %933 }
 0x3c5   : > { %v837_v14 = vpop.xlane.xlu2 %836 }
 0x3c6   : > { %1510 = vrcp.f32 %v837_v14 }
 0x3c7   : > { %1512 = vrcp.f32 %v934_v43 }
 0x3cc   : > { %v1511_v42 = vpop.eup %1510 }
 0x3cd   : > { %v1032_v44 = vpop.xlane.xlu2 %1031  ;;  %v841_v45 = vmul.f32 %v1511_v42, %v1497_v17  ;;  %v1513_v47 = vpop.eup %1512 }
 0x3ce   : > { %1514 = vrcp.f32 %v1032_v44  ;;  %v940_v55 = vmul.f32 %v1513_v47, %v2077_v10  ;;  %v1107_v10 = vld [vmem:[#allocation13 + $0x8] sm:$0xff] }
 0x3cf   : > { %1334 = vmatmul.msk.f32.gmra.mxu2 %vm727_vm9, %v841_v45  ;;  %1134 = vmatpush.msra.mxu3 %v1107_v10 }
 0x3d1   : > { %v773_v63 = vpop.f32.mrf.mxu0  ;;  %1135 = vmatpush.msra.mxu3 %v1106_v11 }
 0x3d2   : > { %v1035_v46 = vpop.xlane.xlu0 %1034 }
 0x3d3   : > { %1516 = vrcp.f32 %v1035_v46 }
 0x3d4   : > { %v1515_v50 = vpop.eup %1514 }
 0x3d5   : > { %v1473_v48 = vpop.permute.xlu1 %1472  ;;  %v1468_v49 = vpop.permute.xlu2 %1467  ;;  %v1038_v56 = vmul.f32 %v1515_v50, %v1501_v25  ;;  %v1481_v25 = vld [vmem:[#allocation15] ss:$0 sm:$0xff] }
 0x3d6   : > { %v1474_v51 = vunpack.i.l.bf16 %v1473_v48  ;;  %v1469_v52 = vunpack.i.l.bf16 %v1468_v49  ;;  %v1475_v53 = vunpack.i.h.bf16 %v1473_v48  ;;  %v1470_v54 = vunpack.i.h.bf16 %v1468_v49 }
 0x3d8   : > { %968 = vmatpush.msra.mxu0 %v1474_v51  ;;  %1066 = vmatpush.msra.mxu2 %v1469_v52 }
 0x3d9   : > { %v1517_v57 = vpop.eup %1516 }
 0x3da   : > { %969 = vmatpush.msra.mxu0 %v1475_v53  ;;  %1067 = vmatpush.msra.mxu2 %v1470_v54  ;;  %v1039_v58 = vmul.f32 %v1517_v57, %v1503_v27 }
 0x3db   : > { %1339 = vmatmul.msk.f32.vlgmr.msra.gmra.mxu0 %vm727_vm9, %v940_v55  ;;  %1345 = vmatmul.msk.f32.vlgmr.msra.gmra.mxu2 %vm727_vm9, %v1038_v56 }
 0x3e3   : > { %1346 = vmatmul.msk.f32.gmra.mxu2 %vm727_vm9, %v1039_v58 }
 0x40e   : > { %v937_v59 = vpop.xlane.xlu2 %936 }
 0x40f   : > { %1518 = vrcp.f32 %v937_v59 }
 0x415   : > { %v1519_v60 = vpop.eup %1518 }
 0x416   : > { %v941_v61 = vmul.f32 %v1519_v60, %v1505_v34 }
 0x418   : > { %1340 = vmatmul.msk.f32.gmra.mxu0 %vm727_vm9, %v941_v61 }
 0x434   : > { %v873_v62 = vpop.f32.mrf.mxu2 }
 0x435   : > { %1077 = vrot.lane.b32.xlu1 %v873_v62, %s1833_s25 }
 0x436   : > { %v776_v1 = vpop.f32.mrf.mxu0 }
 0x452   : > { %v876_v3 = vpop.f32.mrf.mxu2 }
 0x458   : > { %v971_v4 = vpop.f32.mrf.mxu0 }
 0x459   : > { %1085 = vrot.lane.b32.xlu1 %v971_v4, %s1834_s19 }
 0x45e   : > { %v1069_v5 = vpop.f32.mrf.mxu2 }
 0x45f   : > { %1093 = vrot.lane.b32.xlu0 %v1069_v5, %s1835_s28 }
 0x461   : > { %1079 = vrot.lane.b32.xlu1 %v876_v3, %s1833_s25 }
 0x466   : > { %v1072_v7 = vpop.f32.mrf.mxu2 }
 0x495   : > { %v974_v6 = vpop.f32.mrf.mxu0 }
 0x496   : > { %1087 = vrot.lane.b32.xlu1 %v974_v6, %s1834_s19 }
 0x49e   : > { %1095 = vrot.lane.b32.xlu1 %v1072_v7, %s1835_s28 }
 0x4a7   : > { %v1078_v12 = vpop.permute.xlu1 %1077 }
 0x4a8   : > { %v1099_v15 = vsel %vm689_vm8, %v773_v63, %v1078_v12 }
 0x4cb   : > { %v1086_v13 = vpop.permute.xlu1 %1085 }
 0x4cc   : > { %v1101_v16 = vsel %vm727_vm9, %v1099_v15, %v1086_v13 }
 0x4d1   : > { %v1094_v17 = vpop.permute.xlu0 %1093 }
 0x4d2   : > { %v1104_v18 = vsel %vm1103_vm10, %v1101_v16, %v1094_v17 }
 0x4d3   : > { %1347 = vmatmul.msk.f32.vlgmr.msra.gmra.mxu3 %vm528_vm0, %v1104_v18  ;;  %v1080_v19 = vpop.permute.xlu1 %1079 }
 0x4d4   : > { %v1100_v21 = vsel %vm689_vm8, %v776_v1, %v1080_v19 }
 0x508   : > { %v1088_v20 = vpop.permute.xlu1 %1087 }
 0x509   : > { %v1102_v22 = vsel %vm727_vm9, %v1100_v21, %v1088_v20 }
 0x510   : > { %v1096_v23 = vpop.permute.xlu1 %1095 }
 0x511   : > { %v1105_v24 = vsel %vm1103_vm10, %v1102_v22, %v1096_v23 }
 0x512   : > { %1348 = vmatmul.msk.f32.gmra.mxu3 %vm528_vm0, %v1105_v24 }
 0x556   : > { %v1137_v26 = vpop.f32.mrf.mxu3 }
 0x557   : > { %v1138_v27 = vadd.f32 %v1481_v25, %v1137_v26 }
 0x559   : > { %v1143_v28 = vadd.f32 %v1138_v27, %v1996_v0 }
 0x55b   : > { %1145 = vst.msk [vmem:[%s523_s24] sm:$0xff] %vm528_vm0, %v1143_v28 }
 0x595   : > { %v1140_v29 = vpop.f32.mrf.mxu3 }
 0x596   : > { %v1141_v30 = vadd.f32 %v1481_v25, %v1140_v29 }
 0x598   : > { %v1144_v31 = vadd.f32 %v1141_v30, %v2000_v2 }
 0x59a   : > { %1146 = vst.msk [vmem:[%s523_s24 + $0x8] sm:$0xff] %vm528_vm0, %v1144_v31 }
 0x59b PF: > { %s26_s17 = sadd.s32 1, %s1816_s17  }
 0x59c   : > { %p23_p7 = scmp.ge.s32.totalorder %s26_s17, 4  }
 0x59e   :  { %25 = sbr.rel (!%p23_p7) target bundleno = 5 (0x5), region = 131 }
 0x5a3   :  { %1168 = vsyncpa [#allocation3], 1 }
 0x5a4   :  { %1170 = vsyncpa [#allocation3 + $0x1], 1 }
 0x5a5   :  { %1171 = vsyncpa [#allocation5], 1 }
 0x5a6   :  { %1172 = vsyncpa [#allocation8], 1 }
 0x5a7   :  { %1173 = vsyncpa [#allocation11], 1 }
 0x5a8   :  { %1174 = vsyncpa [#allocation14], 1 }

// kernel: perceiver_io_forward.14
= control target key start
LH: loop header
LB: loop body
LE: loop exit
PB: predicated region body
PF: predicated region fallthrough
CT: control target
= control target key end

     0   :  { %12 = vsyncpa [#allocation3], 0  ;;  %s677_s24 = smov 0   ;;  %s767_s0 = inlined_call_operand.vmem [shape: f32[2,16,32], index: 0, kind: input, shape index: {}]   ;;  %s768_s1 = inlined_call_operand.vmem [shape: f32[1,32], index: 1, kind: input, shape index: {}]   ;;  %s769_s2 = inlined_call_operand.vmem [shape: f32[1,32], index: 2, kind: input, shape index: {}]   ;;  %s770_s3 = inlined_call_operand.vmem [shape: f32[32,64], index: 3, kind: input, shape index: {}]   ;;  %s771_s4 = inlined_call_operand.vmem [shape: f32[1,64], index: 4, kind: input, shape index: {}]   ;;  %s772_s5 = inlined_call_operand.vmem [shape: f32[64,32], index: 5, kind: input, shape index: {}]   ;;  %s773_s6 = inlined_call_operand.hbm [shape: f32[1,32], index: 6, kind: input, shape index: {}]   ;;  %s774_s7 = inlined_call_operand.vmem [shape: f32[2,16,32], index: 7, kind: output, shape index: {}]  }
   0x1 LB: > { %s528_s25 = sadd.s32 4294967295, %s633_s24   ;;  %p530_p0 = scmp.ge.s32.totalorder %s633_s24, 1  ;;  %s633_s24 = sphi %s677_s24, %s18_s24  }
   0x2   : > { %p201_p1 = scmp.lt.s32.totalorder %s633_s24, 3  ;;  %s228_s28 = sshll.u32 %s773_s6, 4  ;;  %s229_s28 = int_to_ptr.hbm [resolvable:$true] %s228_s28 }
   0x3   : > { %p567_p3 = scmp.eq.s32.totalorder %s528_s25, 0  ;;  %s635_s29 = smov [#allocation2]  }
   0x4   : > { %p202_p2 = pnand %p530_p0, %p201_p1  ;;  %s230_s30 = sshll.u32 %s635_s29, 4  ;;  %s231_s30 = int_to_ptr.vmem [resolvable:$true] %s230_s30 }
   0x6   : > { %p563_p4 = pneg %p202_p2  ;;  %251 = sbr.rel (%p202_p2) target bundleno = 580 (0x244), region = 48 }
   0x8   : > { %p564_p5 = pnand %p567_p3, %p563_p4 }
   0xa   : > { %566 = dma.hbm_to_vmem [thread:$0]  (!%p564_p5), %s229_s28, 16, %s231_s30, [#allocation3]  }
   0xb   : > { %628 = dma.done.wait (%p567_p3), [#allocation3], 16  }
   0xc   : > { %630 = vsyncadd (%p567_p3), [#allocation3], 4294967280  ;;  %p284_p6 = scmp.lt.s32.totalorder %s528_s25, 1  ;;  %vm298_vm0 = vcmask 261120   ;;  %v636_v4 = vmov 32.0   ;;  %v363_v21 = vld [vmem:[%s770_s3 + $0x18] sm:$0xff] }
   0xd   : > { %583 = vrcp.f32 %v636_v4  ;;  %547 = vmatpush.msra.mxu3 %v363_v21  ;;  %386 = vmatpush.msra.mxu0 %v363_v21  ;;  %v362_v22 = vld [vmem:[%s770_s3 + $0x10] sm:$0xff]  ;;  %v361_v23 = vld [vmem:[%s770_s3 + $0x8] sm:$0xff]  ;;  %v360_v24 = vld [vmem:[%s770_s3] sm:$0xff]  ;;  %vm427_vm8 = vcmask 523264  }
   0xe   : > { %s776_s25 = smov (!%p284_p6, %s528_s25), 1  ;;  %v579_v39 = vld [vmem:[%s768_s1] ss:$0 sm:$0xff]  ;;  %v422_v53 = vld [vmem:[%s772_s5 + $0x38] sm:$0xff]  ;;  %v421_v54 = vld [vmem:[%s772_s5 + $0x30] sm:$0xff] }
   0xf   : > { %s545_s8 = sshll.u32 %s776_s25, 4  ;;  %548 = vmatpush.msra.mxu3 %v362_v22  ;;  %387 = vmatpush.msra.mxu0 %v362_v22  ;;  %v580_v43 = vld [vmem:[%s769_s2] ss:$0 sm:$0xff]  ;;  %v420_v55 = vld [vmem:[%s772_s5 + $0x28] sm:$0xff]  ;;  %v418_v57 = vld [vmem:[%s772_s5 + $0x18] sm:$0xff] }
  0x10   : > { %s288_s11 = scalar_lea.vmem %s767_s0, %s545_s8  ;;  %551 = vmatpush.msra.mxu2 %v422_v53  ;;  %442 = vmatpush.msra.mxu1 %v422_v53  ;;  %v419_v56 = vld [vmem:[%s772_s5 + $0x20] sm:$0xff]  ;;  %v417_v58 = vld [vmem:[%s772_s5 + $0x10] sm:$0xff]  ;;  %v416_v59 = vld [vmem:[%s772_s5 + $0x8] sm:$0xff]  ;;  %s293_s26 = scalar_lea.vmem %s774_s7, %s545_s8 }
  0x11   : > { %v696_v0 = vld [vmem:[%s288_s11 + $0x8] sm:$0xff]  ;;  %v700_v2 = vld [vmem:[%s288_s11] sm:$0xff]  ;;  %549 = vmatpush.msra.mxu3 %v361_v23  ;;  %388 = vmatpush.msra.mxu0 %v361_v23 }
  0x12   : > { %v302_v1 = vsel %vm298_vm0, %v696_v0, 0.0  ;;  %v299_v3 = vsel %vm298_vm0, %v700_v2, 0.0  ;;  %552 = vmatpush.msra.mxu2 %v421_v54  ;;  %443 = vmatpush.msra.mxu1 %v421_v54  ;;  %v415_v60 = vld [vmem:[%s772_s5] sm:$0xff] }
  0x13   : > { %303 = vadd.xlane.f32.xlu0 %v302_v1  ;;  %v584_v5 = vpop.eup %583  ;;  %550 = vmatpush.msra.mxu3 %v360_v24  ;;  %v581_v61 = vld [vmem:[%s771_s4] ss:$0 sm:$0xff] }
  0x14   : > { %v306_v6 = vmul.f32 32.0, %v584_v5  ;;  %vm310_vm1 = vweird.f32 %v584_v5  ;;  %389 = vmatpush.msra.mxu0 %v360_v24  ;;  %553 = vmatpush.msra.mxu2 %v420_v55  ;;  %v582_v22 = vld [vmem:[#allocation2] ss:$0 sm:$0xff] }
  0x15   : > { %444 = vmatpush.msra.mxu1 %v420_v55 }
  0x16   : > { %v307_v7 = vsub.f32 1.0, %v306_v6  ;;  %554 = vmatpush.msra.mxu2 %v419_v56 }
  0x17   : > { %445 = vmatpush.msra.mxu1 %v419_v56 }
  0x18   : > { %v308_v8 = vmul.f32 %v584_v5, %v307_v7  ;;  %555 = vmatpush.msra.mxu2 %v418_v57 }
  0x19   : > { %446 = vmatpush.msra.mxu1 %v418_v57 }
  0x1a   : > { %v309_v9 = vadd.f32 %v584_v5, %v308_v8  ;;  %556 = vmatpush.msra.mxu2 %v417_v58 }
  0x1b   : > { %300 = vadd.xlane.f32.xlu0 %v299_v3  ;;  %447 = vmatpush.msra.mxu1 %v417_v58 }
  0x1c   : > { %v311_v10 = vsel %vm310_vm1, %v584_v5, %v309_v9  ;;  %557 = vmatpush.msra.mxu2 %v416_v59 }
  0x1d   : > { %448 = vmatpush.msra.mxu1 %v416_v59 }
  0x1e   : > { %558 = vmatpush.msra.mxu2 %v415_v60 }
  0x1f   : > { %449 = vmatpush.msra.mxu1 %v415_v60 }
  0x86   : > { %v304_v11 = vpop.xlane.xlu0 %303 }
  0x87   : > { %v313_v12 = vmul.f32 %v311_v10, %v304_v11 }
  0x89   : > { %v315_v13 = vsub.f32 %v696_v0, %v313_v12 }
  0x8b   : > { %v317_v14 = vmul.f32 %v315_v13, %v315_v13 }
  0x8d   : > { %v321_v15 = vsel %vm298_vm0, %v317_v14, 0.0 }
  0x8e   : > { %322 = vadd.xlane.f32.xlu1 %v321_v15  ;;  %v301_v16 = vpop.xlane.xlu0 %300 }
  0x8f   : > { %v312_v17 = vmul.f32 %v311_v10, %v301_v16 }
  0x91   : > { %v314_v18 = vsub.f32 %v700_v2, %v312_v17 }
  0x93   : > { %v316_v19 = vmul.f32 %v314_v18, %v314_v18 }
  0x95   : > { %v318_v20 = vsel %vm298_vm0, %v316_v19, 0.0 }
  0x96   : > { %319 = vadd.xlane.f32.xlu1 %v318_v20 }
 0x101   : > { %v323_v25 = vpop.xlane.xlu1 %322 }
 0x102   : > { %v325_v26 = vmul.f32 %v323_v25, %v311_v10 }
 0x104   : > { %v327_v27 = vadd.f32 1e-05, %v325_v26 }
 0x106   : > { %585 = vrsqrt.f32 %v327_v27  ;;  %vm344_vm3 = vweird.f32 %v327_v27 }
 0x109   : > { %v320_v28 = vpop.xlane.xlu1 %319 }
 0x10a   : > { %v324_v29 = vmul.f32 %v320_v28, %v311_v10 }
 0x10c   : > { %v586_v30 = vpop.eup %585  ;;  %v326_v31 = vadd.f32 1e-05, %v324_v29 }
 0x10d   : > { %v339_v32 = vmul.f32 %v586_v30, %v327_v27  ;;  %vm345_vm2 = vweird.f32 %v586_v30 }
 0x10e   : > { %587 = vrsqrt.f32 %v326_v31  ;;  %vm346_vm4 = vmor %vm344_vm3, %vm345_vm2  ;;  %vm334_vm6 = vweird.f32 %v326_v31 }
 0x10f   : > { %v340_v33 = vmul.f32 %v586_v30, %v339_v32 }
 0x111   : > { %v341_v34 = vmul.f32 0.5, %v340_v33 }
 0x113   : > { %v342_v35 = vsub.f32 1.5, %v341_v34 }
 0x114   : > { %v588_v36 = vpop.eup %587 }
 0x115   : > { %v343_v37 = vmul.f32 %v586_v30, %v342_v35  ;;  %v329_v38 = vmul.f32 %v588_v36, %v326_v31  ;;  %vm335_vm5 = vweird.f32 %v588_v36 }
 0x116   : > { %vm336_vm7 = vmor %vm334_vm6, %vm335_vm5 }
 0x117   : > { %v347_v40 = vsel %vm346_vm4, %v586_v30, %v343_v37  ;;  %v330_v41 = vmul.f32 %v588_v36, %v329_v38 }
 0x118   : > { %v349_v42 = vmul.f32 %v347_v40, %v315_v13 }
 0x119   : > { %v331_v44 = vmul.f32 0.5, %v330_v41 }
 0x11a   : > { %v354_v45 = vmul.f32 %v579_v39, %v349_v42 }
 0x11b   : > { %v332_v46 = vsub.f32 1.5, %v331_v44 }
 0x11c   : > { %v359_v47 = vadd.f32 %v580_v43, %v354_v45 }
 0x11d   : > { %v333_v48 = vmul.f32 %v588_v36, %v332_v46 }
 0x11e   : > { %540 = vmatmul.msk.f32.vlgmr.msra.gmra.mxu3 %vm298_vm0, %v359_v47 }
 0x11f   : > { %v337_v49 = vsel %vm336_vm7, %v588_v36, %v333_v48 }
 0x120   : > { %v348_v50 = vmul.f32 %v337_v49, %v314_v18 }
 0x122   : > { %v353_v51 = vmul.f32 %v579_v39, %v348_v50 }
 0x124   : > { %v358_v52 = vadd.f32 %v580_v43, %v353_v51 }
 0x126   : > { %539 = vmatmul.msk.f32.vlgmr.msra.gmra.mxu0 %vm298_vm0, %v358_v52 }
 0x1a1   : > { %v394_v62 = vpop.f32.mrf.mxu3 }
 0x1a2   : > { %v395_v63 = vadd.f32 %v581_v61, %v394_v62 }
 0x1a3   : > { %v391_v1 = vpop.f32.mrf.mxu0 }
 0x1a4   : > { %v398_v3 = vmul.f32 %v395_v63, %v395_v63  ;;  %v392_v4 = vadd.f32 %v581_v61, %v391_v1 }
 0x1a6   : > { %v400_v5 = vmul.f32 %v398_v3, %v395_v63  ;;  %v397_v6 = vmul.f32 %v392_v4, %v392_v4 }
 0x1a8   : > { %v402_v7 = vmul.f32 0.044715, %v400_v5  ;;  %v399_v8 = vmul.f32 %v397_v6, %v392_v4 }
 0x1aa   : > { %v404_v9 = vadd.f32 %v402_v7, %v395_v63  ;;  %v401_v10 = vmul.f32 0.044715, %v399_v8 }
 0x1ac   : > { %v403_v11 = vadd.f32 %v401_v10, %v392_v4  ;;  %v406_v12 = vmul.f32 0.7978846, %v404_v9 }
 0x1ae   : > { %589 = vtanh.f32 %v406_v12  ;;  %v405_v13 = vmul.f32 0.7978846, %v403_v11 }
 0x1b0   : > { %591 = vtanh.f32 %v405_v13 }
 0x1b4   : > { %v590_v14 = vpop.eup %589 }
 0x1b5   : > { %v410_v15 = vadd.f32 1.0, %v590_v14 }
 0x1b6   : > { %v592_v16 = vpop.eup %591 }
 0x1b7   : > { %v412_v17 = vmul.f32 0.5, %v410_v15  ;;  %v409_v18 = vadd.f32 1.0, %v592_v16 }
 0x1b9   : > { %v414_v19 = vmul.f32 %v412_v17, %v395_v63  ;;  %v411_v20 = vmul.f32 0.5, %v409_v18 }
 0x1bb   : > { %542 = vmatmul.msk.f32.vlgmr.msra.gmra.mxu2 %vm427_vm8, %v414_v19  ;;  %v413_v21 = vmul.f32 %v411_v20, %v392_v4 }
 0x1bd   : > { %541 = vmatmul.msk.f32.vlgmr.msra.gmra.mxu1 %vm427_vm8, %v413_v21 }
 0x23a   : > { %v451_v23 = vpop.f32.mrf.mxu1 }
 0x23b   : > { %v452_v24 = vadd.f32 %v582_v22, %v451_v23 }
 0x23d   : > { %v457_v25 = vadd.f32 %v452_v24, %v700_v2 }
 0x23e   : > { %v454_v26 = vpop.f32.mrf.mxu2 }
 0x23f   : > { %459 = vst.msk [vmem:[%s293_s26] sm:$0xff] %vm298_vm0, %v457_v25  ;;  %v455_v27 = vadd.f32 %v582_v22, %v454_v26 }
 0x241   : > { %v458_v28 = vadd.f32 %v455_v27, %v696_v0 }
 0x243   : > { %460 = vst.msk [vmem:[%s293_s26 + $0x8] sm:$0xff] %vm298_vm0, %v458_v28 }
 0x244 PF: > { %s18_s24 = sadd.s32 1, %s633_s24  }
 0x245   : > { %p15_p7 = scmp.ge.s32.totalorder %s18_s24, 4  }
 0x247   :  { %17 = sbr.rel (!%p15_p7) target bundleno = 1 (0x1), region = 83 }
 0x24c   :  { %482 = vsyncpa [#allocation3], 1 }
 0x24d   :  { %484 = vsyncpa [#allocation3 + $0x1], 1 }

// kernel: perceiver_io_forward.13
= control target key start
LH: loop header
LB: loop body
LE: loop exit
PB: predicated region body
PF: predicated region fallthrough
CT: control target
= control target key end

     0   :  { %s1584_s0 = inlined_call_operand.vmem [shape: f32[2,16,32], index: 0, kind: input, shape index: {}]   ;;  %s1585_s1 = inlined_call_operand.hbm [shape: f32[2,8,16], index: 1, kind: input, shape index: {}]   ;;  %s1586_s2 = inlined_call_operand.vmem [shape: f32[1,32], index: 2, kind: input, shape index: {}]   ;;  %s1587_s3 = inlined_call_operand.vmem [shape: f32[1,32], index: 3, kind: input, shape index: {}]   ;;  %s1588_s4 = inlined_call_operand.vmem [shape: f32[1,16], index: 4, kind: input, shape index: {}]   ;;  %s1589_s5 = inlined_call_operand.vmem [shape: f32[1,16], index: 5, kind: input, shape index: {}]   ;;  %s1590_s6 = inlined_call_operand.vmem [shape: f32[32,32], index: 6, kind: input, shape index: {}]   ;;  %s1591_s7 = inlined_call_operand.vmem [shape: f32[1,32], index: 7, kind: input, shape index: {}]   ;;  %s1592_s8 = inlined_call_operand.hbm [shape: f32[16,32], index: 8, kind: input, shape index: {}]   ;;  %s1593_s9 = inlined_call_operand.vmem [shape: f32[1,32], index: 9, kind: input, shape index: {}]   ;;  %s1594_s10 = inlined_call_operand.hbm [shape: f32[16,32], index: 10, kind: input, shape index: {}]   ;;  %s1595_s11 = inlined_call_operand.vmem [shape: f32[1,32], index: 11, kind: input, shape index: {}]   ;;  %s1596_s12 = inlined_call_operand.hbm [shape: f32[32,32], index: 12, kind: input, shape index: {}]   ;;  %s1597_s13 = inlined_call_operand.vmem [shape: f32[1,32], index: 13, kind: input, shape index: {}]   ;;  %s1598_s14 = inlined_call_operand.vmem [shape: f32[2,16,32], index: 14, kind: output, shape index: {}]  }
   0x1   :  { %1600 = sst [smem:[#allocation14_spill]] %s1592_s8 }
   0x2   :  { %1601 = sst [smem:[#allocation15_spill]] %s1594_s10 }
   0x3   :  { %1602 = sst [smem:[#allocation16_spill]] %s1596_s12 }
   0x4   :  { %19 = vsyncpa [#allocation3], 0 }
   0x5   :  { %21 = vsyncpa [#allocation3 + $0x1], 0 }
   0x6   :  { %22 = vsyncpa [#allocation5], 0 }
   0x7   :  { %23 = vsyncpa [#allocation8], 0  ;;  %s1369_s29 = smov 0   ;;  %s1371_s30 = smov 0  }
   0x8   :  { %s1373_s15 = smov 0   ;;  %s1375_s16 = smov 0  }
   0x9 LB: > { %1603 = sst [smem:[#allocation12_spill]] %s1281_s15  ;;  %s1393_s20 = sadd.s32 4294967295, %s1285_s16   ;;  %s1285_s16 = sphi %s1375_s16, %s1616_s16   ;;  %s1281_s15 = sphi %s1373_s15, %s1613_s15   ;;  %s1277_s30 = sphi %s1371_s30, %s1615_s30   ;;  %s1273_s29 = sphi %s1369_s29, %s1614_s29  }
   0xa   : > { %s1604_s8 = sld [smem:[#allocation14_spill]]  ;;  %p992_p0 = scmp.ge.s32.totalorder %s1285_s16, 1 }
   0xb   : > { %p76_p1 = scmp.eq.s32.totalorder %s1393_s20, 0  ;;  %p364_p2 = scmp.lt.s32.totalorder %s1285_s16, 3 }
   0xc   : > { %s1287_s22 = smov [#allocation4]   ;;  %s1606_s10 = sld [smem:[#allocation15_spill]] }
   0xd   : > { %p1398_p3 = pnand %p992_p0, %p364_p2  ;;  %s395_s23 = sshll.u32 %s1287_s22, 4  ;;  %s396_s23 = int_to_ptr.vmem [resolvable:$true] %s395_s23 }
   0xe   : > { %s1608_s12 = sld [smem:[#allocation16_spill]]  ;;  %s1288_s22 = smov [#allocation6]  }
   0xf   : > { %p1037_p4 = pneg %p1398_p3  ;;  %s412_s24 = sshll.u32 %s1288_s22, 4  ;;  %s413_s24 = int_to_ptr.vmem [resolvable:$true] %s412_s24 }
  0x10   : > { %s393_s19 = sshll.u32 %s1604_s8, 4  ;;  %s1289_s25 = smov 128   ;;  %s394_s19 = int_to_ptr.hbm [resolvable:$true] %s393_s19 }
  0x11   : > { %p1409_p5 = pnand %p1037_p4, %p76_p1  ;;  %s1290_s8 = smov 8  }
  0x12   : > { %s410_s26 = sshll.u32 %s1606_s10, 4  ;;  %s1291_s28 = smov [#allocation7]   ;;  %s411_s26 = int_to_ptr.hbm [resolvable:$true] %s410_s26 }
  0x13   : > { %1040 = dma.hbm_to_vmem [thread:$0]  (!%p1409_p5), %s394_s19, 256, %s396_s23, [#allocation5], %s1289_s25, %s1289_s25, %s1290_s8  }
  0x14   : > { %s427_s18 = sshll.u32 %s1608_s12, 4  ;;  %s429_s17 = sshll.u32 %s1291_s28, 4  ;;  %s428_s18 = int_to_ptr.hbm [resolvable:$true] %s427_s18  ;;  %s430_s17 = int_to_ptr.vmem [resolvable:$true] %s429_s17 }
  0x15   : > { %1043 = dma.hbm_to_vmem [thread:$0]  (!%p1409_p5), %s411_s26, 256, %s413_s24, [#allocation5], %s1289_s25, %s1289_s25, %s1290_s8  }
  0x16   : > { %1046 = dma.hbm_to_vmem [thread:$0]  (!%p1409_p5), %s428_s18, 512, %s430_s17, [#allocation8], %s1289_s25, %s1289_s25, %s1290_s8  }
  0x17   : > { %s1423_s22 = sadd.s32 1, %s1285_s16   ;;  %s62_s12 = sadd.s32 1, %s1281_s15 }
  0x18   : > { %s59_s10 = ssub.s32 %s1285_s16, %s1423_s22  ;;  %p69_p7 = scmp.ne.s32.totalorder %s1281_s15, %s1277_s30 }
  0x19   : > { %p60_p6 = scmp.eq.s32.totalorder %s59_s10, 0  ;;  %p70_p8 = scmp.eq.s32.totalorder %s1285_s16, 0 }
  0x1a   : > { %p75_p9 = scmp.ne.s32.totalorder %s1277_s30, %s1273_s29  ;;  %p1054_p12 = scmp.lt.s32.totalorder %s1285_s16, 2 }
  0x1b   : > { %s1434_s19 = scalar_select %p60_p6, %s1281_s15, %s62_s12  }
  0x1c   : > { %p71_p10 = por %p70_p8, %p69_p7  ;;  %p1438_p11 = por %p76_p1, %p75_p9 }
  0x1d   : > { %1609 = sst [smem:[#allocation13_spill]] %s1434_s19  ;;  %s454_s26 = sand.u32 1, %s1281_s15  }
  0x1e   : > { %s997_s8 = sshll.u32 %s454_s26, 3  ;;  %s998_s27 = sshll.u32 %s1285_s16, 3 }
  0x1f   : > { %s462_s25 = scalar_lea.hbm %s1585_s1, %s998_s27  ;;  %s458_s10 = scalar_lea.vmem [#allocation2], %s997_s8 }
  0x20   : > { %s466_s28 = sshll.u32 %s458_s10, 4  ;;  %s464_s17 = sshll.u32 %s462_s25, 4  ;;  %s467_s28 = int_to_ptr.vmem [resolvable:$true] %s466_s28  ;;  %s465_s17 = int_to_ptr.hbm [resolvable:$true] %s464_s17 }
  0x21   : > { %p1448_p13 = pnand %p1054_p12, %p71_p10  ;;  %s455_s29 = scalar_lea.sflag [#allocation3], %s454_s26 }
  0x22   : > { %s1213_s19 = sshra.s32 %s465_s17, 4  ;;  %s1220_s27 = scalar_lea.hbm %s1585_s1, 16  ;;  %s1214_s19 = int_to_ptr.hbm [resolvable:$true] %s1213_s19 }
  0x23   : > { %s1215_s15 = scalar_lea.hbm %s1214_s19, 8  ;;  %p1217_p2 = pneg %p1448_p13 }
  0x24   : > { %p1216_p0 = scmp.ne.s32.totalorder %s1214_s19, %s1215_s15  ;;  %p1221_p6 = scmp.lt.s32.totalorder %s1214_s19, %s1585_s1 }
  0x25   : > { %p1222_p7 = scmp.lt.s32.totalorder %s1220_s27, %s1215_s15 }
  0x26   : > { %p1218_p4 = pnand %p1217_p2, %p1216_p0 }
  0x27   : > { %p1223_p8 = por %p1222_p7, %p1221_p6 }
  0x28   : > { %p1219_p5 = pneg %p1218_p4 }
  0x2a   : > { %p1224_p9 = pnand %p1223_p8, %p1219_p5 }
  0x2c   : > { %1227 = shalt.err (!%p1224_p9)
}
  0x2d   : > { %1050 = dma.hbm_to_vmem [thread:$0]  (!%p1448_p13), %s465_s17, 128, %s467_s28, %s455_s29  }
  0x2e   : > { %475 = sbr.rel (%p1398_p3) target bundleno = 1120 (0x460), region = 76  ;;  %s477_s26 = sand.u32 (!%p1398_p3), 1, %s1277_s30  }
  0x2f   : > { %s1000_s25 = sshll.u32 (!%p1398_p3), %s477_s26, 3  ;;  %s478_s10 = scalar_lea.sflag (!%p1398_p3), [#allocation3], %s477_s26 }
  0x30   : > { %s481_s16 = scalar_lea.vmem (!%p1398_p3), [#allocation2], %s1000_s25 }
  0x33   : > { %1260 = dma.done.wait (%p1438_p11), %s478_s10, 128  }
  0x34   : > { %1262 = vsyncadd (%p1438_p11), %s478_s10, 4294967168 }
  0x35   : > { %1264 = dma.done.wait (%p76_p1), [#allocation5], 512  }
  0x36   : > { %1266 = vsyncadd (%p76_p1), [#allocation5], 4294966784 }
  0x37   : > { %1268 = dma.done.wait (%p76_p1), [#allocation8], 512  }
  0x38   : > { %1270 = vsyncadd (%p76_p1), [#allocation8], 4294966784  ;;  %p547_p3 = scmp.lt.s32.totalorder %s1393_s20, 1  ;;  %vm626_vm0 = vcmask 130048   ;;  %v623_v0 = vld [vmem:[%s481_s16] sm:$0xff]  ;;  %vm561_vm1 = vcmask 261120  }
  0x39   : > { %v627_v2 = vsel %vm626_vm0, %v623_v0, 0.0  ;;  %v1292_v6 = vmov 16.0   ;;  %v1293_v8 = vmov 32.0   ;;  %v702_v35 = vld [vmem:[#allocation4 + $0x8] sm:$0xff]  ;;  %v731_v36 = vld [vmem:[#allocation6 + $0x8] sm:$0xff]  ;;  %v701_v37 = vld [vmem:[#allocation4] sm:$0xff] }
  0x3a   : > { %s1618_s20 = smov (!%p547_p3, %s1393_s20), 1  ;;  %628 = vadd.xlane.f32.xlu0 %v627_v2  ;;  %1105 = vrcp.f32 %v1292_v6  ;;  %724 = vmatpush.msra.mxu1 %v702_v35  ;;  %v730_v38 = vld [vmem:[#allocation6] sm:$0xff]  ;;  %v667_v39 = vld [vmem:[%s1590_s6 + $0x18] sm:$0xff]  ;;  %v666_v40 = vld [vmem:[%s1590_s6 + $0x10] sm:$0xff]  ;;  %vm790_vm13 = vcmask 64512  }
  0x3b   : > { %s1021_s15 = sshll.u32 %s1618_s20, 4  ;;  %1107 = vrcp.f32 %v1293_v8  ;;  %750 = vmatpush.msra.mxu2 %v731_v36  ;;  %690 = vmatpush.msra.mxu0 %v667_v39  ;;  %v665_v43 = vld [vmem:[%s1590_s6 + $0x8] sm:$0xff]  ;;  %v664_v45 = vld [vmem:[%s1590_s6] sm:$0xff] }
  0x3c   : > { %s551_s23 = scalar_lea.vmem %s1584_s0, %s1021_s15  ;;  %725 = vmatpush.msra.mxu1 %v701_v37  ;;  %v1097_v60 = vld [vmem:[%s1588_s4] ss:$0 sm:$0xff]  ;;  %s556_s16 = scalar_lea.vmem %s1598_s14, %s1021_s15 }
  0x3d   : > { %v1487_v1 = vld [vmem:[%s551_s23 + $0x8] sm:$0xff]  ;;  %v1492_v4 = vld [vmem:[%s551_s23] sm:$0xff]  ;;  %751 = vmatpush.msra.mxu2 %v730_v38  ;;  %691 = vmatpush.msra.mxu0 %v666_v40 }
  0x3e   : > { %v565_v3 = vsel %vm561_vm1, %v1487_v1, 0.0  ;;  %v562_v5 = vsel %vm561_vm1, %v1492_v4, 0.0 }
  0x3f   : > { %566 = vadd.xlane.f32.xlu1 %v565_v3  ;;  %692 = vmatpush.msra.mxu0 %v665_v43 }
  0x40   : > { %v1106_v7 = vpop.eup %1105 }
  0x41   : > { %v631_v9 = vmul.f32 16.0, %v1106_v7  ;;  %v1108_v11 = vpop.eup %1107  ;;  %vm635_vm2 = vweird.f32 %v1106_v7  ;;  %693 = vmatpush.msra.mxu0 %v664_v45 }
  0x42   : > { %563 = vadd.xlane.f32.xlu0 %v562_v5  ;;  %v569_v13 = vmul.f32 32.0, %v1108_v11  ;;  %vm573_vm3 = vweird.f32 %v1108_v11 }
  0x43   : > { %v632_v10 = vsub.f32 1.0, %v631_v9 }
  0x44   : > { %v570_v15 = vsub.f32 1.0, %v569_v13 }
  0x45   : > { %v633_v12 = vmul.f32 %v1106_v7, %v632_v10  ;;  %v1099_v10 = vld [vmem:[%s1586_s2] ss:$0 sm:$0xff] }
  0x46   : > { %v571_v17 = vmul.f32 %v1108_v11, %v570_v15 }
  0x47   : > { %v634_v14 = vadd.f32 %v1106_v7, %v633_v12 }
  0x48   : > { %v572_v20 = vadd.f32 %v1108_v11, %v571_v17 }
  0x49   : > { %v636_v16 = vsel %vm635_vm2, %v1106_v7, %v634_v14  ;;  %v1100_v14 = vld [vmem:[%s1587_s3] ss:$0 sm:$0xff] }
  0x4a   : > { %v574_v23 = vsel %vm573_vm3, %v1108_v11, %v572_v20 }
  0xad   : > { %v629_v18 = vpop.xlane.xlu0 %628 }
  0xae   : > { %v637_v19 = vmul.f32 %v636_v16, %v629_v18 }
  0xb0   : > { %v638_v21 = vsub.f32 %v623_v0, %v637_v19  ;;  %v1098_v0 = vld [vmem:[%s1589_s5] ss:$0 sm:$0xff] }
  0xb2   : > { %v639_v22 = vmul.f32 %v638_v21, %v638_v21  ;;  %v567_v24 = vpop.xlane.xlu1 %566 }
  0xb3   : > { %v576_v28 = vmul.f32 %v574_v23, %v567_v24  ;;  %v1101_v24 = vld [vmem:[%s1593_s9] ss:$0 sm:$0xff] }
  0xb4   : > { %v640_v25 = vsel %vm626_vm0, %v639_v22, 0.0 }
  0xb5   : > { %641 = vadd.xlane.f32.xlu1 %v640_v25  ;;  %v564_v26 = vpop.xlane.xlu0 %563  ;;  %v1501_v30 = vsub.f32 %v1487_v1, %v576_v28  ;;  %v1103_v28 = vld [vmem:[%s1591_s7] ss:$0 sm:$0xff] }
  0xb6   : > { %v575_v27 = vmul.f32 %v574_v23, %v564_v26 }
  0xb7   : > { %v580_v33 = vmul.f32 %v1501_v30, %v1501_v30 }
  0xb8   : > { %v1498_v29 = vsub.f32 %v1492_v4, %v575_v27  ;;  %v1102_v27 = vld [vmem:[%s1595_s11] ss:$0 sm:$0xff] }
  0xb9   : > { %v584_v34 = vsel %vm561_vm1, %v580_v33, 0.0 }
  0xba   : > { %v579_v31 = vmul.f32 %v1498_v29, %v1498_v29 }
  0xbc   : > { %v581_v32 = vsel %vm561_vm1, %v579_v31, 0.0 }
  0xbd   : > { %582 = vadd.xlane.f32.xlu2 %v581_v32 }
  0xc5   : > { %585 = vadd.xlane.f32.xlu2 %v584_v34 }
 0x128   : > { %v642_v41 = vpop.xlane.xlu1 %641 }
 0x129   : > { %v643_v42 = vmul.f32 %v642_v41, %v636_v16 }
 0x12b   : > { %v644_v44 = vadd.f32 1e-05, %v643_v42 }
 0x12d   : > { %1109 = vrsqrt.f32 %v644_v44  ;;  %vm651_vm5 = vweird.f32 %v644_v44 }
 0x130   : > { %v583_v46 = vpop.xlane.xlu2 %582 }
 0x131   : > { %v587_v47 = vmul.f32 %v583_v46, %v574_v23 }
 0x133   : > { %v1110_v48 = vpop.eup %1109  ;;  %v589_v49 = vadd.f32 1e-05, %v587_v47 }
 0x134   : > { %v646_v50 = vmul.f32 %v1110_v48, %v644_v44  ;;  %vm652_vm4 = vweird.f32 %v1110_v48 }
 0x135   : > { %1111 = vrsqrt.f32 %v589_v49  ;;  %vm653_vm6 = vmor %vm651_vm5, %vm652_vm4  ;;  %vm597_vm8 = vweird.f32 %v589_v49 }
 0x136   : > { %v647_v51 = vmul.f32 %v1110_v48, %v646_v50 }
 0x138   : > { %v648_v52 = vmul.f32 0.5, %v647_v51  ;;  %v586_v53 = vpop.xlane.xlu2 %585  ;;  %v845_v51 = vld [vmem:[#allocation7 + $0x18] sm:$0xff] }
 0x139   : > { %v588_v54 = vmul.f32 %v586_v53, %v574_v23  ;;  %868 = vmatpush.msrb.mxu2 %v845_v51  ;;  %v843_v53 = vld [vmem:[#allocation7 + $0x8] sm:$0xff] }
 0x13a   : > { %v649_v55 = vsub.f32 1.5, %v648_v52  ;;  %v844_v52 = vld [vmem:[#allocation7 + $0x10] sm:$0xff] }
 0x13b   : > { %v1112_v56 = vpop.eup %1111  ;;  %v590_v57 = vadd.f32 1e-05, %v588_v54  ;;  %869 = vmatpush.msrb.mxu2 %v844_v52  ;;  %v842_v54 = vld [vmem:[#allocation7] sm:$0xff] }
 0x13c   : > { %v650_v58 = vmul.f32 %v1110_v48, %v649_v55  ;;  %v592_v59 = vmul.f32 %v1112_v56, %v589_v49  ;;  %vm598_vm7 = vweird.f32 %v1112_v56 }
 0x13d   : > { %1113 = vrsqrt.f32 %v590_v57  ;;  %vm599_vm9 = vmor %vm597_vm8, %vm598_vm7  ;;  %vm607_vm11 = vweird.f32 %v590_v57  ;;  %870 = vmatpush.msrb.mxu2 %v843_v53 }
 0x13e   : > { %v654_v61 = vsel %vm653_vm6, %v1110_v48, %v650_v58  ;;  %v593_v62 = vmul.f32 %v1112_v56, %v592_v59 }
 0x13f   : > { %v655_v63 = vmul.f32 %v654_v61, %v638_v21  ;;  %871 = vmatpush.msrb.mxu2 %v842_v54 }
 0x140   : > { %v594_v2 = vmul.f32 0.5, %v593_v62 }
 0x141   : > { %v659_v3 = vmul.f32 %v1097_v60, %v655_v63  ;;  %v1104_v63 = vld [vmem:[%s1597_s13] ss:$0 sm:$0xff] }
 0x142   : > { %v595_v5 = vsub.f32 1.5, %v594_v2 }
 0x143   : > { %v1114_v6 = vpop.eup %1113  ;;  %v663_v7 = vadd.f32 %v1098_v0, %v659_v3 }
 0x144   : > { %v596_v8 = vmul.f32 %v1112_v56, %v595_v5  ;;  %v602_v9 = vmul.f32 %v1114_v6, %v590_v57  ;;  %vm608_vm10 = vweird.f32 %v1114_v6 }
 0x145   : > { %1010 = vmatmul.msk.f32.vlgmr.msra.gmra.mxu1 %vm626_vm0, %v663_v7  ;;  %1011 = vmatmul.msk.f32.vlgmr.msra.gmra.mxu2 %vm626_vm0, %v663_v7  ;;  %vm609_vm12 = vmor %vm607_vm11, %vm608_vm10 }
 0x146   : > { %v600_v11 = vsel %vm599_vm9, %v1112_v56, %v596_v8  ;;  %v603_v12 = vmul.f32 %v1114_v6, %v602_v9 }
 0x147   : > { %v611_v13 = vmul.f32 %v600_v11, %v1498_v29 }
 0x148   : > { %v604_v15 = vmul.f32 0.5, %v603_v12 }
 0x149   : > { %v616_v16 = vmul.f32 %v1099_v10, %v611_v13 }
 0x14a   : > { %v605_v17 = vsub.f32 1.5, %v604_v15 }
 0x14b   : > { %v621_v18 = vadd.f32 %v1100_v14, %v616_v16 }
 0x14c   : > { %v606_v19 = vmul.f32 %v1114_v6, %v605_v17 }
 0x14d   : > { %1008 = vmatmul.msk.f32.vlgmr.msra.gmra.mxu0 %vm561_vm1, %v621_v18 }
 0x14e   : > { %v610_v20 = vsel %vm609_vm12, %v1114_v6, %v606_v19 }
 0x14f   : > { %v612_v21 = vmul.f32 %v610_v20, %v1501_v30 }
 0x151   : > { %v617_v22 = vmul.f32 %v1099_v10, %v612_v21 }
 0x153   : > { %v622_v23 = vadd.f32 %v1100_v14, %v617_v22 }
 0x155   : > { %1009 = vmatmul.msk.f32.gmra.mxu0 %vm561_vm1, %v622_v23 }
 0x1c2   : > { %v727_v25 = vpop.f32.mrf.mxu1 }
 0x1c3   : > { %v728_v26 = vadd.f32 %v1101_v24, %v727_v25 }
 0x1c5   : > { %1012 = vmatpush.xpose.msk.msra.mxu3 %vm561_vm1, %v728_v26 }
 0x1c8   : > { %v753_v29 = vpop.f32.mrf.mxu2 }
 0x1c9   : > { %v754_v30 = vadd.f32 %v1102_v27, %v753_v29 }
 0x1ca   : > { %v695_v31 = vpop.f32.mrf.mxu0 }
 0x1cb   : > { %v696_v32 = vadd.f32 %v1103_v28, %v695_v31  ;;  %834 = vmatpush.msrb.mxu1 %v754_v30 }
 0x1cd   : > { %1013 = vmatmul.msk.f32.vlgmr.msra.gmra.mxu3 %vm561_vm1, %v696_v32 }
 0x1d2   : > { %v698_v33 = vpop.f32.mrf.mxu0 }
 0x1d3   : > { %v699_v34 = vadd.f32 %v1103_v28, %v698_v33 }
 0x1d5   : > { %1014 = vmatmul.msk.f32.gmra.mxu3 %vm561_vm1, %v699_v34 }
 0x250   : > { %v782_v35 = vpop.f32.mrf.mxu3 }
 0x251   : > { %v788_v36 = vmul.f32 0.17677669, %v782_v35 }
 0x253   : > { %v791_v37 = vsel %vm790_vm13, %v788_v36, -inf }
 0x254   : > { %792 = vmax.xlane.f32.xlu0 %v791_v37 }
 0x258   : > { %v785_v38 = vpop.f32.mrf.mxu3 }
 0x259   : > { %v789_v39 = vmul.f32 0.17677669, %v785_v38 }
 0x25b   : > { %v794_v40 = vsel %vm790_vm13, %v789_v39, -inf }
 0x25c   : > { %795 = vmax.xlane.f32.xlu1 %v794_v40 }
 0x2c7   : > { %v793_v41 = vpop.xlane.xlu0 %792 }
 0x2c8   : > { %v797_v42 = vsub.f32 %v788_v36, %v793_v41 }
 0x2ca   : > { %v799_v43 = vmul.f32 1.442695, %v797_v42 }
 0x2cc   : > { %1115 = vpow2.f32 %v799_v43 }
 0x2cf   : > { %v796_v44 = vpop.xlane.xlu1 %795 }
 0x2d0   : > { %v798_v45 = vsub.f32 %v789_v39, %v796_v44 }
 0x2d2   : > { %v1116_v46 = vpop.eup %1115  ;;  %v801_v47 = vmul.f32 1.442695, %v798_v45 }
 0x2d3   : > { %v803_v48 = vsel %vm790_vm13, %v1116_v46, 0.0 }
 0x2d4   : > { %1117 = vpow2.f32 %v801_v47  ;;  %804 = vadd.xlane.f32.xlu2 %v803_v48 }
 0x2da   : > { %v1118_v49 = vpop.eup %1117 }
 0x2db   : > { %v806_v50 = vsel %vm790_vm13, %v1118_v49, 0.0 }
 0x2dc   : > { %807 = vadd.xlane.f32.xlu0 %v806_v50 }
 0x347   : > { %v805_v55 = vpop.xlane.xlu2 %804 }
 0x348   : > { %1119 = vrcp.f32 %v805_v55 }
 0x34e   : > { %v1120_v56 = vpop.eup %1119 }
 0x34f   : > { %v811_v57 = vmul.f32 %v1120_v56, %v1116_v46  ;;  %v808_v58 = vpop.xlane.xlu0 %807 }
 0x350   : > { %1121 = vrcp.f32 %v808_v58 }
 0x351   : > { %1015 = vmatmul.msk.f32.vlgmr.msrb.gmra.mxu1 %vm790_vm13, %v811_v57 }
 0x356   : > { %v1122_v59 = vpop.eup %1121 }
 0x357   : > { %v812_v60 = vmul.f32 %v1122_v59, %v1118_v49 }
 0x359   : > { %1016 = vmatmul.msk.f32.gmra.mxu1 %vm790_vm13, %v812_v60 }
 0x3ce   : > { %v836_v61 = vpop.f32.mrf.mxu1 }
 0x3cf   : > { %1017 = vmatmul.msk.f32.vlgmr.msrb.gmra.mxu2 %vm561_vm1, %v836_v61 }
 0x3d6   : > { %v839_v62 = vpop.f32.mrf.mxu1 }
 0x3d7   : > { %1018 = vmatmul.msk.f32.gmra.mxu2 %vm561_vm1, %v839_v62 }
 0x452   : > { %v873_v0 = vpop.f32.mrf.mxu2 }
 0x453   : > { %v874_v2 = vadd.f32 %v1104_v63, %v873_v0 }
 0x455   : > { %v879_v3 = vadd.f32 %v874_v2, %v1492_v4 }
 0x457   : > { %881 = vst.msk [vmem:[%s556_s16] sm:$0xff] %vm561_vm1, %v879_v3 }
 0x45a   : > { %v876_v5 = vpop.f32.mrf.mxu2 }
 0x45b   : > { %v877_v6 = vadd.f32 %v1104_v63, %v876_v5 }
 0x45d   : > { %v880_v7 = vadd.f32 %v877_v6, %v1487_v1 }
 0x45f   : > { %882 = vst.msk [vmem:[%s556_s16 + $0x8] sm:$0xff] %vm561_vm1, %v880_v7 }
 0x460 PF: > { %s1612_s21 = sld [smem:[#allocation12_spill]]  ;;  %p26_p1 = scmp.ge.s32.totalorder %s1423_s22, 4  }
 0x461   : > { %s1613_s15 = sld [smem:[#allocation13_spill]]  ;;  %s1614_s29 = smov %s1277_s30 }
 0x462   : > { %s1616_s16 = smov %s1423_s22  ;;  %28 = sbr.rel (!%p26_p1) target bundleno = 9 (0x9), region = 131 }
 0x466   : > { %s1615_s30 = smov %s1612_s21 }
 0x467   :  { %904 = vsyncpa [#allocation3], 1 }
 0x468   :  { %906 = vsyncpa [#allocation3 + $0x1], 1 }
 0x469   :  { %907 = vsyncpa [#allocation5], 1 }
 0x46a   :  { %908 = vsyncpa [#allocation8], 1 }

// kernel: perceiver_io_forward.17
= control target key start
LH: loop header
LB: loop body
LE: loop exit
PB: predicated region body
PF: predicated region fallthrough
CT: control target
= control target key end

     0   :  { %s1891_s0 = inlined_call_operand.vmem [shape: f32[2,8,32], index: 0, kind: input, shape index: {}]   ;;  %s1892_s1 = inlined_call_operand.vmem [shape: f32[2,16,32], index: 1, kind: input, shape index: {}]   ;;  %s1893_s2 = inlined_call_operand.vmem [shape: f32[1,32], index: 2, kind: input, shape index: {}]   ;;  %s1894_s3 = inlined_call_operand.hbm [shape: f32[1,32], index: 3, kind: input, shape index: {}]   ;;  %s1895_s4 = inlined_call_operand.hbm [shape: f32[1,32], index: 4, kind: input, shape index: {}]   ;;  %s1896_s5 = inlined_call_operand.hbm [shape: f32[1,32], index: 5, kind: input, shape index: {}]   ;;  %s1897_s6 = inlined_call_operand.vmem [shape: f32[32,32], index: 6, kind: input, shape index: {}]   ;;  %s1898_s7 = inlined_call_operand.hbm [shape: f32[1,32], index: 7, kind: input, shape index: {}]   ;;  %s1899_s8 = inlined_call_operand.vmem [shape: f32[32,32], index: 8, kind: input, shape index: {}]   ;;  %s1900_s9 = inlined_call_operand.hbm [shape: f32[1,32], index: 9, kind: input, shape index: {}]   ;;  %s1901_s10 = inlined_call_operand.vmem [shape: f32[32,32], index: 10, kind: input, shape index: {}]   ;;  %s1902_s11 = inlined_call_operand.hbm [shape: f32[1,32], index: 11, kind: input, shape index: {}]   ;;  %s1903_s12 = inlined_call_operand.hbm [shape: f32[32,32], index: 12, kind: input, shape index: {}]   ;;  %s1904_s13 = inlined_call_operand.hbm [shape: f32[1,32], index: 13, kind: input, shape index: {}]   ;;  %s1905_s14 = inlined_call_operand.hbm [shape: f32[2,8,32], index: 14, kind: output, shape index: {}]  }
   0x1   :  { %1912 = sst [smem:[#allocation29_spill]] %s1895_s4 }
   0x2   :  { %1913 = sst [smem:[#allocation30_spill]] %s1898_s7 }
   0x3   :  { %1914 = sst [smem:[#allocation31_spill]] %s1902_s11 }
   0x4   :  { %19 = vsyncpa [#allocation3], 0 }
   0x5   :  { %20 = vsyncpa [#allocation6], 0 }
   0x6   :  { %21 = vsyncpa [#allocation9], 0 }
   0x7   :  { %22 = vsyncpa [#allocation12], 0 }
   0x8   :  { %23 = vsyncpa [#allocation15], 0 }
   0x9   :  { %24 = vsyncpa [#allocation4], 0 }
   0xa   :  { %26 = vsyncpa [#allocation4 + $0x1], 0  ;;  %s1655_s29 = smov 0   ;;  %s1657_s30 = smov 0  }
   0xb   :  { %s1659_s15 = smov 0   ;;  %s1661_s16 = smov 0  }
   0xc LB: > { %1915 = sst [smem:[#allocation23_spill]] %s1555_s29  ;;  %s1676_s17 = sadd.s32 4294967295, %s1567_s16   ;;  %s1567_s16 = sphi %s1661_s16, %s1931_s16   ;;  %s1563_s15 = sphi %s1659_s15, %s1933_s15   ;;  %s1559_s30 = sphi %s1657_s30, %s1935_s30   ;;  %s1555_s29 = sphi %s1655_s29, %s1934_s29  }
   0xd   : > { %1916 = sst [smem:[#allocation24_spill]] %s1563_s15  ;;  %s1063_s18 = sadd.s32 4294967294, %s1567_s16  }
   0xe   : > { %1917 = sst [smem:[#allocation25_spill]] %s1567_s16  ;;  %s1680_s19 = sadd.s32 1, %s1567_s16  }
   0xf   : > { %1918 = sst [smem:[#allocation26_spill]] %s1680_s19  ;;  %s343_s20 = sadd.s32 1, %s1563_s15 }
  0x10   : > { %s340_s21 = ssub.s32 %s1567_s16, %s1680_s19  ;;  %p353_p0 = scmp.ne.s32.totalorder %s1563_s15, %s1559_s30 }
  0x11   : > { %p341_p1 = scmp.eq.s32.totalorder %s340_s21, 0  ;;  %p354_p2 = scmp.eq.s32.totalorder %s1676_s17, 1 }
  0x12   : > { %p359_p3 = scmp.ne.s32.totalorder %s1559_s30, %s1555_s29  ;;  %p360_p4 = scmp.eq.s32.totalorder %s1063_s18, 1 }
  0x13   : > { %s1691_s22 = scalar_select %p341_p1, %s1563_s15, %s343_s20  }
  0x14   : > { %p1693_p5 = por %p354_p2, %p353_p0  ;;  %p1697_p6 = por %p360_p4, %p359_p3 }
  0x15   : > { %1919 = sst [smem:[#allocation27_spill]] %s1691_s22  ;;  %p1064_p7 = scmp.ge.s32.totalorder %s1567_s16, 1 }
  0x16   : > { %s1921_s24 = scalar_select %p1697_p6, 1, 0 }
  0x17   : > { %p367_p8 = scmp.lt.s32.totalorder %s1567_s16, 3  ;;  %p1165_p9 = scmp.eq.s32.totalorder %s1676_s17, 0 }
  0x18   : > { %1922 = sst [smem:[#allocation28_spill]] %s1921_s24  ;;  %s1569_s18 = smov [#allocation5]  }
  0x19   : > { %p1704_p10 = pnand %p1064_p7, %p367_p8  ;;  %s1924_s4 = sld [smem:[#allocation29_spill]] }
  0x1a   : > { %s396_s20 = sshll.u32 %s1569_s18, 4  ;;  %s1925_s7 = sld [smem:[#allocation30_spill]]  ;;  %s397_s20 = int_to_ptr.vmem [resolvable:$true] %s396_s20 }
  0x1b   : > { %p1136_p11 = pneg %p1704_p10  ;;  %s1927_s11 = sld [smem:[#allocation31_spill]] }
  0x1c   : > { %s1570_s24 = smov [#allocation8]   ;;  %s1571_s29 = smov [#allocation11]  }
  0x1d   : > { %p1718_p12 = pnand %p1165_p9, %p1136_p11  ;;  %s423_s18 = sshll.u32 %s1570_s24, 4  ;;  %s424_s18 = int_to_ptr.vmem [resolvable:$true] %s423_s18 }
  0x1e   : > { %s453_s16 = sshll.u32 %s1571_s29, 4  ;;  %s1572_s26 = smov [#allocation2]   ;;  %s454_s16 = int_to_ptr.vmem [resolvable:$true] %s453_s16 }
  0x1f   : > { %s394_s28 = sshll.u32 %s1924_s4, 4  ;;  %s384_s24 = sshll.u32 %s1572_s26, 4  ;;  %s395_s28 = int_to_ptr.hbm [resolvable:$true] %s394_s28  ;;  %s385_s24 = int_to_ptr.vmem [resolvable:$true] %s384_s24 }
  0x20   : > { %s421_s15 = sshll.u32 %s1925_s7, 4  ;;  %s382_s7 = sshll.u32 %s1894_s3, 4  ;;  %s422_s15 = int_to_ptr.hbm [resolvable:$true] %s421_s15  ;;  %s383_s7 = int_to_ptr.hbm [resolvable:$true] %s382_s7 }
  0x21   : > { %s451_s4 = sshll.u32 %s1927_s11, 4  ;;  %s1573_s29 = smov [#allocation7]   ;;  %s452_s4 = int_to_ptr.hbm [resolvable:$true] %s451_s4 }
  0x22   : > { %1142 = dma.hbm_to_vmem [thread:$0]  (!%p1718_p12), %s395_s28, 16, %s397_s20, [#allocation6]  }
  0x23   : > { %1148 = dma.hbm_to_vmem [thread:$0]  (!%p1718_p12), %s422_s15, 16, %s424_s18, [#allocation9]  }
  0x24   : > { %1154 = dma.hbm_to_vmem [thread:$0]  (!%p1718_p12), %s452_s4, 16, %s454_s16, [#allocation12]  }
  0x25   : > { %s406_s28 = sshll.u32 %s1896_s5, 4  ;;  %s436_s18 = sshll.u32 %s1900_s9, 4  ;;  %s407_s28 = int_to_ptr.hbm [resolvable:$true] %s406_s28  ;;  %s437_s18 = int_to_ptr.hbm [resolvable:$true] %s436_s18 }
  0x26   : > { %1139 = dma.hbm_to_vmem [thread:$0]  (!%p1718_p12), %s383_s7, 16, %s385_s24, [#allocation3]  }
  0x27   : > { %s408_s22 = sshll.u32 %s1573_s29, 4  ;;  %s1574_s4 = smov [#allocation10]   ;;  %s409_s22 = int_to_ptr.vmem [resolvable:$true] %s408_s22 }
  0x28   : > { %1145 = dma.hbm_to_vmem [thread:$0]  (!%p1718_p12), %s407_s28, 16, %s409_s22, [#allocation6]  }
  0x29   : > { %s438_s16 = sshll.u32 %s1574_s4, 4  ;;  %s462_s26 = sshll.u32 %s1903_s12, 4  ;;  %s439_s16 = int_to_ptr.vmem [resolvable:$true] %s438_s16  ;;  %s463_s26 = int_to_ptr.hbm [resolvable:$true] %s462_s26 }
  0x2a   : > { %1151 = dma.hbm_to_vmem [thread:$0]  (!%p1718_p12), %s437_s18, 16, %s439_s16, [#allocation9]  }
  0x2b   : > { %s1575_s7 = smov [#allocation13]   ;;  %s477_s20 = sshll.u32 %s1904_s13, 4  ;;  %s478_s20 = int_to_ptr.hbm [resolvable:$true] %s477_s20 }
  0x2c   : > { %s464_s24 = sshll.u32 %s1575_s7, 4  ;;  %s1576_s29 = smov 128   ;;  %s465_s24 = int_to_ptr.vmem [resolvable:$true] %s464_s24 }
  0x2d   : > { %s1577_s28 = smov 8   ;;  %s1578_s22 = smov [#allocation14]  }
  0x2e   : > { %1157 = dma.hbm_to_vmem [thread:$0]  (!%p1718_p12), %s463_s26, 512, %s465_s24, [#allocation12], %s1576_s29, %s1576_s29, %s1577_s28  }
  0x2f   : > { %s479_s4 = sshll.u32 %s1578_s22, 4  ;;  %507 = sbr.rel (%p1704_p10) target bundleno = 1131 (0x46b), region = 76  ;;  %s480_s4 = int_to_ptr.vmem [resolvable:$true] %s479_s4 }
  0x30   : > { %1160 = dma.hbm_to_vmem [thread:$0]  (!%p1718_p12), %s478_s20, 16, %s480_s4, [#allocation15]  }
  0x34   : > { %1530 = dma.done.wait (%p1165_p9), [#allocation3], 16  }
  0x35   : > { %1532 = vsyncadd (%p1165_p9), [#allocation3], 4294967280 }
  0x36   : > { %1534 = dma.done.wait (%p1165_p9), [#allocation6], 32  }
  0x37   : > { %1536 = vsyncadd (%p1165_p9), [#allocation6], 4294967264 }
  0x38   : > { %1538 = dma.done.wait (%p1165_p9), [#allocation9], 32  }
  0x39   : > { %1540 = vsyncadd (%p1165_p9), [#allocation9], 4294967264 }
  0x3a   : > { %1542 = dma.done.wait (%p1165_p9), [#allocation12], 528  }
  0x3b   : > { %1544 = vsyncadd (%p1165_p9), [#allocation12], 4294966768 }
  0x3c   : > { %1546 = dma.done.wait (%p1165_p9), [#allocation15], 16  }
  0x3d   : > { %1548 = vsyncadd (%p1165_p9), [#allocation15], 4294967280  ;;  %p593_p13 = scmp.lt.s32.totalorder %s1676_s17, 1  ;;  %vm605_vm0 = vcmask 261120   ;;  %v1579_v6 = vmov 32.0   ;;  %v735_v28 = vld [vmem:[%s1899_s8 + $0x18] sm:$0xff] }
  0x3e   : > { %1233 = vrcp.f32 %v1579_v6  ;;  %v772_v29 = vld [vmem:[%s1901_s10 + $0x18] sm:$0xff]  ;;  %758 = vmatpush.msra.mxu1 %v735_v28  ;;  %v734_v30 = vld [vmem:[%s1899_s8 + $0x10] sm:$0xff]  ;;  %v733_v32 = vld [vmem:[%s1899_s8 + $0x8] sm:$0xff]  ;;  %vm830_vm11 = vcmask 130048   ;;  %s590_s16 = sand.u32 1, %s1559_s30  }
  0x3f   : > { %s594_s19 = scalar_select %p593_p13, %s1676_s17, 1  ;;  %789 = vmatpush.msra.mxu2 %v772_v29  ;;  %v771_v31 = vld [vmem:[%s1901_s10 + $0x10] sm:$0xff]  ;;  %v770_v33 = vld [vmem:[%s1901_s10 + $0x8] sm:$0xff]  ;;  %v732_v34 = vld [vmem:[%s1899_s8] sm:$0xff] }
  0x40   : > { %759 = vmatpush.msra.mxu1 %v734_v30  ;;  %v769_v35 = vld [vmem:[%s1901_s10] sm:$0xff]  ;;  %v704_v39 = vld [vmem:[%s1897_s6 + $0x18] sm:$0xff]  ;;  %v703_v40 = vld [vmem:[%s1897_s6 + $0x10] sm:$0xff]  ;;  %s1083_s11 = sshll.u32 %s590_s16, 3  ;;  %s898_s29 = scalar_lea.sflag [#allocation4], %s590_s16 }
  0x41   : > { %s1101_s25 = sshll.u32 %s594_s19, 4  ;;  %s1084_s18 = sshll.u32 %s594_s19, 3  ;;  %790 = vmatpush.msra.mxu2 %v771_v31  ;;  %724 = vmatpush.msra.mxu0 %v704_v39  ;;  %v702_v41 = vld [vmem:[%s1897_s6 + $0x8] sm:$0xff]  ;;  %v701_v44 = vld [vmem:[%s1897_s6] sm:$0xff] }
  0x42   : > { %s601_s21 = scalar_lea.vmem %s1892_s1, %s1101_s25  ;;  %s596_s24 = scalar_lea.vmem %s1891_s0, %s1084_s18  ;;  %760 = vmatpush.msra.mxu1 %v733_v32  ;;  %v1225_v57 = vld [vmem:[#allocation5] ss:$0 sm:$0xff]  ;;  %v1226_v61 = vld [vmem:[#allocation7] ss:$0 sm:$0xff] }
  0x43   : > { %v643_v0 = vld [vmem:[%s601_s21] sm:$0xff]  ;;  %v644_v4 = vld [vmem:[%s601_s21 + $0x8] sm:$0xff]  ;;  %791 = vmatpush.msra.mxu2 %v770_v33  ;;  %725 = vmatpush.msra.mxu0 %v703_v40  ;;  %s1098_s21 = sshll.u32 %s1676_s17, 3  ;;  %s592_s27 = scalar_lea.vmem [#allocation16], %s1083_s11 }
  0x44   : > { %v602_v1 = vld [vmem:[%s596_s24] sm:$0xff]  ;;  %v647_v2 = vsel %vm605_vm0, %v643_v0, 0.0  ;;  %v650_v5 = vsel %vm605_vm0, %v644_v4, 0.0  ;;  %v1234_v7 = vpop.eup %1233  ;;  %761 = vmatpush.msra.mxu1 %v732_v34  ;;  %s908_s24 = scalar_lea.hbm %s1905_s14, %s1098_s21  ;;  %s910_s15 = sshll.u32 %s592_s27, 4  ;;  %s911_s15 = int_to_ptr.vmem [resolvable:$true] %s910_s15 }
  0x45   : > { %v606_v3 = vsel %vm605_vm0, %v602_v1, 0.0  ;;  %648 = vadd.xlane.f32.xlu0 %v647_v2  ;;  %v610_v8 = vmul.f32 32.0, %v1234_v7  ;;  %vm614_vm1 = vweird.f32 %v1234_v7  ;;  %792 = vmatpush.msra.mxu2 %v769_v35  ;;  %v868_v40 = vld [vmem:[#allocation13 + $0x18] sm:$0xff]  ;;  %s912_s20 = sshll.u32 %s908_s24, 4  ;;  %s1505_s19 = scalar_lea.hbm %s1905_s14, 16  ;;  %s913_s20 = int_to_ptr.hbm [resolvable:$true] %s912_s20 }
  0x46   : > { %607 = vadd.xlane.f32.xlu1 %v606_v3  ;;  %726 = vmatpush.msra.mxu0 %v702_v41  ;;  %v867_v41 = vld [vmem:[#allocation13 + $0x10] sm:$0xff]  ;;  %s1499_s28 = sshra.s32 %s913_s20, 4  ;;  %s1500_s28 = int_to_ptr.hbm [resolvable:$true] %s1499_s28 }
  0x47   : > { %v611_v9 = vsub.f32 1.0, %v610_v8  ;;  %s1501_s22 = scalar_lea.hbm %s1500_s28, 8  ;;  %p1506_p3 = scmp.lt.s32.totalorder %s1500_s28, %s1905_s14 }
  0x48   : > { %727 = vmatpush.msra.mxu0 %v701_v44  ;;  %p1502_p0 = scmp.ne.s32.totalorder %s1500_s28, %s1501_s22  ;;  %p1507_p4 = scmp.lt.s32.totalorder %s1505_s19, %s1501_s22 }
  0x49   : > { %v612_v10 = vmul.f32 %v1234_v7, %v611_v9 }
  0x4a   : > { %p1503_p1 = pnand %p1502_p0, %p1693_p5  ;;  %p1508_p7 = por %p1507_p4, %p1506_p3 }
  0x4b   : > { %v613_v11 = vadd.f32 %v1234_v7, %v612_v10 }
  0x4c   : > { %p1504_p2 = pneg %p1503_p1 }
  0x4d   : > { %651 = vadd.xlane.f32.xlu0 %v650_v5  ;;  %v615_v12 = vsel %vm614_vm1, %v1234_v7, %v613_v11 }
  0x4e   : > { %p1509_p8 = pnand %p1508_p7, %p1504_p2 }
  0xb8   : > { %v649_v13 = vpop.xlane.xlu0 %648 }
  0xb9   : > { %v653_v14 = vmul.f32 %v649_v13, %v615_v12  ;;  %v608_v17 = vpop.xlane.xlu1 %607  ;;  %v1227_v13 = vld [vmem:[%s1893_s2] ss:$0 sm:$0xff] }
  0xba   : > { %v616_v21 = vmul.f32 %v615_v12, %v608_v17 }
  0xbb   : > { %v1789_v15 = vsub.f32 %v643_v0, %v653_v14 }
  0xbc   : > { %v1798_v24 = vsub.f32 %v602_v1, %v616_v21  ;;  %v1229_v21 = vld [vmem:[#allocation10] ss:$0 sm:$0xff] }
  0xbd   : > { %v657_v16 = vmul.f32 %v1789_v15, %v1789_v15 }
  0xbe   : > { %v618_v26 = vmul.f32 %v1798_v24, %v1798_v24 }
  0xbf   : > { %v659_v18 = vsel %vm605_vm0, %v657_v16, 0.0  ;;  %v1228_v16 = vld [vmem:[#allocation2] ss:$0 sm:$0xff] }
  0xc0   : > { %v652_v19 = vpop.xlane.xlu0 %651  ;;  %660 = vadd.xlane.f32.xlu1 %v659_v18  ;;  %v619_v27 = vsel %vm605_vm0, %v618_v26, 0.0  ;;  %v1230_v26 = vld [vmem:[#allocation11] ss:$0 sm:$0xff] }
  0xc1   : > { %v654_v20 = vmul.f32 %v652_v19, %v615_v12 }
  0xc3   : > { %v1794_v22 = vsub.f32 %v644_v4, %v654_v20 }
  0xc5   : > { %v658_v23 = vmul.f32 %v1794_v22, %v1794_v22 }
  0xc7   : > { %v662_v25 = vsel %vm605_vm0, %v658_v23, 0.0 }
  0xc8   : > { %663 = vadd.xlane.f32.xlu2 %v662_v25 }
  0xd0   : > { %620 = vadd.xlane.f32.xlu2 %v619_v27  ;;  %v1231_v27 = vld [vmem:[#allocation8] ss:$0 sm:$0xff] }
 0x133   : > { %v661_v36 = vpop.xlane.xlu1 %660 }
 0x134   : > { %v665_v37 = vmul.f32 %v661_v36, %v615_v12 }
 0x136   : > { %v667_v38 = vadd.f32 1e-05, %v665_v37 }
 0x138   : > { %1235 = vrsqrt.f32 %v667_v38  ;;  %vm675_vm3 = vweird.f32 %v667_v38 }
 0x13b   : > { %v664_v42 = vpop.xlane.xlu2 %663 }
 0x13c   : > { %v666_v43 = vmul.f32 %v664_v42, %v615_v12  ;;  %v866_v42 = vld [vmem:[#allocation13 + $0x8] sm:$0xff] }
 0x13e   : > { %v1236_v45 = vpop.eup %1235  ;;  %v668_v46 = vadd.f32 1e-05, %v666_v43  ;;  %v865_v43 = vld [vmem:[#allocation13] sm:$0xff] }
 0x13f   : > { %v670_v47 = vmul.f32 %v1236_v45, %v667_v38  ;;  %vm676_vm2 = vweird.f32 %v1236_v45 }
 0x140   : > { %1237 = vrsqrt.f32 %v668_v46  ;;  %vm677_vm4 = vmor %vm675_vm3, %vm676_vm2  ;;  %vm685_vm6 = vweird.f32 %v668_v46 }
 0x141   : > { %v671_v48 = vmul.f32 %v1236_v45, %v670_v47 }
 0x143   : > { %v672_v49 = vmul.f32 0.5, %v671_v48  ;;  %v621_v50 = vpop.xlane.xlu2 %620  ;;  %v1232_v48 = vld [vmem:[#allocation14] ss:$0 sm:$0xff] }
 0x144   : > { %v622_v51 = vmul.f32 %v621_v50, %v615_v12 }
 0x145   : > { %v673_v52 = vsub.f32 1.5, %v672_v49 }
 0x146   : > { %v1238_v53 = vpop.eup %1237  ;;  %v623_v54 = vadd.f32 1e-05, %v622_v51 }
 0x147   : > { %v674_v55 = vmul.f32 %v1236_v45, %v673_v52  ;;  %v680_v56 = vmul.f32 %v1238_v53, %v668_v46  ;;  %vm686_vm5 = vweird.f32 %v1238_v53 }
 0x148   : > { %1239 = vrsqrt.f32 %v623_v54  ;;  %vm687_vm7 = vmor %vm685_vm6, %vm686_vm5  ;;  %vm630_vm9 = vweird.f32 %v623_v54 }
 0x149   : > { %v678_v58 = vsel %vm677_vm4, %v1236_v45, %v674_v55  ;;  %v681_v59 = vmul.f32 %v1238_v53, %v680_v56 }
 0x14a   : > { %v689_v60 = vmul.f32 %v678_v58, %v1789_v15 }
 0x14b   : > { %v682_v62 = vmul.f32 0.5, %v681_v59 }
 0x14c   : > { %v694_v63 = vmul.f32 %v1225_v57, %v689_v60 }
 0x14d   : > { %v683_v0 = vsub.f32 1.5, %v682_v62 }
 0x14e   : > { %v1240_v1 = vpop.eup %1239  ;;  %v699_v2 = vadd.f32 %v1226_v61, %v694_v63 }
 0x14f   : > { %v684_v3 = vmul.f32 %v1238_v53, %v683_v0  ;;  %v625_v4 = vmul.f32 %v1240_v1, %v623_v54  ;;  %vm631_vm8 = vweird.f32 %v1240_v1 }
 0x150   : > { %1088 = vmatmul.msk.f32.vlgmr.msra.gmra.mxu1 %vm605_vm0, %v699_v2  ;;  %1090 = vmatmul.msk.f32.vlgmr.msra.gmra.mxu2 %vm605_vm0, %v699_v2  ;;  %vm632_vm10 = vmor %vm630_vm9, %vm631_vm8 }
 0x151   : > { %v688_v5 = vsel %vm687_vm7, %v1238_v53, %v684_v3  ;;  %v626_v6 = vmul.f32 %v1240_v1, %v625_v4 }
 0x152   : > { %v690_v7 = vmul.f32 %v688_v5, %v1794_v22 }
 0x153   : > { %v627_v8 = vmul.f32 0.5, %v626_v6 }
 0x154   : > { %v695_v9 = vmul.f32 %v1225_v57, %v690_v7 }
 0x155   : > { %v628_v10 = vsub.f32 1.5, %v627_v8 }
 0x156   : > { %v700_v11 = vadd.f32 %v1226_v61, %v695_v9 }
 0x157   : > { %v629_v12 = vmul.f32 %v1240_v1, %v628_v10 }
 0x158   : > { %1089 = vmatmul.msk.f32.gmra.mxu1 %vm605_vm0, %v700_v11  ;;  %1091 = vmatmul.msk.f32.gmra.mxu2 %vm605_vm0, %v700_v11 }
 0x159   : > { %v633_v14 = vsel %vm632_vm10, %v1240_v1, %v629_v12 }
 0x15a   : > { %v634_v15 = vmul.f32 %v633_v14, %v1798_v24 }
 0x15c   : > { %v638_v17 = vmul.f32 %v1227_v13, %v634_v15 }
 0x15e   : > { %v642_v18 = vadd.f32 %v1228_v16, %v638_v17 }
 0x160   : > { %1087 = vmatmul.msk.f32.vlgmr.msra.gmra.mxu0 %vm605_vm0, %v642_v18 }
 0x1cd   : > { %v763_v19 = vpop.f32.mrf.mxu1 }
 0x1ce   : > { %v764_v25 = vadd.f32 %v1229_v21, %v763_v19 }
 0x1d3   : > { %v794_v20 = vpop.f32.mrf.mxu2 }
 0x1d4   : > { %v795_v30 = vadd.f32 %v1230_v26, %v794_v20 }
 0x1d5   : > { %v766_v22 = vpop.f32.mrf.mxu1 }
 0x1d6   : > { %v767_v23 = vadd.f32 %v1229_v21, %v766_v22 }
 0x1d8   : > { %1092 = vmatpush.xpose.msk.msra.mxu3 %vm605_vm0, %v767_v23 }
 0x1db   : > { %v797_v28 = vpop.f32.mrf.mxu2 }
 0x1dc   : > { %v798_v29 = vadd.f32 %v1230_v26, %v797_v28  ;;  %1093 = vmatpush.xpose.msk.msra.mxu3 %vm605_vm0, %v764_v25 }
 0x1dd   : > { %v729_v24 = vpop.f32.mrf.mxu0 }
 0x1de   : > { %v730_v31 = vadd.f32 %v1231_v27, %v729_v24  ;;  %859 = vmatpush.msrb.mxu0 %v798_v29 }
 0x1e0   : > { %1094 = vmatmul.msk.f32.vlgmr.msra.gmra.mxu3 %vm605_vm0, %v730_v31  ;;  %860 = vmatpush.msrb.mxu0 %v795_v30 }
 0x1e1   : > { %888 = vmatpush.msrb.mxu3 %v868_v40 }
 0x1e3   : > { %889 = vmatpush.msrb.mxu3 %v867_v41 }
 0x1e5   : > { %890 = vmatpush.msrb.mxu3 %v866_v42 }
 0x1e7   : > { %891 = vmatpush.msrb.mxu3 %v865_v43 }
 0x263   : > { %v826_v32 = vpop.f32.mrf.mxu3 }
 0x264   : > { %v829_v33 = vmul.f32 0.17677669, %v826_v32 }
 0x266   : > { %v831_v34 = vsel %vm830_vm11, %v829_v33, -inf }
 0x267   : > { %832 = vmax.xlane.f32.xlu0 %v831_v34 }
 0x2da   : > { %v833_v35 = vpop.xlane.xlu0 %832 }
 0x2db   : > { %v834_v36 = vsub.f32 %v829_v33, %v833_v35 }
 0x2dd   : > { %v835_v37 = vmul.f32 1.442695, %v834_v36 }
 0x2df   : > { %1241 = vpow2.f32 %v835_v37 }
 0x2e5   : > { %v1242_v38 = vpop.eup %1241 }
 0x2e6   : > { %v837_v39 = vsel %vm830_vm11, %v1242_v38, 0.0 }
 0x2e7   : > { %838 = vadd.xlane.f32.xlu1 %v837_v39 }
 0x35a   : > { %v839_v44 = vpop.xlane.xlu1 %838 }
 0x35b   : > { %1243 = vrcp.f32 %v839_v44 }
 0x361   : > { %v1244_v45 = vpop.eup %1243 }
 0x362   : > { %v841_v46 = vmul.f32 %v1244_v45, %v1242_v38 }
 0x364   : > { %1095 = vmatmul.msk.f32.vlgmr.msrb.gmra.mxu0 %vm830_vm11, %v841_v46 }
 0x3e1   : > { %v862_v47 = vpop.f32.mrf.mxu0 }
 0x3e2   : > { %1096 = vmatmul.msk.f32.vlgmr.msrb.gmra.mxu3 %vm605_vm0, %v862_v47 }
 0x465   : > { %v893_v49 = vpop.f32.mrf.mxu3 }
 0x466   : > { %v894_v50 = vadd.f32 %v1232_v48, %v893_v49 }
 0x468   : > { %896 = vst.msk [vmem:[%s592_s27] sm:$0xff] %vm605_vm0, %v894_v50 }
 0x469   : > { %1512 = shalt.err (!%p1509_p8)
}
 0x46a   : > { %1134 = dma.vmem_to_hbm [thread:$0]  (%p1693_p5), %s911_s15, 128, %s913_s20, %s898_s29  }
 0x46b PF: > { %s1928_s16 = sld [smem:[#allocation25_spill]] }
 0x46c   : > { %s1929_s11 = sld [smem:[#allocation23_spill]] }
 0x471   : > { %p1181_p9 = scmp.ge.s32.totalorder %s1928_s16, 2 }
 0x472   : > { %s924_s26 = sand.u32 1, %s1929_s11  }
 0x473   : > { %p1162_p10 = pnand %p1181_p9, %p1697_p6  ;;  %s925_s7 = scalar_lea.sflag [#allocation4], %s924_s26 }
 0x475   : > { %p1163_p11 = pneg %p1162_p10 }
 0x477   : > { %1550 = dma.done.wait (%p1163_p11), %s925_s7, 128  }
 0x478   : > { %1552 = vsyncadd (%p1163_p11), %s925_s7, 4294967168  ;;  %s1931_s16 = sld [smem:[#allocation26_spill]]  ;;  %s1934_s29 = smov %s1559_s30 }
 0x479   : > { %s1932_s24 = sld [smem:[#allocation24_spill]] }
 0x47a   : > { %s1933_s15 = sld [smem:[#allocation27_spill]] }
 0x47e   : > { %p29_p12 = scmp.ge.s32.totalorder %s1931_s16, 4  }
 0x47f   : > { %s1935_s30 = smov %s1932_s24 }
 0x480   :  { %31 = sbr.rel (!%p29_p12) target bundleno = 12 (0xc), region = 147 }
 0x485   :  { %931 = vsyncpa [#allocation3], 1 }
 0x486   :  { %933 = vsyncpa [#allocation3 + $0x1], 1 }
 0x487   :  { %934 = vsyncpa [#allocation6], 1 }
 0x488   :  { %935 = vsyncpa [#allocation9], 1 }
 0x489   :  { %936 = vsyncpa [#allocation12], 1 }
 0x48a   :  { %937 = vsyncpa [#allocation15], 1 }
 0x48b   :  { %938 = vsyncpa [#allocation4], 1 }
 0x48c   :  { %940 = vsyncpa [#allocation4 + $0x1], 1 }

</bundles_post_ra>
